<compile_context>
chip_gen: v7x
topology: tpu7x:2x2x1
jax: 0.10.0
libtpu: 0.0.40
codegen_flags: <defaults>
</compile_context>

<pallas_src>
import functools
import math

import jax
import jax.numpy as jnp
from jax import lax
from jax.experimental import pallas as pl
from jax.experimental.pallas import tpu as pltpu

# ---------------- scaled-down BERT config ----------------
VOCAB = 128
TYPE_VOCAB = 2
MAX_POS = 16
HIDDEN = 64
N_LAYERS = 2
N_HEADS = 4
HEAD_DIM = HIDDEN // N_HEADS
INTERMEDIATE = 128
LN_EPS = 1e-12

OUT_LANE = 128   # lane-dense logit slab width
MXU_ROWS = 256   # target M rows per grid step (v6e/v7x); TODO(synk): 128 on v5e


# ---------------- fused forward kernel (one batch block per grid step) ----------------
def _fused_forward_kernel(
    emb_ref, mask_ref,
    wqkv_ref, bqkv_ref, wao_ref, bao_ref, ln1g_ref, ln1b_ref,
    wi_ref, bi_ref, wo_ref, bo_ref, ln2g_ref, ln2b_ref,
    embg_ref, embb_ref, poolw_ref, poolb_ref, clsw_ref, clsb_ref,
    out_ref,
    *, n_layers, n_heads, head_dim, hidden, eps, bt, seq, bt_pad,
):
    f32, bf16 = jnp.float32, jnp.bfloat16

    def layernorm(x, g, b):
        mu = jnp.mean(x, axis=-1, keepdims=True)
        var = jnp.mean((x - mu) * (x - mu), axis=-1, keepdims=True)
        return (x - mu) * lax.rsqrt(var + eps) * g + b

    def gelu(x):
        # TODO(synk): HF BERT uses exact erf-GELU; tanh approximation used here
        # for robust Mosaic lowering (difference ~1e-3).
        c = 0.7978845608028654  # sqrt(2/pi)
        return 0.5 * x * (1.0 + jnp.tanh(c * (x + 0.044715 * x * x * x)))

    # ---- embeddings LN over the whole flattened [bt*seq, H] slab ----
    h = layernorm(emb_ref[0].astype(f32), embg_ref[...], embb_ref[...])   # [bt*seq, H]
    mask = mask_ref[0].astype(f32)                                        # [bt, seq]

    # ---- encoder layers (weights stacked on a leading layer axis, resident in VMEM) ----
    for l in range(n_layers):
        wqkv_l = wqkv_ref[l]
        wao_l = wao_ref[l]
        wi_l = wi_ref[l]
        wo_l = wo_ref[l]

        # fused QKV on the flattened slab: bf16 MXU, f32 accumulate.
        # (1/sqrt(head_dim) already folded into the Q columns/bias by pack_params.)
        qkv = jnp.dot(h.astype(bf16), wqkv_l, preferred_element_type=f32) + bqkv_ref[l]

        # per-batch-element attention; output projection folded per head (no concat)
        attn_rows = []
        for b in range(bt):
            r = b * seq
            mask_b = mask[b:b + 1, :]                        # [1, seq] (broadcast over queries)
            acc = jnp.zeros((seq, hidden), f32)
            for hh in range(n_heads):
                lo = hh * head_dim
                qh = qkv[r:r + seq, lo:lo + head_dim].astype(bf16)
                kh = qkv[r:r + seq, hidden + lo:hidden + lo + head_dim].astype(bf16)
                vh = qkv[r:r + seq, 2 * hidden + lo:2 * hidden + lo + head_dim].astype(bf16)
                # scores contract the last dims directly — no kh.T transpose
                s = lax.dot_general(qh, kh, (((1,), (1,)), ((), ())),
                                    preferred_element_type=f32) + mask_b
                m = jnp.max(s, axis=-1, keepdims=True)
                p = jnp.exp(s - m)
                p = p * pl.reciprocal(jnp.sum(p, axis=-1, keepdims=True), approx=True)
                ctx = jnp.dot(p.astype(bf16), vh, preferred_element_type=f32)     # [seq, Dh]
                # fold the attention-output projection into the head loop
                acc = acc + jnp.dot(ctx.astype(bf16), wao_l[lo:lo + head_dim, :],
                                    preferred_element_type=f32)                    # [seq, H]
            attn_rows.append(acc)
        attn_out = jnp.concatenate(attn_rows, axis=0) + bao_ref[l]                 # [bt*seq, H]
        # dropout in eval mode == identity
        h = layernorm(attn_out + h, ln1g_ref[l], ln1b_ref[l])

        inter = gelu(jnp.dot(h.astype(bf16), wi_l, preferred_element_type=f32) + bi_ref[l])
        ffn = jnp.dot(inter.astype(bf16), wo_l, preferred_element_type=f32) + bo_ref[l]
        h = layernorm(ffn + h, ln2g_ref[l], ln2b_ref[l])

    # ---- pooler (token 0 of every batch element) + classifier, fused ----
    cls_list = [h[b * seq:b * seq + 1, :] for b in range(bt)]
    if bt_pad > bt:
        cls_list.append(jnp.zeros((bt_pad - bt, hidden), f32))
    cls_rows = jnp.concatenate(cls_list, axis=0)                                   # [bt_pad, H]
    pooled = jnp.tanh(jnp.dot(cls_rows.astype(bf16), poolw_ref[...],
                              preferred_element_type=f32) + poolb_ref[...])        # [bt_pad, H]
    logit = jnp.sum(pooled * clsw_ref[...], axis=-1, keepdims=True) + clsb_ref[...]  # [bt_pad, 1]

    # lane-dense write: row i of the slab = logit of batch element i of this block
    out_ref[0] = jnp.broadcast_to(logit, (bt_pad, OUT_LANE)).astype(out_ref.dtype)


def _const_map(ndim):
    return lambda b: (0,) * ndim


# ---------------- one-time weight packing (outside the per-call path) ----------------
def pack_params(params):
    """Pack/stack per-layer weights once: QKV fused to [H,3H], 1/sqrt(Dh) folded into the
    Q columns/bias, matmul weights cast to bf16 (LN params / biases stay f32)."""
    f32, bf16 = jnp.float32, jnp.bfloat16
    scale = 1.0 / math.sqrt(HEAD_DIM)
    layers = params["layers"]
    stack = lambda name: jnp.stack([l[name] for l in layers])
    return {
        "word_emb": params["word_emb"],
        "pos_emb": params["pos_emb"],
        "type_emb": params["type_emb"],
        "wqkv": jnp.stack([jnp.concatenate([l["q_w"] * scale, l["k_w"], l["v_w"]], axis=1)
                           for l in layers]).astype(bf16),                       # [L,H,3H]
        "bqkv": jnp.stack([jnp.concatenate([l["q_b"] * scale, l["k_b"], l["v_b"]])[None, :]
                           for l in layers]).astype(f32),                        # [L,1,3H]
        "wao": stack("ao_w").astype(bf16),                                       # [L,H,H]
        "bao": stack("ao_b")[:, None, :].astype(f32),                            # [L,1,H]
        "ln1g": stack("attn_ln_g")[:, None, :],
        "ln1b": stack("attn_ln_b")[:, None, :],
        "wi": stack("i_w").astype(bf16),                                         # [L,H,I]
        "bi": stack("i_b")[:, None, :].astype(f32),
        "wo": stack("o_w").astype(bf16),                                         # [L,I,H]
        "bo": stack("o_b")[:, None, :].astype(f32),
        "ln2g": stack("out_ln_g")[:, None, :],
        "ln2b": stack("out_ln_b")[:, None, :],
        "embg": params["emb_ln_g"][None, :],
        "embb": params["emb_ln_b"][None, :],
        "poolw": params["pool_w"].astype(bf16),                                  # [H,H]
        "poolb": params["pool_b"][None, :],
        "clsw": params["cls_w"].T.astype(f32),                                   # [1,H]
        "clsb": params["cls_b"][None, :],                                        # [1,1]
    }


# ---------------- model forward ----------------
def pair_classifier_forward(packed, input_ids, att_mask, token_type_ids):
    B, S = input_ids.shape

    # --- BERT embeddings: table gathers stay as XLA glue ---
    emb = (packed["word_emb"][input_ids]
           + packed["pos_emb"][None, :S, :]
           + packed["type_emb"][token_type_ids])                                 # [B,S,H]
    add_mask = (1.0 - att_mask.astype(jnp.float32)) * -10000.0                   # [B,S]

    # --- batch-block the grid so each step feeds the MXU BT*S rows ---
    BT = max(1, min(B, MXU_ROWS // S))
    n_blocks = pl.cdiv(B, BT)
    B_pad = n_blocks * BT
    if B_pad > B:
        emb = jnp.concatenate(
            [emb, jnp.zeros((B_pad - B, S, HIDDEN), emb.dtype)], axis=0)
        add_mask = jnp.concatenate(
            [add_mask, jnp.full((B_pad - B, S), -10000.0, jnp.float32)], axis=0)
    emb = emb.reshape(n_blocks, BT * S, HIDDEN)
    add_mask = add_mask.reshape(n_blocks, BT, S)
    BT_PAD = max(8, ((BT + 7) // 8) * 8)

    weight_args = (
        packed["wqkv"], packed["bqkv"], packed["wao"], packed["bao"],
        packed["ln1g"], packed["ln1b"], packed["wi"], packed["bi"],
        packed["wo"], packed["bo"], packed["ln2g"], packed["ln2b"],
        packed["embg"], packed["embb"], packed["poolw"], packed["poolb"],
        packed["clsw"], packed["clsb"],
    )

    in_specs = [
        pl.BlockSpec((1, BT * S, HIDDEN), lambda b: (b, 0, 0)),   # activations: per-block
        pl.BlockSpec((1, BT, S), lambda b: (b, 0, 0)),            # mask: per-block
    ] + [pl.BlockSpec(w.shape, _const_map(w.ndim)) for w in weight_args]  # weights resident

    kernel = functools.partial(
        _fused_forward_kernel,
        n_layers=int(packed["wqkv"].shape[0]), n_heads=N_HEADS, head_dim=HEAD_DIM,
        hidden=HIDDEN, eps=LN_EPS, bt=BT, seq=S, bt_pad=BT_PAD,
    )

    out = pl.pallas_call(
        kernel,
        grid=(n_blocks,),
        out_shape=jax.ShapeDtypeStruct((n_blocks, BT_PAD, OUT_LANE), jnp.float32),
        in_specs=in_specs,
        out_specs=pl.BlockSpec((1, BT_PAD, OUT_LANE), lambda b: (b, 0, 0)),
        compiler_params=pltpu.CompilerParams(
            dimension_semantics=("parallel",) if n_blocks > 1 else ("arbitrary",)),
    )(emb, add_mask, *weight_args)

    # row i of block b = logit of batch element b*BT+i
    return out[:, :BT, 0:1].reshape(B_pad, 1)[:B]                                # [B,1]


# ---------------- deterministic parameter init ----------------
def init_params(key):
    std = 0.02

    def nrm(k, shape):
        return jax.random.normal(k, shape, jnp.float32) * std

    keys = iter(jax.random.split(key, 256))
    params = {
        "word_emb": nrm(next(keys), (VOCAB, HIDDEN)),
        "pos_emb": nrm(next(keys), (MAX_POS, HIDDEN)),
        "type_emb": nrm(next(keys), (TYPE_VOCAB, HIDDEN)),
        "emb_ln_g": jnp.ones((HIDDEN,), jnp.float32),
        "emb_ln_b": jnp.zeros((HIDDEN,), jnp.float32),
        "pool_w": nrm(next(keys), (HIDDEN, HIDDEN)),
        "pool_b": jnp.zeros((HIDDEN,), jnp.float32),
        "cls_w": nrm(next(keys), (HIDDEN, 1)),
        "cls_b": jnp.zeros((1,), jnp.float32),
        "layers": [],
    }
    for _ in range(N_LAYERS):
        layer = {
            "q_w": nrm(next(keys), (HIDDEN, HIDDEN)), "q_b": jnp.zeros((HIDDEN,), jnp.float32),
            "k_w": nrm(next(keys), (HIDDEN, HIDDEN)), "k_b": jnp.zeros((HIDDEN,), jnp.float32),
            "v_w": nrm(next(keys), (HIDDEN, HIDDEN)), "v_b": jnp.zeros((HIDDEN,), jnp.float32),
            "ao_w": nrm(next(keys), (HIDDEN, HIDDEN)), "ao_b": jnp.zeros((HIDDEN,), jnp.float32),
            "attn_ln_g": jnp.ones((HIDDEN,), jnp.float32),
            "attn_ln_b": jnp.zeros((HIDDEN,), jnp.float32),
            "i_w": nrm(next(keys), (HIDDEN, INTERMEDIATE)),
            "i_b": jnp.zeros((INTERMEDIATE,), jnp.float32),
            "o_w": nrm(next(keys), (INTERMEDIATE, HIDDEN)),
            "o_b": jnp.zeros((HIDDEN,), jnp.float32),
            "out_ln_g": jnp.ones((HIDDEN,), jnp.float32),
            "out_ln_b": jnp.zeros((HIDDEN,), jnp.float32),
        }
        params["layers"].append(layer)
    return params


if __name__ == "__main__":
    B, S = 2, 8
    root = jax.random.PRNGKey(0)
    k_par, k_ids, k_seg = jax.random.split(root, 3)

    params = init_params(k_par)
    packed = pack_params(params)        # one-time packing, outside the per-call path
    packed = jax.block_until_ready(packed)

    input_ids = jax.random.randint(k_ids, (B, S), 0, VOCAB, dtype=jnp.int32)
    # second example has 2 padding positions at the end
    att_mask = jnp.array([[1] * S, [1] * (S - 2) + [0, 0]], dtype=jnp.int32)
    # sentence-pair token types: first half segment 0, second half segment 1
    token_type_ids = jnp.array([[0] * (S // 2) + [1] * (S // 2)] * B, dtype=jnp.int32)

    fwd = jax.jit(pair_classifier_forward)
    logits = fwd(packed, input_ids, att_mask, token_type_ids)
    jax.block_until_ready(logits)

    assert logits.shape == (B, 1) and logits.dtype == jnp.float32
    print("KERNEL_OK")
</pallas_src>

<mosaic_0001>
module attributes {stable_mosaic.version = 11 : i64} {
  func.func @_fused_forward_kernel(%arg0: i32, %arg1: memref<1x16x64xf32, #tpu.memory_space<vmem>>, %arg2: memref<1x2x8xf32, #tpu.memory_space<vmem>>, %arg3: memref<2x64x192xbf16, #tpu.memory_space<vmem>>, %arg4: memref<2x1x192xf32, #tpu.memory_space<vmem>>, %arg5: memref<2x64x64xbf16, #tpu.memory_space<vmem>>, %arg6: memref<2x1x64xf32, #tpu.memory_space<vmem>>, %arg7: memref<2x1x64xf32, #tpu.memory_space<vmem>>, %arg8: memref<2x1x64xf32, #tpu.memory_space<vmem>>, %arg9: memref<2x64x128xbf16, #tpu.memory_space<vmem>>, %arg10: memref<2x1x128xf32, #tpu.memory_space<vmem>>, %arg11: memref<2x128x64xbf16, #tpu.memory_space<vmem>>, %arg12: memref<2x1x64xf32, #tpu.memory_space<vmem>>, %arg13: memref<2x1x64xf32, #tpu.memory_space<vmem>>, %arg14: memref<2x1x64xf32, #tpu.memory_space<vmem>>, %arg15: memref<1x64xf32, #tpu.memory_space<vmem>>, %arg16: memref<1x64xf32, #tpu.memory_space<vmem>>, %arg17: memref<64x64xbf16, #tpu.memory_space<vmem>>, %arg18: memref<1x64xf32, #tpu.memory_space<vmem>>, %arg19: memref<1x64xf32, #tpu.memory_space<vmem>>, %arg20: memref<1x1xf32, #tpu.memory_space<vmem>>, %arg21: memref<1x8x128xf32, #tpu.memory_space<vmem>>) attributes {dimension_semantics = [#tpu.dimension_semantics<arbitrary>], iteration_bounds = array<i64: 1>, scalar_prefetch = 0 : i64, scratch_operands = 0 : i64, tpu.core_type = #tpu.core_type<tc>, window_params = [{transform_indices = @transform_0, window_bounds = array<i64: 1, 16, 64>}, {transform_indices = @transform_1, window_bounds = array<i64: 1, 2, 8>}, {pipeline_mode = #tpu.pipeline_mode<synchronous>, transform_indices = @transform_2, window_bounds = array<i64: 2, 64, 192>}, {pipeline_mode = #tpu.pipeline_mode<synchronous>, transform_indices = @transform_3, window_bounds = array<i64: 2, 1, 192>}, {pipeline_mode = #tpu.pipeline_mode<synchronous>, transform_indices = @transform_4, window_bounds = array<i64: 2, 64, 64>}, {pipeline_mode = #tpu.pipeline_mode<synchronous>, transform_indices = @transform_5, window_bounds = array<i64: 2, 1, 64>}, {pipeline_mode = #tpu.pipeline_mode<synchronous>, transform_indices = @transform_6, window_bounds = array<i64: 2, 1, 64>}, {pipeline_mode = #tpu.pipeline_mode<synchronous>, transform_indices = @transform_7, window_bounds = array<i64: 2, 1, 64>}, {pipeline_mode = #tpu.pipeline_mode<synchronous>, transform_indices = @transform_8, window_bounds = array<i64: 2, 64, 128>}, {pipeline_mode = #tpu.pipeline_mode<synchronous>, transform_indices = @transform_9, window_bounds = array<i64: 2, 1, 128>}, {pipeline_mode = #tpu.pipeline_mode<synchronous>, transform_indices = @transform_10, window_bounds = array<i64: 2, 128, 64>}, {pipeline_mode = #tpu.pipeline_mode<synchronous>, transform_indices = @transform_11, window_bounds = array<i64: 2, 1, 64>}, {pipeline_mode = #tpu.pipeline_mode<synchronous>, transform_indices = @transform_12, window_bounds = array<i64: 2, 1, 64>}, {pipeline_mode = #tpu.pipeline_mode<synchronous>, transform_indices = @transform_13, window_bounds = array<i64: 2, 1, 64>}, {pipeline_mode = #tpu.pipeline_mode<synchronous>, transform_indices = @transform_14, window_bounds = array<i64: 1, 64>}, {pipeline_mode = #tpu.pipeline_mode<synchronous>, transform_indices = @transform_15, window_bounds = array<i64: 1, 64>}, {pipeline_mode = #tpu.pipeline_mode<synchronous>, transform_indices = @transform_16, window_bounds = array<i64: 64, 64>}, {pipeline_mode = #tpu.pipeline_mode<synchronous>, transform_indices = @transform_17, window_bounds = array<i64: 1, 64>}, {pipeline_mode = #tpu.pipeline_mode<synchronous>, transform_indices = @transform_18, window_bounds = array<i64: 1, 64>}, {pipeline_mode = #tpu.pipeline_mode<synchronous>, transform_indices = @transform_19, window_bounds = array<i64: 1, 1>}, {transform_indices = @transform_20, window_bounds = array<i64: 1, 8, 128>}]} {
    %c0 = arith.constant 0 : index
    %c0_0 = arith.constant 0 : index
    %c0_1 = arith.constant 0 : index
    %0 = vector.load %arg1[%c0, %c0_0, %c0_1] : memref<1x16x64xf32, #tpu.memory_space<vmem>>, vector<1x16x64xf32>
    %1 = vector.shape_cast %0 : vector<1x16x64xf32> to vector<16x64xf32>
    %c0_2 = arith.constant 0 : index
    %c0_3 = arith.constant 0 : index
    %2 = vector.load %arg15[%c0_2, %c0_3] : memref<1x64xf32, #tpu.memory_space<vmem>>, vector<1x64xf32>
    %c0_4 = arith.constant 0 : index
    %c0_5 = arith.constant 0 : index
    %3 = vector.load %arg16[%c0_4, %c0_5] : memref<1x64xf32, #tpu.memory_space<vmem>>, vector<1x64xf32>
    %cst = arith.constant dense<0.000000e+00> : vector<16xf32>
    %4 = vector.multi_reduction <add>, %1, %cst [1] : vector<16x64xf32> to vector<16xf32>
    %5 = vector.shape_cast %4 : vector<16xf32> to vector<16x1xf32>
    %cst_6 = arith.constant 6.400000e+01 : f32
    %6 = vector.broadcast %cst_6 : f32 to vector<16x1xf32>
    %7 = arith.divf %5, %6 : vector<16x1xf32>
    %8 = vector.broadcast %7 : vector<16x1xf32> to vector<16x64xf32>
    %9 = arith.subf %1, %8 : vector<16x64xf32>
    %10 = vector.broadcast %7 : vector<16x1xf32> to vector<16x64xf32>
    %11 = arith.subf %1, %10 : vector<16x64xf32>
    %12 = arith.mulf %9, %11 : vector<16x64xf32>
    %cst_7 = arith.constant dense<0.000000e+00> : vector<16xf32>
    %13 = vector.multi_reduction <add>, %12, %cst_7 [1] : vector<16x64xf32> to vector<16xf32>
    %14 = vector.shape_cast %13 : vector<16xf32> to vector<16x1xf32>
    %cst_8 = arith.constant 6.400000e+01 : f32
    %15 = vector.broadcast %cst_8 : f32 to vector<16x1xf32>
    %16 = arith.divf %14, %15 : vector<16x1xf32>
    %17 = vector.broadcast %7 : vector<16x1xf32> to vector<16x64xf32>
    %18 = arith.subf %1, %17 : vector<16x64xf32>
    %cst_9 = arith.constant 9.99999996E-13 : f32
    %19 = vector.broadcast %cst_9 : f32 to vector<16x1xf32>
    %20 = arith.addf %16, %19 : vector<16x1xf32>
    %21 = math.rsqrt %20 : vector<16x1xf32>
    %22 = vector.broadcast %21 : vector<16x1xf32> to vector<16x64xf32>
    %23 = arith.mulf %18, %22 : vector<16x64xf32>
    %24 = vector.broadcast %2 : vector<1x64xf32> to vector<16x64xf32>
    %25 = arith.mulf %23, %24 : vector<16x64xf32>
    %26 = vector.broadcast %3 : vector<1x64xf32> to vector<16x64xf32>
    %27 = arith.addf %25, %26 : vector<16x64xf32>
    %c0_10 = arith.constant 0 : index
    %c0_11 = arith.constant 0 : index
    %c0_12 = arith.constant 0 : index
    %28 = vector.load %arg2[%c0_10, %c0_11, %c0_12] : memref<1x2x8xf32, #tpu.memory_space<vmem>>, vector<1x2x8xf32>
    %29 = vector.shape_cast %28 : vector<1x2x8xf32> to vector<2x8xf32>
    %c0_13 = arith.constant 0 : index
    %c0_14 = arith.constant 0 : index
    %c0_15 = arith.constant 0 : index
    %30 = vector.load %arg3[%c0_13, %c0_14, %c0_15] : memref<2x64x192xbf16, #tpu.memory_space<vmem>>, vector<1x64x192xbf16>
    %31 = vector.shape_cast %30 : vector<1x64x192xbf16> to vector<64x192xbf16>
    %c0_16 = arith.constant 0 : index
    %c0_17 = arith.constant 0 : index
    %c0_18 = arith.constant 0 : index
    %32 = vector.load %arg5[%c0_16, %c0_17, %c0_18] : memref<2x64x64xbf16, #tpu.memory_space<vmem>>, vector<1x64x64xbf16>
    %33 = vector.shape_cast %32 : vector<1x64x64xbf16> to vector<64x64xbf16>
    %c0_19 = arith.constant 0 : index
    %c0_20 = arith.constant 0 : index
    %c0_21 = arith.constant 0 : index
    %34 = vector.load %arg9[%c0_19, %c0_20, %c0_21] : memref<2x64x128xbf16, #tpu.memory_space<vmem>>, vector<1x64x128xbf16>
    %35 = vector.shape_cast %34 : vector<1x64x128xbf16> to vector<64x128xbf16>
    %c0_22 = arith.constant 0 : index
    %c0_23 = arith.constant 0 : index
    %c0_24 = arith.constant 0 : index
    %36 = vector.load %arg11[%c0_22, %c0_23, %c0_24] : memref<2x128x64xbf16, #tpu.memory_space<vmem>>, vector<1x128x64xbf16>
    %37 = vector.shape_cast %36 : vector<1x128x64xbf16> to vector<128x64xbf16>
    %38 = arith.truncf %27 : vector<16x64xf32> to vector<16x64xbf16>
    %cst_25 = arith.constant dense<0.000000e+00> : vector<16x192xf32>
    %39 = tpu.matmul %38, %31, %cst_25 {dimension_numbers = #tpu.dot_dimension_numbers<[1], [0], [0], [1], [0, 0, 1, 1], [], []>} : vector<16x64xbf16>, vector<64x192xbf16>, vector<16x192xf32> -> vector<16x192xf32>
    %c0_26 = arith.constant 0 : index
    %c0_27 = arith.constant 0 : index
    %c0_28 = arith.constant 0 : index
    %40 = vector.load %arg4[%c0_26, %c0_27, %c0_28] : memref<2x1x192xf32, #tpu.memory_space<vmem>>, vector<1x1x192xf32>
    %41 = vector.shape_cast %40 : vector<1x1x192xf32> to vector<1x192xf32>
    %42 = vector.broadcast %41 : vector<1x192xf32> to vector<16x192xf32>
    %43 = arith.addf %39, %42 : vector<16x192xf32>
    %44 = vector.extract_strided_slice %29 {offsets = [0, 0], sizes = [1, 8], strides = [1, 1]} : vector<2x8xf32> to vector<1x8xf32>
    %cst_29 = arith.constant 0.000000e+00 : f32
    %45 = vector.broadcast %cst_29 : f32 to vector<8x64xf32>
    %46 = vector.extract_strided_slice %43 {offsets = [0, 0], sizes = [8, 16], strides = [1, 1]} : vector<16x192xf32> to vector<8x16xf32>
    %47 = arith.truncf %46 : vector<8x16xf32> to vector<8x16xbf16>
    %48 = vector.extract_strided_slice %43 {offsets = [0, 64], sizes = [8, 16], strides = [1, 1]} : vector<16x192xf32> to vector<8x16xf32>
    %49 = arith.truncf %48 : vector<8x16xf32> to vector<8x16xbf16>
    %50 = vector.extract_strided_slice %43 {offsets = [0, 128], sizes = [8, 16], strides = [1, 1]} : vector<16x192xf32> to vector<8x16xf32>
    %51 = arith.truncf %50 : vector<8x16xf32> to vector<8x16xbf16>
    %cst_30 = arith.constant dense<0.000000e+00> : vector<8x8xf32>
    %52 = tpu.matmul %47, %49, %cst_30 {dimension_numbers = #tpu.dot_dimension_numbers<[1], [1], [0], [0], [0, 0, 1, 0], [], []>} : vector<8x16xbf16>, vector<8x16xbf16>, vector<8x8xf32> -> vector<8x8xf32>
    %53 = vector.broadcast %44 : vector<1x8xf32> to vector<8x8xf32>
    %54 = arith.addf %52, %53 : vector<8x8xf32>
    %cst_31 = arith.constant dense<0xFF800000> : vector<8xf32>
    %55 = vector.multi_reduction <maximumf>, %54, %cst_31 [1] : vector<8x8xf32> to vector<8xf32>
    %56 = vector.shape_cast %55 : vector<8xf32> to vector<8x1xf32>
    %57 = vector.broadcast %56 : vector<8x1xf32> to vector<8x8xf32>
    %58 = arith.subf %54, %57 : vector<8x8xf32>
    %59 = math.exp %58 : vector<8x8xf32>
    %cst_32 = arith.constant dense<0.000000e+00> : vector<8xf32>
    %60 = vector.multi_reduction <add>, %59, %cst_32 [1] : vector<8x8xf32> to vector<8xf32>
    %61 = vector.shape_cast %60 : vector<8xf32> to vector<8x1xf32>
    %62 = tpu.reciprocal %61 {approx = true} : vector<8x1xf32> -> vector<8x1xf32>
    %63 = vector.broadcast %62 : vector<8x1xf32> to vector<8x8xf32>
    %64 = arith.mulf %59, %63 : vector<8x8xf32>
    %65 = arith.truncf %64 : vector<8x8xf32> to vector<8x8xbf16>
    %cst_33 = arith.constant dense<0.000000e+00> : vector<8x16xf32>
    %66 = tpu.matmul %65, %51, %cst_33 {dimension_numbers = #tpu.dot_dimension_numbers<[1], [0], [0], [1], [0, 0, 1, 1], [], []>} : vector<8x8xbf16>, vector<8x16xbf16>, vector<8x16xf32> -> vector<8x16xf32>
    %67 = arith.truncf %66 : vector<8x16xf32> to vector<8x16xbf16>
    %68 = vector.extract_strided_slice %33 {offsets = [0, 0], sizes = [16, 64], strides = [1, 1]} : vector<64x64xbf16> to vector<16x64xbf16>
    %cst_34 = arith.constant dense<0.000000e+00> : vector<8x64xf32>
    %69 = tpu.matmul %67, %68, %cst_34 {dimension_numbers = #tpu.dot_dimension_numbers<[1], [0], [0], [1], [0, 0, 1, 1], [], []>} : vector<8x16xbf16>, vector<16x64xbf16>, vector<8x64xf32> -> vector<8x64xf32>
    %70 = arith.addf %45, %69 : vector<8x64xf32>
    %71 = vector.extract_strided_slice %43 {offsets = [0, 16], sizes = [8, 16], strides = [1, 1]} : vector<16x192xf32> to vector<8x16xf32>
    %72 = arith.truncf %71 : vector<8x16xf32> to vector<8x16xbf16>
    %73 = vector.extract_strided_slice %43 {offsets = [0, 80], sizes = [8, 16], strides = [1, 1]} : vector<16x192xf32> to vector<8x16xf32>
    %74 = arith.truncf %73 : vector<8x16xf32> to vector<8x16xbf16>
    %75 = vector.extract_strided_slice %43 {offsets = [0, 144], sizes = [8, 16], strides = [1, 1]} : vector<16x192xf32> to vector<8x16xf32>
    %76 = arith.truncf %75 : vector<8x16xf32> to vector<8x16xbf16>
    %cst_35 = arith.constant dense<0.000000e+00> : vector<8x8xf32>
    %77 = tpu.matmul %72, %74, %cst_35 {dimension_numbers = #tpu.dot_dimension_numbers<[1], [1], [0], [0], [0, 0, 1, 0], [], []>} : vector<8x16xbf16>, vector<8x16xbf16>, vector<8x8xf32> -> vector<8x8xf32>
    %78 = vector.broadcast %44 : vector<1x8xf32> to vector<8x8xf32>
    %79 = arith.addf %77, %78 : vector<8x8xf32>
    %cst_36 = arith.constant dense<0xFF800000> : vector<8xf32>
    %80 = vector.multi_reduction <maximumf>, %79, %cst_36 [1] : vector<8x8xf32> to vector<8xf32>
    %81 = vector.shape_cast %80 : vector<8xf32> to vector<8x1xf32>
    %82 = vector.broadcast %81 : vector<8x1xf32> to vector<8x8xf32>
    %83 = arith.subf %79, %82 : vector<8x8xf32>
    %84 = math.exp %83 : vector<8x8xf32>
    %cst_37 = arith.constant dense<0.000000e+00> : vector<8xf32>
    %85 = vector.multi_reduction <add>, %84, %cst_37 [1] : vector<8x8xf32> to vector<8xf32>
    %86 = vector.shape_cast %85 : vector<8xf32> to vector<8x1xf32>
    %87 = tpu.reciprocal %86 {approx = true} : vector<8x1xf32> -> vector<8x1xf32>
    %88 = vector.broadcast %87 : vector<8x1xf32> to vector<8x8xf32>
    %89 = arith.mulf %84, %88 : vector<8x8xf32>
    %90 = arith.truncf %89 : vector<8x8xf32> to vector<8x8xbf16>
    %cst_38 = arith.constant dense<0.000000e+00> : vector<8x16xf32>
    %91 = tpu.matmul %90, %76, %cst_38 {dimension_numbers = #tpu.dot_dimension_numbers<[1], [0], [0], [1], [0, 0, 1, 1], [], []>} : vector<8x8xbf16>, vector<8x16xbf16>, vector<8x16xf32> -> vector<8x16xf32>
    %92 = arith.truncf %91 : vector<8x16xf32> to vector<8x16xbf16>
    %93 = vector.extract_strided_slice %33 {offsets = [16, 0], sizes = [16, 64], strides = [1, 1]} : vector<64x64xbf16> to vector<16x64xbf16>
    %cst_39 = arith.constant dense<0.000000e+00> : vector<8x64xf32>
    %94 = tpu.matmul %92, %93, %cst_39 {dimension_numbers = #tpu.dot_dimension_numbers<[1], [0], [0], [1], [0, 0, 1, 1], [], []>} : vector<8x16xbf16>, vector<16x64xbf16>, vector<8x64xf32> -> vector<8x64xf32>
    %95 = arith.addf %70, %94 : vector<8x64xf32>
    %96 = vector.extract_strided_slice %43 {offsets = [0, 32], sizes = [8, 16], strides = [1, 1]} : vector<16x192xf32> to vector<8x16xf32>
    %97 = arith.truncf %96 : vector<8x16xf32> to vector<8x16xbf16>
    %98 = vector.extract_strided_slice %43 {offsets = [0, 96], sizes = [8, 16], strides = [1, 1]} : vector<16x192xf32> to vector<8x16xf32>
    %99 = arith.truncf %98 : vector<8x16xf32> to vector<8x16xbf16>
    %100 = vector.extract_strided_slice %43 {offsets = [0, 160], sizes = [8, 16], strides = [1, 1]} : vector<16x192xf32> to vector<8x16xf32>
    %101 = arith.truncf %100 : vector<8x16xf32> to vector<8x16xbf16>
    %cst_40 = arith.constant dense<0.000000e+00> : vector<8x8xf32>
    %102 = tpu.matmul %97, %99, %cst_40 {dimension_numbers = #tpu.dot_dimension_numbers<[1], [1], [0], [0], [0, 0, 1, 0], [], []>} : vector<8x16xbf16>, vector<8x16xbf16>, vector<8x8xf32> -> vector<8x8xf32>
    %103 = vector.broadcast %44 : vector<1x8xf32> to vector<8x8xf32>
    %104 = arith.addf %102, %103 : vector<8x8xf32>
    %cst_41 = arith.constant dense<0xFF800000> : vector<8xf32>
    %105 = vector.multi_reduction <maximumf>, %104, %cst_41 [1] : vector<8x8xf32> to vector<8xf32>
    %106 = vector.shape_cast %105 : vector<8xf32> to vector<8x1xf32>
    %107 = vector.broadcast %106 : vector<8x1xf32> to vector<8x8xf32>
    %108 = arith.subf %104, %107 : vector<8x8xf32>
    %109 = math.exp %108 : vector<8x8xf32>
    %cst_42 = arith.constant dense<0.000000e+00> : vector<8xf32>
    %110 = vector.multi_reduction <add>, %109, %cst_42 [1] : vector<8x8xf32> to vector<8xf32>
    %111 = vector.shape_cast %110 : vector<8xf32> to vector<8x1xf32>
    %112 = tpu.reciprocal %111 {approx = true} : vector<8x1xf32> -> vector<8x1xf32>
    %113 = vector.broadcast %112 : vector<8x1xf32> to vector<8x8xf32>
    %114 = arith.mulf %109, %113 : vector<8x8xf32>
    %115 = arith.truncf %114 : vector<8x8xf32> to vector<8x8xbf16>
    %cst_43 = arith.constant dense<0.000000e+00> : vector<8x16xf32>
    %116 = tpu.matmul %115, %101, %cst_43 {dimension_numbers = #tpu.dot_dimension_numbers<[1], [0], [0], [1], [0, 0, 1, 1], [], []>} : vector<8x8xbf16>, vector<8x16xbf16>, vector<8x16xf32> -> vector<8x16xf32>
    %117 = arith.truncf %116 : vector<8x16xf32> to vector<8x16xbf16>
    %118 = vector.extract_strided_slice %33 {offsets = [32, 0], sizes = [16, 64], strides = [1, 1]} : vector<64x64xbf16> to vector<16x64xbf16>
    %cst_44 = arith.constant dense<0.000000e+00> : vector<8x64xf32>
    %119 = tpu.matmul %117, %118, %cst_44 {dimension_numbers = #tpu.dot_dimension_numbers<[1], [0], [0], [1], [0, 0, 1, 1], [], []>} : vector<8x16xbf16>, vector<16x64xbf16>, vector<8x64xf32> -> vector<8x64xf32>
    %120 = arith.addf %95, %119 : vector<8x64xf32>
    %121 = vector.extract_strided_slice %43 {offsets = [0, 48], sizes = [8, 16], strides = [1, 1]} : vector<16x192xf32> to vector<8x16xf32>
    %122 = arith.truncf %121 : vector<8x16xf32> to vector<8x16xbf16>
    %123 = vector.extract_strided_slice %43 {offsets = [0, 112], sizes = [8, 16], strides = [1, 1]} : vector<16x192xf32> to vector<8x16xf32>
    %124 = arith.truncf %123 : vector<8x16xf32> to vector<8x16xbf16>
    %125 = vector.extract_strided_slice %43 {offsets = [0, 176], sizes = [8, 16], strides = [1, 1]} : vector<16x192xf32> to vector<8x16xf32>
    %126 = arith.truncf %125 : vector<8x16xf32> to vector<8x16xbf16>
    %cst_45 = arith.constant dense<0.000000e+00> : vector<8x8xf32>
    %127 = tpu.matmul %122, %124, %cst_45 {dimension_numbers = #tpu.dot_dimension_numbers<[1], [1], [0], [0], [0, 0, 1, 0], [], []>} : vector<8x16xbf16>, vector<8x16xbf16>, vector<8x8xf32> -> vector<8x8xf32>
    %128 = vector.broadcast %44 : vector<1x8xf32> to vector<8x8xf32>
    %129 = arith.addf %127, %128 : vector<8x8xf32>
    %cst_46 = arith.constant dense<0xFF800000> : vector<8xf32>
    %130 = vector.multi_reduction <maximumf>, %129, %cst_46 [1] : vector<8x8xf32> to vector<8xf32>
    %131 = vector.shape_cast %130 : vector<8xf32> to vector<8x1xf32>
    %132 = vector.broadcast %131 : vector<8x1xf32> to vector<8x8xf32>
    %133 = arith.subf %129, %132 : vector<8x8xf32>
    %134 = math.exp %133 : vector<8x8xf32>
    %cst_47 = arith.constant dense<0.000000e+00> : vector<8xf32>
    %135 = vector.multi_reduction <add>, %134, %cst_47 [1] : vector<8x8xf32> to vector<8xf32>
    %136 = vector.shape_cast %135 : vector<8xf32> to vector<8x1xf32>
    %137 = tpu.reciprocal %136 {approx = true} : vector<8x1xf32> -> vector<8x1xf32>
    %138 = vector.broadcast %137 : vector<8x1xf32> to vector<8x8xf32>
    %139 = arith.mulf %134, %138 : vector<8x8xf32>
    %140 = arith.truncf %139 : vector<8x8xf32> to vector<8x8xbf16>
    %cst_48 = arith.constant dense<0.000000e+00> : vector<8x16xf32>
    %141 = tpu.matmul %140, %126, %cst_48 {dimension_numbers = #tpu.dot_dimension_numbers<[1], [0], [0], [1], [0, 0, 1, 1], [], []>} : vector<8x8xbf16>, vector<8x16xbf16>, vector<8x16xf32> -> vector<8x16xf32>
    %142 = arith.truncf %141 : vector<8x16xf32> to vector<8x16xbf16>
    %143 = vector.extract_strided_slice %33 {offsets = [48, 0], sizes = [16, 64], strides = [1, 1]} : vector<64x64xbf16> to vector<16x64xbf16>
    %cst_49 = arith.constant dense<0.000000e+00> : vector<8x64xf32>
    %144 = tpu.matmul %142, %143, %cst_49 {dimension_numbers = #tpu.dot_dimension_numbers<[1], [0], [0], [1], [0, 0, 1, 1], [], []>} : vector<8x16xbf16>, vector<16x64xbf16>, vector<8x64xf32> -> vector<8x64xf32>
    %145 = arith.addf %120, %144 : vector<8x64xf32>
    %146 = vector.extract_strided_slice %29 {offsets = [1, 0], sizes = [1, 8], strides = [1, 1]} : vector<2x8xf32> to vector<1x8xf32>
    %cst_50 = arith.constant 0.000000e+00 : f32
    %147 = vector.broadcast %cst_50 : f32 to vector<8x64xf32>
    %148 = vector.extract_strided_slice %43 {offsets = [8, 0], sizes = [8, 16], strides = [1, 1]} : vector<16x192xf32> to vector<8x16xf32>
    %149 = arith.truncf %148 : vector<8x16xf32> to vector<8x16xbf16>
    %150 = vector.extract_strided_slice %43 {offsets = [8, 64], sizes = [8, 16], strides = [1, 1]} : vector<16x192xf32> to vector<8x16xf32>
    %151 = arith.truncf %150 : vector<8x16xf32> to vector<8x16xbf16>
    %152 = vector.extract_strided_slice %43 {offsets = [8, 128], sizes = [8, 16], strides = [1, 1]} : vector<16x192xf32> to vector<8x16xf32>
    %153 = arith.truncf %152 : vector<8x16xf32> to vector<8x16xbf16>
    %cst_51 = arith.constant dense<0.000000e+00> : vector<8x8xf32>
    %154 = tpu.matmul %149, %151, %cst_51 {dimension_numbers = #tpu.dot_dimension_numbers<[1], [1], [0], [0], [0, 0, 1, 0], [], []>} : vector<8x16xbf16>, vector<8x16xbf16>, vector<8x8xf32> -> vector<8x8xf32>
    %155 = vector.broadcast %146 : vector<1x8xf32> to vector<8x8xf32>
    %156 = arith.addf %154, %155 : vector<8x8xf32>
    %cst_52 = arith.constant dense<0xFF800000> : vector<8xf32>
    %157 = vector.multi_reduction <maximumf>, %156, %cst_52 [1] : vector<8x8xf32> to vector<8xf32>
    %158 = vector.shape_cast %157 : vector<8xf32> to vector<8x1xf32>
    %159 = vector.broadcast %158 : vector<8x1xf32> to vector<8x8xf32>
    %160 = arith.subf %156, %159 : vector<8x8xf32>
    %161 = math.exp %160 : vector<8x8xf32>
    %cst_53 = arith.constant dense<0.000000e+00> : vector<8xf32>
    %162 = vector.multi_reduction <add>, %161, %cst_53 [1] : vector<8x8xf32> to vector<8xf32>
    %163 = vector.shape_cast %162 : vector<8xf32> to vector<8x1xf32>
    %164 = tpu.reciprocal %163 {approx = true} : vector<8x1xf32> -> vector<8x1xf32>
    %165 = vector.broadcast %164 : vector<8x1xf32> to vector<8x8xf32>
    %166 = arith.mulf %161, %165 : vector<8x8xf32>
    %167 = arith.truncf %166 : vector<8x8xf32> to vector<8x8xbf16>
    %cst_54 = arith.constant dense<0.000000e+00> : vector<8x16xf32>
    %168 = tpu.matmul %167, %153, %cst_54 {dimension_numbers = #tpu.dot_dimension_numbers<[1], [0], [0], [1], [0, 0, 1, 1], [], []>} : vector<8x8xbf16>, vector<8x16xbf16>, vector<8x16xf32> -> vector<8x16xf32>
    %169 = arith.truncf %168 : vector<8x16xf32> to vector<8x16xbf16>
    %170 = vector.extract_strided_slice %33 {offsets = [0, 0], sizes = [16, 64], strides = [1, 1]} : vector<64x64xbf16> to vector<16x64xbf16>
    %cst_55 = arith.constant dense<0.000000e+00> : vector<8x64xf32>
    %171 = tpu.matmul %169, %170, %cst_55 {dimension_numbers = #tpu.dot_dimension_numbers<[1], [0], [0], [1], [0, 0, 1, 1], [], []>} : vector<8x16xbf16>, vector<16x64xbf16>, vector<8x64xf32> -> vector<8x64xf32>
    %172 = arith.addf %147, %171 : vector<8x64xf32>
    %173 = vector.extract_strided_slice %43 {offsets = [8, 16], sizes = [8, 16], strides = [1, 1]} : vector<16x192xf32> to vector<8x16xf32>
    %174 = arith.truncf %173 : vector<8x16xf32> to vector<8x16xbf16>
    %175 = vector.extract_strided_slice %43 {offsets = [8, 80], sizes = [8, 16], strides = [1, 1]} : vector<16x192xf32> to vector<8x16xf32>
    %176 = arith.truncf %175 : vector<8x16xf32> to vector<8x16xbf16>
    %177 = vector.extract_strided_slice %43 {offsets = [8, 144], sizes = [8, 16], strides = [1, 1]} : vector<16x192xf32> to vector<8x16xf32>
    %178 = arith.truncf %177 : vector<8x16xf32> to vector<8x16xbf16>
    %cst_56 = arith.constant dense<0.000000e+00> : vector<8x8xf32>
    %179 = tpu.matmul %174, %176, %cst_56 {dimension_numbers = #tpu.dot_dimension_numbers<[1], [1], [0], [0], [0, 0, 1, 0], [], []>} : vector<8x16xbf16>, vector<8x16xbf16>, vector<8x8xf32> -> vector<8x8xf32>
    %180 = vector.broadcast %146 : vector<1x8xf32> to vector<8x8xf32>
    %181 = arith.addf %179, %180 : vector<8x8xf32>
    %cst_57 = arith.constant dense<0xFF800000> : vector<8xf32>
    %182 = vector.multi_reduction <maximumf>, %181, %cst_57 [1] : vector<8x8xf32> to vector<8xf32>
    %183 = vector.shape_cast %182 : vector<8xf32> to vector<8x1xf32>
    %184 = vector.broadcast %183 : vector<8x1xf32> to vector<8x8xf32>
    %185 = arith.subf %181, %184 : vector<8x8xf32>
    %186 = math.exp %185 : vector<8x8xf32>
    %cst_58 = arith.constant dense<0.000000e+00> : vector<8xf32>
    %187 = vector.multi_reduction <add>, %186, %cst_58 [1] : vector<8x8xf32> to vector<8xf32>
    %188 = vector.shape_cast %187 : vector<8xf32> to vector<8x1xf32>
    %189 = tpu.reciprocal %188 {approx = true} : vector<8x1xf32> -> vector<8x1xf32>
    %190 = vector.broadcast %189 : vector<8x1xf32> to vector<8x8xf32>
    %191 = arith.mulf %186, %190 : vector<8x8xf32>
    %192 = arith.truncf %191 : vector<8x8xf32> to vector<8x8xbf16>
    %cst_59 = arith.constant dense<0.000000e+00> : vector<8x16xf32>
    %193 = tpu.matmul %192, %178, %cst_59 {dimension_numbers = #tpu.dot_dimension_numbers<[1], [0], [0], [1], [0, 0, 1, 1], [], []>} : vector<8x8xbf16>, vector<8x16xbf16>, vector<8x16xf32> -> vector<8x16xf32>
    %194 = arith.truncf %193 : vector<8x16xf32> to vector<8x16xbf16>
    %195 = vector.extract_strided_slice %33 {offsets = [16, 0], sizes = [16, 64], strides = [1, 1]} : vector<64x64xbf16> to vector<16x64xbf16>
    %cst_60 = arith.constant dense<0.000000e+00> : vector<8x64xf32>
    %196 = tpu.matmul %194, %195, %cst_60 {dimension_numbers = #tpu.dot_dimension_numbers<[1], [0], [0], [1], [0, 0, 1, 1], [], []>} : vector<8x16xbf16>, vector<16x64xbf16>, vector<8x64xf32> -> vector<8x64xf32>
    %197 = arith.addf %172, %196 : vector<8x64xf32>
    %198 = vector.extract_strided_slice %43 {offsets = [8, 32], sizes = [8, 16], strides = [1, 1]} : vector<16x192xf32> to vector<8x16xf32>
    %199 = arith.truncf %198 : vector<8x16xf32> to vector<8x16xbf16>
    %200 = vector.extract_strided_slice %43 {offsets = [8, 96], sizes = [8, 16], strides = [1, 1]} : vector<16x192xf32> to vector<8x16xf32>
    %201 = arith.truncf %200 : vector<8x16xf32> to vector<8x16xbf16>
    %202 = vector.extract_strided_slice %43 {offsets = [8, 160], sizes = [8, 16], strides = [1, 1]} : vector<16x192xf32> to vector<8x16xf32>
    %203 = arith.truncf %202 : vector<8x16xf32> to vector<8x16xbf16>
    %cst_61 = arith.constant dense<0.000000e+00> : vector<8x8xf32>
    %204 = tpu.matmul %199, %201, %cst_61 {dimension_numbers = #tpu.dot_dimension_numbers<[1], [1], [0], [0], [0, 0, 1, 0], [], []>} : vector<8x16xbf16>, vector<8x16xbf16>, vector<8x8xf32> -> vector<8x8xf32>
    %205 = vector.broadcast %146 : vector<1x8xf32> to vector<8x8xf32>
    %206 = arith.addf %204, %205 : vector<8x8xf32>
    %cst_62 = arith.constant dense<0xFF800000> : vector<8xf32>
    %207 = vector.multi_reduction <maximumf>, %206, %cst_62 [1] : vector<8x8xf32> to vector<8xf32>
    %208 = vector.shape_cast %207 : vector<8xf32> to vector<8x1xf32>
    %209 = vector.broadcast %208 : vector<8x1xf32> to vector<8x8xf32>
    %210 = arith.subf %206, %209 : vector<8x8xf32>
    %211 = math.exp %210 : vector<8x8xf32>
    %cst_63 = arith.constant dense<0.000000e+00> : vector<8xf32>
    %212 = vector.multi_reduction <add>, %211, %cst_63 [1] : vector<8x8xf32> to vector<8xf32>
    %213 = vector.shape_cast %212 : vector<8xf32> to vector<8x1xf32>
    %214 = tpu.reciprocal %213 {approx = true} : vector<8x1xf32> -> vector<8x1xf32>
    %215 = vector.broadcast %214 : vector<8x1xf32> to vector<8x8xf32>
    %216 = arith.mulf %211, %215 : vector<8x8xf32>
    %217 = arith.truncf %216 : vector<8x8xf32> to vector<8x8xbf16>
    %cst_64 = arith.constant dense<0.000000e+00> : vector<8x16xf32>
    %218 = tpu.matmul %217, %203, %cst_64 {dimension_numbers = #tpu.dot_dimension_numbers<[1], [0], [0], [1], [0, 0, 1, 1], [], []>} : vector<8x8xbf16>, vector<8x16xbf16>, vector<8x16xf32> -> vector<8x16xf32>
    %219 = arith.truncf %218 : vector<8x16xf32> to vector<8x16xbf16>
    %220 = vector.extract_strided_slice %33 {offsets = [32, 0], sizes = [16, 64], strides = [1, 1]} : vector<64x64xbf16> to vector<16x64xbf16>
    %cst_65 = arith.constant dense<0.000000e+00> : vector<8x64xf32>
    %221 = tpu.matmul %219, %220, %cst_65 {dimension_numbers = #tpu.dot_dimension_numbers<[1], [0], [0], [1], [0, 0, 1, 1], [], []>} : vector<8x16xbf16>, vector<16x64xbf16>, vector<8x64xf32> -> vector<8x64xf32>
    %222 = arith.addf %197, %221 : vector<8x64xf32>
    %223 = vector.extract_strided_slice %43 {offsets = [8, 48], sizes = [8, 16], strides = [1, 1]} : vector<16x192xf32> to vector<8x16xf32>
    %224 = arith.truncf %223 : vector<8x16xf32> to vector<8x16xbf16>
    %225 = vector.extract_strided_slice %43 {offsets = [8, 112], sizes = [8, 16], strides = [1, 1]} : vector<16x192xf32> to vector<8x16xf32>
    %226 = arith.truncf %225 : vector<8x16xf32> to vector<8x16xbf16>
    %227 = vector.extract_strided_slice %43 {offsets = [8, 176], sizes = [8, 16], strides = [1, 1]} : vector<16x192xf32> to vector<8x16xf32>
    %228 = arith.truncf %227 : vector<8x16xf32> to vector<8x16xbf16>
    %cst_66 = arith.constant dense<0.000000e+00> : vector<8x8xf32>
    %229 = tpu.matmul %224, %226, %cst_66 {dimension_numbers = #tpu.dot_dimension_numbers<[1], [1], [0], [0], [0, 0, 1, 0], [], []>} : vector<8x16xbf16>, vector<8x16xbf16>, vector<8x8xf32> -> vector<8x8xf32>
    %230 = vector.broadcast %146 : vector<1x8xf32> to vector<8x8xf32>
    %231 = arith.addf %229, %230 : vector<8x8xf32>
    %cst_67 = arith.constant dense<0xFF800000> : vector<8xf32>
    %232 = vector.multi_reduction <maximumf>, %231, %cst_67 [1] : vector<8x8xf32> to vector<8xf32>
    %233 = vector.shape_cast %232 : vector<8xf32> to vector<8x1xf32>
    %234 = vector.broadcast %233 : vector<8x1xf32> to vector<8x8xf32>
    %235 = arith.subf %231, %234 : vector<8x8xf32>
    %236 = math.exp %235 : vector<8x8xf32>
    %cst_68 = arith.constant dense<0.000000e+00> : vector<8xf32>
    %237 = vector.multi_reduction <add>, %236, %cst_68 [1] : vector<8x8xf32> to vector<8xf32>
    %238 = vector.shape_cast %237 : vector<8xf32> to vector<8x1xf32>
    %239 = tpu.reciprocal %238 {approx = true} : vector<8x1xf32> -> vector<8x1xf32>
    %240 = vector.broadcast %239 : vector<8x1xf32> to vector<8x8xf32>
    %241 = arith.mulf %236, %240 : vector<8x8xf32>
    %242 = arith.truncf %241 : vector<8x8xf32> to vector<8x8xbf16>
    %cst_69 = arith.constant dense<0.000000e+00> : vector<8x16xf32>
    %243 = tpu.matmul %242, %228, %cst_69 {dimension_numbers = #tpu.dot_dimension_numbers<[1], [0], [0], [1], [0, 0, 1, 1], [], []>} : vector<8x8xbf16>, vector<8x16xbf16>, vector<8x16xf32> -> vector<8x16xf32>
    %244 = arith.truncf %243 : vector<8x16xf32> to vector<8x16xbf16>
    %245 = vector.extract_strided_slice %33 {offsets = [48, 0], sizes = [16, 64], strides = [1, 1]} : vector<64x64xbf16> to vector<16x64xbf16>
    %cst_70 = arith.constant dense<0.000000e+00> : vector<8x64xf32>
    %246 = tpu.matmul %244, %245, %cst_70 {dimension_numbers = #tpu.dot_dimension_numbers<[1], [0], [0], [1], [0, 0, 1, 1], [], []>} : vector<8x16xbf16>, vector<16x64xbf16>, vector<8x64xf32> -> vector<8x64xf32>
    %247 = arith.addf %222, %246 : vector<8x64xf32>
    %248 = tpu.concatenate %145, %247 in 0 : vector<8x64xf32>, vector<8x64xf32> -> vector<16x64xf32>
    %c0_71 = arith.constant 0 : index
    %c0_72 = arith.constant 0 : index
    %c0_73 = arith.constant 0 : index
    %249 = vector.load %arg6[%c0_71, %c0_72, %c0_73] : memref<2x1x64xf32, #tpu.memory_space<vmem>>, vector<1x1x64xf32>
    %250 = vector.shape_cast %249 : vector<1x1x64xf32> to vector<1x64xf32>
    %251 = vector.broadcast %250 : vector<1x64xf32> to vector<16x64xf32>
    %252 = arith.addf %248, %251 : vector<16x64xf32>
    %253 = arith.addf %252, %27 : vector<16x64xf32>
    %c0_74 = arith.constant 0 : index
    %c0_75 = arith.constant 0 : index
    %c0_76 = arith.constant 0 : index
    %254 = vector.load %arg7[%c0_74, %c0_75, %c0_76] : memref<2x1x64xf32, #tpu.memory_space<vmem>>, vector<1x1x64xf32>
    %255 = vector.shape_cast %254 : vector<1x1x64xf32> to vector<1x64xf32>
    %c0_77 = arith.constant 0 : index
    %c0_78 = arith.constant 0 : index
    %c0_79 = arith.constant 0 : index
    %256 = vector.load %arg8[%c0_77, %c0_78, %c0_79] : memref<2x1x64xf32, #tpu.memory_space<vmem>>, vector<1x1x64xf32>
    %257 = vector.shape_cast %256 : vector<1x1x64xf32> to vector<1x64xf32>
    %cst_80 = arith.constant dense<0.000000e+00> : vector<16xf32>
    %258 = vector.multi_reduction <add>, %253, %cst_80 [1] : vector<16x64xf32> to vector<16xf32>
    %259 = vector.shape_cast %258 : vector<16xf32> to vector<16x1xf32>
    %cst_81 = arith.constant 6.400000e+01 : f32
    %260 = vector.broadcast %cst_81 : f32 to vector<16x1xf32>
    %261 = arith.divf %259, %260 : vector<16x1xf32>
    %262 = vector.broadcast %261 : vector<16x1xf32> to vector<16x64xf32>
    %263 = arith.subf %253, %262 : vector<16x64xf32>
    %264 = vector.broadcast %261 : vector<16x1xf32> to vector<16x64xf32>
    %265 = arith.subf %253, %264 : vector<16x64xf32>
    %266 = arith.mulf %263, %265 : vector<16x64xf32>
    %cst_82 = arith.constant dense<0.000000e+00> : vector<16xf32>
    %267 = vector.multi_reduction <add>, %266, %cst_82 [1] : vector<16x64xf32> to vector<16xf32>
    %268 = vector.shape_cast %267 : vector<16xf32> to vector<16x1xf32>
    %cst_83 = arith.constant 6.400000e+01 : f32
    %269 = vector.broadcast %cst_83 : f32 to vector<16x1xf32>
    %270 = arith.divf %268, %269 : vector<16x1xf32>
    %271 = vector.broadcast %261 : vector<16x1xf32> to vector<16x64xf32>
    %272 = arith.subf %253, %271 : vector<16x64xf32>
    %cst_84 = arith.constant 9.99999996E-13 : f32
    %273 = vector.broadcast %cst_84 : f32 to vector<16x1xf32>
    %274 = arith.addf %270, %273 : vector<16x1xf32>
    %275 = math.rsqrt %274 : vector<16x1xf32>
    %276 = vector.broadcast %275 : vector<16x1xf32> to vector<16x64xf32>
    %277 = arith.mulf %272, %276 : vector<16x64xf32>
    %278 = vector.broadcast %255 : vector<1x64xf32> to vector<16x64xf32>
    %279 = arith.mulf %277, %278 : vector<16x64xf32>
    %280 = vector.broadcast %257 : vector<1x64xf32> to vector<16x64xf32>
    %281 = arith.addf %279, %280 : vector<16x64xf32>
    %282 = arith.truncf %281 : vector<16x64xf32> to vector<16x64xbf16>
    %cst_85 = arith.constant dense<0.000000e+00> : vector<16x128xf32>
    %283 = tpu.matmul %282, %35, %cst_85 {dimension_numbers = #tpu.dot_dimension_numbers<[1], [0], [0], [1], [0, 0, 1, 1], [], []>} : vector<16x64xbf16>, vector<64x128xbf16>, vector<16x128xf32> -> vector<16x128xf32>
    %c0_86 = arith.constant 0 : index
    %c0_87 = arith.constant 0 : index
    %c0_88 = arith.constant 0 : index
    %284 = vector.load %arg10[%c0_86, %c0_87, %c0_88] : memref<2x1x128xf32, #tpu.memory_space<vmem>>, vector<1x1x128xf32>
    %285 = vector.shape_cast %284 : vector<1x1x128xf32> to vector<1x128xf32>
    %286 = vector.broadcast %285 : vector<1x128xf32> to vector<16x128xf32>
    %287 = arith.addf %283, %286 : vector<16x128xf32>
    %cst_89 = arith.constant 5.000000e-01 : f32
    %288 = vector.broadcast %cst_89 : f32 to vector<16x128xf32>
    %289 = arith.mulf %288, %287 : vector<16x128xf32>
    %cst_90 = arith.constant 4.471500e-02 : f32
    %290 = vector.broadcast %cst_90 : f32 to vector<16x128xf32>
    %291 = arith.mulf %290, %287 : vector<16x128xf32>
    %292 = arith.mulf %291, %287 : vector<16x128xf32>
    %293 = arith.mulf %292, %287 : vector<16x128xf32>
    %294 = arith.addf %287, %293 : vector<16x128xf32>
    %cst_91 = arith.constant 0.797884583 : f32
    %295 = vector.broadcast %cst_91 : f32 to vector<16x128xf32>
    %296 = arith.mulf %295, %294 : vector<16x128xf32>
    %297 = math.tanh %296 : vector<16x128xf32>
    %cst_92 = arith.constant 1.000000e+00 : f32
    %298 = vector.broadcast %cst_92 : f32 to vector<16x128xf32>
    %299 = arith.addf %298, %297 : vector<16x128xf32>
    %300 = arith.mulf %289, %299 : vector<16x128xf32>
    %301 = arith.truncf %300 : vector<16x128xf32> to vector<16x128xbf16>
    %cst_93 = arith.constant dense<0.000000e+00> : vector<16x64xf32>
    %302 = tpu.matmul %301, %37, %cst_93 {dimension_numbers = #tpu.dot_dimension_numbers<[1], [0], [0], [1], [0, 0, 1, 1], [], []>} : vector<16x128xbf16>, vector<128x64xbf16>, vector<16x64xf32> -> vector<16x64xf32>
    %c0_94 = arith.constant 0 : index
    %c0_95 = arith.constant 0 : index
    %c0_96 = arith.constant 0 : index
    %303 = vector.load %arg12[%c0_94, %c0_95, %c0_96] : memref<2x1x64xf32, #tpu.memory_space<vmem>>, vector<1x1x64xf32>
    %304 = vector.shape_cast %303 : vector<1x1x64xf32> to vector<1x64xf32>
    %305 = vector.broadcast %304 : vector<1x64xf32> to vector<16x64xf32>
    %306 = arith.addf %302, %305 : vector<16x64xf32>
    %307 = arith.addf %306, %281 : vector<16x64xf32>
    %c0_97 = arith.constant 0 : index
    %c0_98 = arith.constant 0 : index
    %c0_99 = arith.constant 0 : index
    %308 = vector.load %arg13[%c0_97, %c0_98, %c0_99] : memref<2x1x64xf32, #tpu.memory_space<vmem>>, vector<1x1x64xf32>
    %309 = vector.shape_cast %308 : vector<1x1x64xf32> to vector<1x64xf32>
    %c0_100 = arith.constant 0 : index
    %c0_101 = arith.constant 0 : index
    %c0_102 = arith.constant 0 : index
    %310 = vector.load %arg14[%c0_100, %c0_101, %c0_102] : memref<2x1x64xf32, #tpu.memory_space<vmem>>, vector<1x1x64xf32>
    %311 = vector.shape_cast %310 : vector<1x1x64xf32> to vector<1x64xf32>
    %cst_103 = arith.constant dense<0.000000e+00> : vector<16xf32>
    %312 = vector.multi_reduction <add>, %307, %cst_103 [1] : vector<16x64xf32> to vector<16xf32>
    %313 = vector.shape_cast %312 : vector<16xf32> to vector<16x1xf32>
    %cst_104 = arith.constant 6.400000e+01 : f32
    %314 = vector.broadcast %cst_104 : f32 to vector<16x1xf32>
    %315 = arith.divf %313, %314 : vector<16x1xf32>
    %316 = vector.broadcast %315 : vector<16x1xf32> to vector<16x64xf32>
    %317 = arith.subf %307, %316 : vector<16x64xf32>
    %318 = vector.broadcast %315 : vector<16x1xf32> to vector<16x64xf32>
    %319 = arith.subf %307, %318 : vector<16x64xf32>
    %320 = arith.mulf %317, %319 : vector<16x64xf32>
    %cst_105 = arith.constant dense<0.000000e+00> : vector<16xf32>
    %321 = vector.multi_reduction <add>, %320, %cst_105 [1] : vector<16x64xf32> to vector<16xf32>
    %322 = vector.shape_cast %321 : vector<16xf32> to vector<16x1xf32>
    %cst_106 = arith.constant 6.400000e+01 : f32
    %323 = vector.broadcast %cst_106 : f32 to vector<16x1xf32>
    %324 = arith.divf %322, %323 : vector<16x1xf32>
    %325 = vector.broadcast %315 : vector<16x1xf32> to vector<16x64xf32>
    %326 = arith.subf %307, %325 : vector<16x64xf32>
    %cst_107 = arith.constant 9.99999996E-13 : f32
    %327 = vector.broadcast %cst_107 : f32 to vector<16x1xf32>
    %328 = arith.addf %324, %327 : vector<16x1xf32>
    %329 = math.rsqrt %328 : vector<16x1xf32>
    %330 = vector.broadcast %329 : vector<16x1xf32> to vector<16x64xf32>
    %331 = arith.mulf %326, %330 : vector<16x64xf32>
    %332 = vector.broadcast %309 : vector<1x64xf32> to vector<16x64xf32>
    %333 = arith.mulf %331, %332 : vector<16x64xf32>
    %334 = vector.broadcast %311 : vector<1x64xf32> to vector<16x64xf32>
    %335 = arith.addf %333, %334 : vector<16x64xf32>
    %c1 = arith.constant 1 : index
    %c0_108 = arith.constant 0 : index
    %c0_109 = arith.constant 0 : index
    %336 = vector.load %arg3[%c1, %c0_108, %c0_109] : memref<2x64x192xbf16, #tpu.memory_space<vmem>>, vector<1x64x192xbf16>
    %337 = vector.shape_cast %336 : vector<1x64x192xbf16> to vector<64x192xbf16>
    %c1_110 = arith.constant 1 : index
    %c0_111 = arith.constant 0 : index
    %c0_112 = arith.constant 0 : index
    %338 = vector.load %arg5[%c1_110, %c0_111, %c0_112] : memref<2x64x64xbf16, #tpu.memory_space<vmem>>, vector<1x64x64xbf16>
    %339 = vector.shape_cast %338 : vector<1x64x64xbf16> to vector<64x64xbf16>
    %c1_113 = arith.constant 1 : index
    %c0_114 = arith.constant 0 : index
    %c0_115 = arith.constant 0 : index
    %340 = vector.load %arg9[%c1_113, %c0_114, %c0_115] : memref<2x64x128xbf16, #tpu.memory_space<vmem>>, vector<1x64x128xbf16>
    %341 = vector.shape_cast %340 : vector<1x64x128xbf16> to vector<64x128xbf16>
    %c1_116 = arith.constant 1 : index
    %c0_117 = arith.constant 0 : index
    %c0_118 = arith.constant 0 : index
    %342 = vector.load %arg11[%c1_116, %c0_117, %c0_118] : memref<2x128x64xbf16, #tpu.memory_space<vmem>>, vector<1x128x64xbf16>
    %343 = vector.shape_cast %342 : vector<1x128x64xbf16> to vector<128x64xbf16>
    %344 = arith.truncf %335 : vector<16x64xf32> to vector<16x64xbf16>
    %cst_119 = arith.constant dense<0.000000e+00> : vector<16x192xf32>
    %345 = tpu.matmul %344, %337, %cst_119 {dimension_numbers = #tpu.dot_dimension_numbers<[1], [0], [0], [1], [0, 0, 1, 1], [], []>} : vector<16x64xbf16>, vector<64x192xbf16>, vector<16x192xf32> -> vector<16x192xf32>
    %c1_120 = arith.constant 1 : index
    %c0_121 = arith.constant 0 : index
    %c0_122 = arith.constant 0 : index
    %346 = vector.load %arg4[%c1_120, %c0_121, %c0_122] : memref<2x1x192xf32, #tpu.memory_space<vmem>>, vector<1x1x192xf32>
    %347 = vector.shape_cast %346 : vector<1x1x192xf32> to vector<1x192xf32>
    %348 = vector.broadcast %347 : vector<1x192xf32> to vector<16x192xf32>
    %349 = arith.addf %345, %348 : vector<16x192xf32>
    %350 = vector.extract_strided_slice %29 {offsets = [0, 0], sizes = [1, 8], strides = [1, 1]} : vector<2x8xf32> to vector<1x8xf32>
    %cst_123 = arith.constant 0.000000e+00 : f32
    %351 = vector.broadcast %cst_123 : f32 to vector<8x64xf32>
    %352 = vector.extract_strided_slice %349 {offsets = [0, 0], sizes = [8, 16], strides = [1, 1]} : vector<16x192xf32> to vector<8x16xf32>
    %353 = arith.truncf %352 : vector<8x16xf32> to vector<8x16xbf16>
    %354 = vector.extract_strided_slice %349 {offsets = [0, 64], sizes = [8, 16], strides = [1, 1]} : vector<16x192xf32> to vector<8x16xf32>
    %355 = arith.truncf %354 : vector<8x16xf32> to vector<8x16xbf16>
    %356 = vector.extract_strided_slice %349 {offsets = [0, 128], sizes = [8, 16], strides = [1, 1]} : vector<16x192xf32> to vector<8x16xf32>
    %357 = arith.truncf %356 : vector<8x16xf32> to vector<8x16xbf16>
    %cst_124 = arith.constant dense<0.000000e+00> : vector<8x8xf32>
    %358 = tpu.matmul %353, %355, %cst_124 {dimension_numbers = #tpu.dot_dimension_numbers<[1], [1], [0], [0], [0, 0, 1, 0], [], []>} : vector<8x16xbf16>, vector<8x16xbf16>, vector<8x8xf32> -> vector<8x8xf32>
    %359 = vector.broadcast %350 : vector<1x8xf32> to vector<8x8xf32>
    %360 = arith.addf %358, %359 : vector<8x8xf32>
    %cst_125 = arith.constant dense<0xFF800000> : vector<8xf32>
    %361 = vector.multi_reduction <maximumf>, %360, %cst_125 [1] : vector<8x8xf32> to vector<8xf32>
    %362 = vector.shape_cast %361 : vector<8xf32> to vector<8x1xf32>
    %363 = vector.broadcast %362 : vector<8x1xf32> to vector<8x8xf32>
    %364 = arith.subf %360, %363 : vector<8x8xf32>
    %365 = math.exp %364 : vector<8x8xf32>
    %cst_126 = arith.constant dense<0.000000e+00> : vector<8xf32>
    %366 = vector.multi_reduction <add>, %365, %cst_126 [1] : vector<8x8xf32> to vector<8xf32>
    %367 = vector.shape_cast %366 : vector<8xf32> to vector<8x1xf32>
    %368 = tpu.reciprocal %367 {approx = true} : vector<8x1xf32> -> vector<8x1xf32>
    %369 = vector.broadcast %368 : vector<8x1xf32> to vector<8x8xf32>
    %370 = arith.mulf %365, %369 : vector<8x8xf32>
    %371 = arith.truncf %370 : vector<8x8xf32> to vector<8x8xbf16>
    %cst_127 = arith.constant dense<0.000000e+00> : vector<8x16xf32>
    %372 = tpu.matmul %371, %357, %cst_127 {dimension_numbers = #tpu.dot_dimension_numbers<[1], [0], [0], [1], [0, 0, 1, 1], [], []>} : vector<8x8xbf16>, vector<8x16xbf16>, vector<8x16xf32> -> vector<8x16xf32>
    %373 = arith.truncf %372 : vector<8x16xf32> to vector<8x16xbf16>
    %374 = vector.extract_strided_slice %339 {offsets = [0, 0], sizes = [16, 64], strides = [1, 1]} : vector<64x64xbf16> to vector<16x64xbf16>
    %cst_128 = arith.constant dense<0.000000e+00> : vector<8x64xf32>
    %375 = tpu.matmul %373, %374, %cst_128 {dimension_numbers = #tpu.dot_dimension_numbers<[1], [0], [0], [1], [0, 0, 1, 1], [], []>} : vector<8x16xbf16>, vector<16x64xbf16>, vector<8x64xf32> -> vector<8x64xf32>
    %376 = arith.addf %351, %375 : vector<8x64xf32>
    %377 = vector.extract_strided_slice %349 {offsets = [0, 16], sizes = [8, 16], strides = [1, 1]} : vector<16x192xf32> to vector<8x16xf32>
    %378 = arith.truncf %377 : vector<8x16xf32> to vector<8x16xbf16>
    %379 = vector.extract_strided_slice %349 {offsets = [0, 80], sizes = [8, 16], strides = [1, 1]} : vector<16x192xf32> to vector<8x16xf32>
    %380 = arith.truncf %379 : vector<8x16xf32> to vector<8x16xbf16>
    %381 = vector.extract_strided_slice %349 {offsets = [0, 144], sizes = [8, 16], strides = [1, 1]} : vector<16x192xf32> to vector<8x16xf32>
    %382 = arith.truncf %381 : vector<8x16xf32> to vector<8x16xbf16>
    %cst_129 = arith.constant dense<0.000000e+00> : vector<8x8xf32>
    %383 = tpu.matmul %378, %380, %cst_129 {dimension_numbers = #tpu.dot_dimension_numbers<[1], [1], [0], [0], [0, 0, 1, 0], [], []>} : vector<8x16xbf16>, vector<8x16xbf16>, vector<8x8xf32> -> vector<8x8xf32>
    %384 = vector.broadcast %350 : vector<1x8xf32> to vector<8x8xf32>
    %385 = arith.addf %383, %384 : vector<8x8xf32>
    %cst_130 = arith.constant dense<0xFF800000> : vector<8xf32>
    %386 = vector.multi_reduction <maximumf>, %385, %cst_130 [1] : vector<8x8xf32> to vector<8xf32>
    %387 = vector.shape_cast %386 : vector<8xf32> to vector<8x1xf32>
    %388 = vector.broadcast %387 : vector<8x1xf32> to vector<8x8xf32>
    %389 = arith.subf %385, %388 : vector<8x8xf32>
    %390 = math.exp %389 : vector<8x8xf32>
    %cst_131 = arith.constant dense<0.000000e+00> : vector<8xf32>
    %391 = vector.multi_reduction <add>, %390, %cst_131 [1] : vector<8x8xf32> to vector<8xf32>
    %392 = vector.shape_cast %391 : vector<8xf32> to vector<8x1xf32>
    %393 = tpu.reciprocal %392 {approx = true} : vector<8x1xf32> -> vector<8x1xf32>
    %394 = vector.broadcast %393 : vector<8x1xf32> to vector<8x8xf32>
    %395 = arith.mulf %390, %394 : vector<8x8xf32>
    %396 = arith.truncf %395 : vector<8x8xf32> to vector<8x8xbf16>
    %cst_132 = arith.constant dense<0.000000e+00> : vector<8x16xf32>
    %397 = tpu.matmul %396, %382, %cst_132 {dimension_numbers = #tpu.dot_dimension_numbers<[1], [0], [0], [1], [0, 0, 1, 1], [], []>} : vector<8x8xbf16>, vector<8x16xbf16>, vector<8x16xf32> -> vector<8x16xf32>
    %398 = arith.truncf %397 : vector<8x16xf32> to vector<8x16xbf16>
    %399 = vector.extract_strided_slice %339 {offsets = [16, 0], sizes = [16, 64], strides = [1, 1]} : vector<64x64xbf16> to vector<16x64xbf16>
    %cst_133 = arith.constant dense<0.000000e+00> : vector<8x64xf32>
    %400 = tpu.matmul %398, %399, %cst_133 {dimension_numbers = #tpu.dot_dimension_numbers<[1], [0], [0], [1], [0, 0, 1, 1], [], []>} : vector<8x16xbf16>, vector<16x64xbf16>, vector<8x64xf32> -> vector<8x64xf32>
    %401 = arith.addf %376, %400 : vector<8x64xf32>
    %402 = vector.extract_strided_slice %349 {offsets = [0, 32], sizes = [8, 16], strides = [1, 1]} : vector<16x192xf32> to vector<8x16xf32>
    %403 = arith.truncf %402 : vector<8x16xf32> to vector<8x16xbf16>
    %404 = vector.extract_strided_slice %349 {offsets = [0, 96], sizes = [8, 16], strides = [1, 1]} : vector<16x192xf32> to vector<8x16xf32>
    %405 = arith.truncf %404 : vector<8x16xf32> to vector<8x16xbf16>
    %406 = vector.extract_strided_slice %349 {offsets = [0, 160], sizes = [8, 16], strides = [1, 1]} : vector<16x192xf32> to vector<8x16xf32>
    %407 = arith.truncf %406 : vector<8x16xf32> to vector<8x16xbf16>
    %cst_134 = arith.constant dense<0.000000e+00> : vector<8x8xf32>
    %408 = tpu.matmul %403, %405, %cst_134 {dimension_numbers = #tpu.dot_dimension_numbers<[1], [1], [0], [0], [0, 0, 1, 0], [], []>} : vector<8x16xbf16>, vector<8x16xbf16>, vector<8x8xf32> -> vector<8x8xf32>
    %409 = vector.broadcast %350 : vector<1x8xf32> to vector<8x8xf32>
    %410 = arith.addf %408, %409 : vector<8x8xf32>
    %cst_135 = arith.constant dense<0xFF800000> : vector<8xf32>
    %411 = vector.multi_reduction <maximumf>, %410, %cst_135 [1] : vector<8x8xf32> to vector<8xf32>
    %412 = vector.shape_cast %411 : vector<8xf32> to vector<8x1xf32>
    %413 = vector.broadcast %412 : vector<8x1xf32> to vector<8x8xf32>
    %414 = arith.subf %410, %413 : vector<8x8xf32>
    %415 = math.exp %414 : vector<8x8xf32>
    %cst_136 = arith.constant dense<0.000000e+00> : vector<8xf32>
    %416 = vector.multi_reduction <add>, %415, %cst_136 [1] : vector<8x8xf32> to vector<8xf32>
    %417 = vector.shape_cast %416 : vector<8xf32> to vector<8x1xf32>
    %418 = tpu.reciprocal %417 {approx = true} : vector<8x1xf32> -> vector<8x1xf32>
    %419 = vector.broadcast %418 : vector<8x1xf32> to vector<8x8xf32>
    %420 = arith.mulf %415, %419 : vector<8x8xf32>
    %421 = arith.truncf %420 : vector<8x8xf32> to vector<8x8xbf16>
    %cst_137 = arith.constant dense<0.000000e+00> : vector<8x16xf32>
    %422 = tpu.matmul %421, %407, %cst_137 {dimension_numbers = #tpu.dot_dimension_numbers<[1], [0], [0], [1], [0, 0, 1, 1], [], []>} : vector<8x8xbf16>, vector<8x16xbf16>, vector<8x16xf32> -> vector<8x16xf32>
    %423 = arith.truncf %422 : vector<8x16xf32> to vector<8x16xbf16>
    %424 = vector.extract_strided_slice %339 {offsets = [32, 0], sizes = [16, 64], strides = [1, 1]} : vector<64x64xbf16> to vector<16x64xbf16>
    %cst_138 = arith.constant dense<0.000000e+00> : vector<8x64xf32>
    %425 = tpu.matmul %423, %424, %cst_138 {dimension_numbers = #tpu.dot_dimension_numbers<[1], [0], [0], [1], [0, 0, 1, 1], [], []>} : vector<8x16xbf16>, vector<16x64xbf16>, vector<8x64xf32> -> vector<8x64xf32>
    %426 = arith.addf %401, %425 : vector<8x64xf32>
    %427 = vector.extract_strided_slice %349 {offsets = [0, 48], sizes = [8, 16], strides = [1, 1]} : vector<16x192xf32> to vector<8x16xf32>
    %428 = arith.truncf %427 : vector<8x16xf32> to vector<8x16xbf16>
    %429 = vector.extract_strided_slice %349 {offsets = [0, 112], sizes = [8, 16], strides = [1, 1]} : vector<16x192xf32> to vector<8x16xf32>
    %430 = arith.truncf %429 : vector<8x16xf32> to vector<8x16xbf16>
    %431 = vector.extract_strided_slice %349 {offsets = [0, 176], sizes = [8, 16], strides = [1, 1]} : vector<16x192xf32> to vector<8x16xf32>
    %432 = arith.truncf %431 : vector<8x16xf32> to vector<8x16xbf16>
    %cst_139 = arith.constant dense<0.000000e+00> : vector<8x8xf32>
    %433 = tpu.matmul %428, %430, %cst_139 {dimension_numbers = #tpu.dot_dimension_numbers<[1], [1], [0], [0], [0, 0, 1, 0], [], []>} : vector<8x16xbf16>, vector<8x16xbf16>, vector<8x8xf32> -> vector<8x8xf32>
    %434 = vector.broadcast %350 : vector<1x8xf32> to vector<8x8xf32>
    %435 = arith.addf %433, %434 : vector<8x8xf32>
    %cst_140 = arith.constant dense<0xFF800000> : vector<8xf32>
    %436 = vector.multi_reduction <maximumf>, %435, %cst_140 [1] : vector<8x8xf32> to vector<8xf32>
    %437 = vector.shape_cast %436 : vector<8xf32> to vector<8x1xf32>
    %438 = vector.broadcast %437 : vector<8x1xf32> to vector<8x8xf32>
    %439 = arith.subf %435, %438 : vector<8x8xf32>
    %440 = math.exp %439 : vector<8x8xf32>
    %cst_141 = arith.constant dense<0.000000e+00> : vector<8xf32>
    %441 = vector.multi_reduction <add>, %440, %cst_141 [1] : vector<8x8xf32> to vector<8xf32>
    %442 = vector.shape_cast %441 : vector<8xf32> to vector<8x1xf32>
    %443 = tpu.reciprocal %442 {approx = true} : vector<8x1xf32> -> vector<8x1xf32>
    %444 = vector.broadcast %443 : vector<8x1xf32> to vector<8x8xf32>
    %445 = arith.mulf %440, %444 : vector<8x8xf32>
    %446 = arith.truncf %445 : vector<8x8xf32> to vector<8x8xbf16>
    %cst_142 = arith.constant dense<0.000000e+00> : vector<8x16xf32>
    %447 = tpu.matmul %446, %432, %cst_142 {dimension_numbers = #tpu.dot_dimension_numbers<[1], [0], [0], [1], [0, 0, 1, 1], [], []>} : vector<8x8xbf16>, vector<8x16xbf16>, vector<8x16xf32> -> vector<8x16xf32>
    %448 = arith.truncf %447 : vector<8x16xf32> to vector<8x16xbf16>
    %449 = vector.extract_strided_slice %339 {offsets = [48, 0], sizes = [16, 64], strides = [1, 1]} : vector<64x64xbf16> to vector<16x64xbf16>
    %cst_143 = arith.constant dense<0.000000e+00> : vector<8x64xf32>
    %450 = tpu.matmul %448, %449, %cst_143 {dimension_numbers = #tpu.dot_dimension_numbers<[1], [0], [0], [1], [0, 0, 1, 1], [], []>} : vector<8x16xbf16>, vector<16x64xbf16>, vector<8x64xf32> -> vector<8x64xf32>
    %451 = arith.addf %426, %450 : vector<8x64xf32>
    %452 = vector.extract_strided_slice %29 {offsets = [1, 0], sizes = [1, 8], strides = [1, 1]} : vector<2x8xf32> to vector<1x8xf32>
    %cst_144 = arith.constant 0.000000e+00 : f32
    %453 = vector.broadcast %cst_144 : f32 to vector<8x64xf32>
    %454 = vector.extract_strided_slice %349 {offsets = [8, 0], sizes = [8, 16], strides = [1, 1]} : vector<16x192xf32> to vector<8x16xf32>
    %455 = arith.truncf %454 : vector<8x16xf32> to vector<8x16xbf16>
    %456 = vector.extract_strided_slice %349 {offsets = [8, 64], sizes = [8, 16], strides = [1, 1]} : vector<16x192xf32> to vector<8x16xf32>
    %457 = arith.truncf %456 : vector<8x16xf32> to vector<8x16xbf16>
    %458 = vector.extract_strided_slice %349 {offsets = [8, 128], sizes = [8, 16], strides = [1, 1]} : vector<16x192xf32> to vector<8x16xf32>
    %459 = arith.truncf %458 : vector<8x16xf32> to vector<8x16xbf16>
    %cst_145 = arith.constant dense<0.000000e+00> : vector<8x8xf32>
    %460 = tpu.matmul %455, %457, %cst_145 {dimension_numbers = #tpu.dot_dimension_numbers<[1], [1], [0], [0], [0, 0, 1, 0], [], []>} : vector<8x16xbf16>, vector<8x16xbf16>, vector<8x8xf32> -> vector<8x8xf32>
    %461 = vector.broadcast %452 : vector<1x8xf32> to vector<8x8xf32>
    %462 = arith.addf %460, %461 : vector<8x8xf32>
    %cst_146 = arith.constant dense<0xFF800000> : vector<8xf32>
    %463 = vector.multi_reduction <maximumf>, %462, %cst_146 [1] : vector<8x8xf32> to vector<8xf32>
    %464 = vector.shape_cast %463 : vector<8xf32> to vector<8x1xf32>
    %465 = vector.broadcast %464 : vector<8x1xf32> to vector<8x8xf32>
    %466 = arith.subf %462, %465 : vector<8x8xf32>
    %467 = math.exp %466 : vector<8x8xf32>
    %cst_147 = arith.constant dense<0.000000e+00> : vector<8xf32>
    %468 = vector.multi_reduction <add>, %467, %cst_147 [1] : vector<8x8xf32> to vector<8xf32>
    %469 = vector.shape_cast %468 : vector<8xf32> to vector<8x1xf32>
    %470 = tpu.reciprocal %469 {approx = true} : vector<8x1xf32> -> vector<8x1xf32>
    %471 = vector.broadcast %470 : vector<8x1xf32> to vector<8x8xf32>
    %472 = arith.mulf %467, %471 : vector<8x8xf32>
    %473 = arith.truncf %472 : vector<8x8xf32> to vector<8x8xbf16>
    %cst_148 = arith.constant dense<0.000000e+00> : vector<8x16xf32>
    %474 = tpu.matmul %473, %459, %cst_148 {dimension_numbers = #tpu.dot_dimension_numbers<[1], [0], [0], [1], [0, 0, 1, 1], [], []>} : vector<8x8xbf16>, vector<8x16xbf16>, vector<8x16xf32> -> vector<8x16xf32>
    %475 = arith.truncf %474 : vector<8x16xf32> to vector<8x16xbf16>
    %476 = vector.extract_strided_slice %339 {offsets = [0, 0], sizes = [16, 64], strides = [1, 1]} : vector<64x64xbf16> to vector<16x64xbf16>
    %cst_149 = arith.constant dense<0.000000e+00> : vector<8x64xf32>
    %477 = tpu.matmul %475, %476, %cst_149 {dimension_numbers = #tpu.dot_dimension_numbers<[1], [0], [0], [1], [0, 0, 1, 1], [], []>} : vector<8x16xbf16>, vector<16x64xbf16>, vector<8x64xf32> -> vector<8x64xf32>
    %478 = arith.addf %453, %477 : vector<8x64xf32>
    %479 = vector.extract_strided_slice %349 {offsets = [8, 16], sizes = [8, 16], strides = [1, 1]} : vector<16x192xf32> to vector<8x16xf32>
    %480 = arith.truncf %479 : vector<8x16xf32> to vector<8x16xbf16>
    %481 = vector.extract_strided_slice %349 {offsets = [8, 80], sizes = [8, 16], strides = [1, 1]} : vector<16x192xf32> to vector<8x16xf32>
    %482 = arith.truncf %481 : vector<8x16xf32> to vector<8x16xbf16>
    %483 = vector.extract_strided_slice %349 {offsets = [8, 144], sizes = [8, 16], strides = [1, 1]} : vector<16x192xf32> to vector<8x16xf32>
    %484 = arith.truncf %483 : vector<8x16xf32> to vector<8x16xbf16>
    %cst_150 = arith.constant dense<0.000000e+00> : vector<8x8xf32>
    %485 = tpu.matmul %480, %482, %cst_150 {dimension_numbers = #tpu.dot_dimension_numbers<[1], [1], [0], [0], [0, 0, 1, 0], [], []>} : vector<8x16xbf16>, vector<8x16xbf16>, vector<8x8xf32> -> vector<8x8xf32>
    %486 = vector.broadcast %452 : vector<1x8xf32> to vector<8x8xf32>
    %487 = arith.addf %485, %486 : vector<8x8xf32>
    %cst_151 = arith.constant dense<0xFF800000> : vector<8xf32>
    %488 = vector.multi_reduction <maximumf>, %487, %cst_151 [1] : vector<8x8xf32> to vector<8xf32>
    %489 = vector.shape_cast %488 : vector<8xf32> to vector<8x1xf32>
    %490 = vector.broadcast %489 : vector<8x1xf32> to vector<8x8xf32>
    %491 = arith.subf %487, %490 : vector<8x8xf32>
    %492 = math.exp %491 : vector<8x8xf32>
    %cst_152 = arith.constant dense<0.000000e+00> : vector<8xf32>
    %493 = vector.multi_reduction <add>, %492, %cst_152 [1] : vector<8x8xf32> to vector<8xf32>
    %494 = vector.shape_cast %493 : vector<8xf32> to vector<8x1xf32>
    %495 = tpu.reciprocal %494 {approx = true} : vector<8x1xf32> -> vector<8x1xf32>
    %496 = vector.broadcast %495 : vector<8x1xf32> to vector<8x8xf32>
    %497 = arith.mulf %492, %496 : vector<8x8xf32>
    %498 = arith.truncf %497 : vector<8x8xf32> to vector<8x8xbf16>
    %cst_153 = arith.constant dense<0.000000e+00> : vector<8x16xf32>
    %499 = tpu.matmul %498, %484, %cst_153 {dimension_numbers = #tpu.dot_dimension_numbers<[1], [0], [0], [1], [0, 0, 1, 1], [], []>} : vector<8x8xbf16>, vector<8x16xbf16>, vector<8x16xf32> -> vector<8x16xf32>
    %500 = arith.truncf %499 : vector<8x16xf32> to vector<8x16xbf16>
    %501 = vector.extract_strided_slice %339 {offsets = [16, 0], sizes = [16, 64], strides = [1, 1]} : vector<64x64xbf16> to vector<16x64xbf16>
    %cst_154 = arith.constant dense<0.000000e+00> : vector<8x64xf32>
    %502 = tpu.matmul %500, %501, %cst_154 {dimension_numbers = #tpu.dot_dimension_numbers<[1], [0], [0], [1], [0, 0, 1, 1], [], []>} : vector<8x16xbf16>, vector<16x64xbf16>, vector<8x64xf32> -> vector<8x64xf32>
    %503 = arith.addf %478, %502 : vector<8x64xf32>
    %504 = vector.extract_strided_slice %349 {offsets = [8, 32], sizes = [8, 16], strides = [1, 1]} : vector<16x192xf32> to vector<8x16xf32>
    %505 = arith.truncf %504 : vector<8x16xf32> to vector<8x16xbf16>
    %506 = vector.extract_strided_slice %349 {offsets = [8, 96], sizes = [8, 16], strides = [1, 1]} : vector<16x192xf32> to vector<8x16xf32>
    %507 = arith.truncf %506 : vector<8x16xf32> to vector<8x16xbf16>
    %508 = vector.extract_strided_slice %349 {offsets = [8, 160], sizes = [8, 16], strides = [1, 1]} : vector<16x192xf32> to vector<8x16xf32>
    %509 = arith.truncf %508 : vector<8x16xf32> to vector<8x16xbf16>
    %cst_155 = arith.constant dense<0.000000e+00> : vector<8x8xf32>
    %510 = tpu.matmul %505, %507, %cst_155 {dimension_numbers = #tpu.dot_dimension_numbers<[1], [1], [0], [0], [0, 0, 1, 0], [], []>} : vector<8x16xbf16>, vector<8x16xbf16>, vector<8x8xf32> -> vector<8x8xf32>
    %511 = vector.broadcast %452 : vector<1x8xf32> to vector<8x8xf32>
    %512 = arith.addf %510, %511 : vector<8x8xf32>
    %cst_156 = arith.constant dense<0xFF800000> : vector<8xf32>
    %513 = vector.multi_reduction <maximumf>, %512, %cst_156 [1] : vector<8x8xf32> to vector<8xf32>
    %514 = vector.shape_cast %513 : vector<8xf32> to vector<8x1xf32>
    %515 = vector.broadcast %514 : vector<8x1xf32> to vector<8x8xf32>
    %516 = arith.subf %512, %515 : vector<8x8xf32>
    %517 = math.exp %516 : vector<8x8xf32>
    %cst_157 = arith.constant dense<0.000000e+00> : vector<8xf32>
    %518 = vector.multi_reduction <add>, %517, %cst_157 [1] : vector<8x8xf32> to vector<8xf32>
    %519 = vector.shape_cast %518 : vector<8xf32> to vector<8x1xf32>
    %520 = tpu.reciprocal %519 {approx = true} : vector<8x1xf32> -> vector<8x1xf32>
    %521 = vector.broadcast %520 : vector<8x1xf32> to vector<8x8xf32>
    %522 = arith.mulf %517, %521 : vector<8x8xf32>
    %523 = arith.truncf %522 : vector<8x8xf32> to vector<8x8xbf16>
    %cst_158 = arith.constant dense<0.000000e+00> : vector<8x16xf32>
    %524 = tpu.matmul %523, %509, %cst_158 {dimension_numbers = #tpu.dot_dimension_numbers<[1], [0], [0], [1], [0, 0, 1, 1], [], []>} : vector<8x8xbf16>, vector<8x16xbf16>, vector<8x16xf32> -> vector<8x16xf32>
    %525 = arith.truncf %524 : vector<8x16xf32> to vector<8x16xbf16>
    %526 = vector.extract_strided_slice %339 {offsets = [32, 0], sizes = [16, 64], strides = [1, 1]} : vector<64x64xbf16> to vector<16x64xbf16>
    %cst_159 = arith.constant dense<0.000000e+00> : vector<8x64xf32>
    %527 = tpu.matmul %525, %526, %cst_159 {dimension_numbers = #tpu.dot_dimension_numbers<[1], [0], [0], [1], [0, 0, 1, 1], [], []>} : vector<8x16xbf16>, vector<16x64xbf16>, vector<8x64xf32> -> vector<8x64xf32>
    %528 = arith.addf %503, %527 : vector<8x64xf32>
    %529 = vector.extract_strided_slice %349 {offsets = [8, 48], sizes = [8, 16], strides = [1, 1]} : vector<16x192xf32> to vector<8x16xf32>
    %530 = arith.truncf %529 : vector<8x16xf32> to vector<8x16xbf16>
    %531 = vector.extract_strided_slice %349 {offsets = [8, 112], sizes = [8, 16], strides = [1, 1]} : vector<16x192xf32> to vector<8x16xf32>
    %532 = arith.truncf %531 : vector<8x16xf32> to vector<8x16xbf16>
    %533 = vector.extract_strided_slice %349 {offsets = [8, 176], sizes = [8, 16], strides = [1, 1]} : vector<16x192xf32> to vector<8x16xf32>
    %534 = arith.truncf %533 : vector<8x16xf32> to vector<8x16xbf16>
    %cst_160 = arith.constant dense<0.000000e+00> : vector<8x8xf32>
    %535 = tpu.matmul %530, %532, %cst_160 {dimension_numbers = #tpu.dot_dimension_numbers<[1], [1], [0], [0], [0, 0, 1, 0], [], []>} : vector<8x16xbf16>, vector<8x16xbf16>, vector<8x8xf32> -> vector<8x8xf32>
    %536 = vector.broadcast %452 : vector<1x8xf32> to vector<8x8xf32>
    %537 = arith.addf %535, %536 : vector<8x8xf32>
    %cst_161 = arith.constant dense<0xFF800000> : vector<8xf32>
    %538 = vector.multi_reduction <maximumf>, %537, %cst_161 [1] : vector<8x8xf32> to vector<8xf32>
    %539 = vector.shape_cast %538 : vector<8xf32> to vector<8x1xf32>
    %540 = vector.broadcast %539 : vector<8x1xf32> to vector<8x8xf32>
    %541 = arith.subf %537, %540 : vector<8x8xf32>
    %542 = math.exp %541 : vector<8x8xf32>
    %cst_162 = arith.constant dense<0.000000e+00> : vector<8xf32>
    %543 = vector.multi_reduction <add>, %542, %cst_162 [1] : vector<8x8xf32> to vector<8xf32>
    %544 = vector.shape_cast %543 : vector<8xf32> to vector<8x1xf32>
    %545 = tpu.reciprocal %544 {approx = true} : vector<8x1xf32> -> vector<8x1xf32>
    %546 = vector.broadcast %545 : vector<8x1xf32> to vector<8x8xf32>
    %547 = arith.mulf %542, %546 : vector<8x8xf32>
    %548 = arith.truncf %547 : vector<8x8xf32> to vector<8x8xbf16>
    %cst_163 = arith.constant dense<0.000000e+00> : vector<8x16xf32>
    %549 = tpu.matmul %548, %534, %cst_163 {dimension_numbers = #tpu.dot_dimension_numbers<[1], [0], [0], [1], [0, 0, 1, 1], [], []>} : vector<8x8xbf16>, vector<8x16xbf16>, vector<8x16xf32> -> vector<8x16xf32>
    %550 = arith.truncf %549 : vector<8x16xf32> to vector<8x16xbf16>
    %551 = vector.extract_strided_slice %339 {offsets = [48, 0], sizes = [16, 64], strides = [1, 1]} : vector<64x64xbf16> to vector<16x64xbf16>
    %cst_164 = arith.constant dense<0.000000e+00> : vector<8x64xf32>
    %552 = tpu.matmul %550, %551, %cst_164 {dimension_numbers = #tpu.dot_dimension_numbers<[1], [0], [0], [1], [0, 0, 1, 1], [], []>} : vector<8x16xbf16>, vector<16x64xbf16>, vector<8x64xf32> -> vector<8x64xf32>
    %553 = arith.addf %528, %552 : vector<8x64xf32>
    %554 = tpu.concatenate %451, %553 in 0 : vector<8x64xf32>, vector<8x64xf32> -> vector<16x64xf32>
    %c1_165 = arith.constant 1 : index
    %c0_166 = arith.constant 0 : index
    %c0_167 = arith.constant 0 : index
    %555 = vector.load %arg6[%c1_165, %c0_166, %c0_167] : memref<2x1x64xf32, #tpu.memory_space<vmem>>, vector<1x1x64xf32>
    %556 = vector.shape_cast %555 : vector<1x1x64xf32> to vector<1x64xf32>
    %557 = vector.broadcast %556 : vector<1x64xf32> to vector<16x64xf32>
    %558 = arith.addf %554, %557 : vector<16x64xf32>
    %559 = arith.addf %558, %335 : vector<16x64xf32>
    %c1_168 = arith.constant 1 : index
    %c0_169 = arith.constant 0 : index
    %c0_170 = arith.constant 0 : index
    %560 = vector.load %arg7[%c1_168, %c0_169, %c0_170] : memref<2x1x64xf32, #tpu.memory_space<vmem>>, vector<1x1x64xf32>
    %561 = vector.shape_cast %560 : vector<1x1x64xf32> to vector<1x64xf32>
    %c1_171 = arith.constant 1 : index
    %c0_172 = arith.constant 0 : index
    %c0_173 = arith.constant 0 : index
    %562 = vector.load %arg8[%c1_171, %c0_172, %c0_173] : memref<2x1x64xf32, #tpu.memory_space<vmem>>, vector<1x1x64xf32>
    %563 = vector.shape_cast %562 : vector<1x1x64xf32> to vector<1x64xf32>
    %cst_174 = arith.constant dense<0.000000e+00> : vector<16xf32>
    %564 = vector.multi_reduction <add>, %559, %cst_174 [1] : vector<16x64xf32> to vector<16xf32>
    %565 = vector.shape_cast %564 : vector<16xf32> to vector<16x1xf32>
    %cst_175 = arith.constant 6.400000e+01 : f32
    %566 = vector.broadcast %cst_175 : f32 to vector<16x1xf32>
    %567 = arith.divf %565, %566 : vector<16x1xf32>
    %568 = vector.broadcast %567 : vector<16x1xf32> to vector<16x64xf32>
    %569 = arith.subf %559, %568 : vector<16x64xf32>
    %570 = vector.broadcast %567 : vector<16x1xf32> to vector<16x64xf32>
    %571 = arith.subf %559, %570 : vector<16x64xf32>
    %572 = arith.mulf %569, %571 : vector<16x64xf32>
    %cst_176 = arith.constant dense<0.000000e+00> : vector<16xf32>
    %573 = vector.multi_reduction <add>, %572, %cst_176 [1] : vector<16x64xf32> to vector<16xf32>
    %574 = vector.shape_cast %573 : vector<16xf32> to vector<16x1xf32>
    %cst_177 = arith.constant 6.400000e+01 : f32
    %575 = vector.broadcast %cst_177 : f32 to vector<16x1xf32>
    %576 = arith.divf %574, %575 : vector<16x1xf32>
    %577 = vector.broadcast %567 : vector<16x1xf32> to vector<16x64xf32>
    %578 = arith.subf %559, %577 : vector<16x64xf32>
    %cst_178 = arith.constant 9.99999996E-13 : f32
    %579 = vector.broadcast %cst_178 : f32 to vector<16x1xf32>
    %580 = arith.addf %576, %579 : vector<16x1xf32>
    %581 = math.rsqrt %580 : vector<16x1xf32>
    %582 = vector.broadcast %581 : vector<16x1xf32> to vector<16x64xf32>
    %583 = arith.mulf %578, %582 : vector<16x64xf32>
    %584 = vector.broadcast %561 : vector<1x64xf32> to vector<16x64xf32>
    %585 = arith.mulf %583, %584 : vector<16x64xf32>
    %586 = vector.broadcast %563 : vector<1x64xf32> to vector<16x64xf32>
    %587 = arith.addf %585, %586 : vector<16x64xf32>
    %588 = arith.truncf %587 : vector<16x64xf32> to vector<16x64xbf16>
    %cst_179 = arith.constant dense<0.000000e+00> : vector<16x128xf32>
    %589 = tpu.matmul %588, %341, %cst_179 {dimension_numbers = #tpu.dot_dimension_numbers<[1], [0], [0], [1], [0, 0, 1, 1], [], []>} : vector<16x64xbf16>, vector<64x128xbf16>, vector<16x128xf32> -> vector<16x128xf32>
    %c1_180 = arith.constant 1 : index
    %c0_181 = arith.constant 0 : index
    %c0_182 = arith.constant 0 : index
    %590 = vector.load %arg10[%c1_180, %c0_181, %c0_182] : memref<2x1x128xf32, #tpu.memory_space<vmem>>, vector<1x1x128xf32>
    %591 = vector.shape_cast %590 : vector<1x1x128xf32> to vector<1x128xf32>
    %592 = vector.broadcast %591 : vector<1x128xf32> to vector<16x128xf32>
    %593 = arith.addf %589, %592 : vector<16x128xf32>
    %cst_183 = arith.constant 5.000000e-01 : f32
    %594 = vector.broadcast %cst_183 : f32 to vector<16x128xf32>
    %595 = arith.mulf %594, %593 : vector<16x128xf32>
    %cst_184 = arith.constant 4.471500e-02 : f32
    %596 = vector.broadcast %cst_184 : f32 to vector<16x128xf32>
    %597 = arith.mulf %596, %593 : vector<16x128xf32>
    %598 = arith.mulf %597, %593 : vector<16x128xf32>
    %599 = arith.mulf %598, %593 : vector<16x128xf32>
    %600 = arith.addf %593, %599 : vector<16x128xf32>
    %cst_185 = arith.constant 0.797884583 : f32
    %601 = vector.broadcast %cst_185 : f32 to vector<16x128xf32>
    %602 = arith.mulf %601, %600 : vector<16x128xf32>
    %603 = math.tanh %602 : vector<16x128xf32>
    %cst_186 = arith.constant 1.000000e+00 : f32
    %604 = vector.broadcast %cst_186 : f32 to vector<16x128xf32>
    %605 = arith.addf %604, %603 : vector<16x128xf32>
    %606 = arith.mulf %595, %605 : vector<16x128xf32>
    %607 = arith.truncf %606 : vector<16x128xf32> to vector<16x128xbf16>
    %cst_187 = arith.constant dense<0.000000e+00> : vector<16x64xf32>
    %608 = tpu.matmul %607, %343, %cst_187 {dimension_numbers = #tpu.dot_dimension_numbers<[1], [0], [0], [1], [0, 0, 1, 1], [], []>} : vector<16x128xbf16>, vector<128x64xbf16>, vector<16x64xf32> -> vector<16x64xf32>
    %c1_188 = arith.constant 1 : index
    %c0_189 = arith.constant 0 : index
    %c0_190 = arith.constant 0 : index
    %609 = vector.load %arg12[%c1_188, %c0_189, %c0_190] : memref<2x1x64xf32, #tpu.memory_space<vmem>>, vector<1x1x64xf32>
    %610 = vector.shape_cast %609 : vector<1x1x64xf32> to vector<1x64xf32>
    %611 = vector.broadcast %610 : vector<1x64xf32> to vector<16x64xf32>
    %612 = arith.addf %608, %611 : vector<16x64xf32>
    %613 = arith.addf %612, %587 : vector<16x64xf32>
    %c1_191 = arith.constant 1 : index
    %c0_192 = arith.constant 0 : index
    %c0_193 = arith.constant 0 : index
    %614 = vector.load %arg13[%c1_191, %c0_192, %c0_193] : memref<2x1x64xf32, #tpu.memory_space<vmem>>, vector<1x1x64xf32>
    %615 = vector.shape_cast %614 : vector<1x1x64xf32> to vector<1x64xf32>
    %c1_194 = arith.constant 1 : index
    %c0_195 = arith.constant 0 : index
    %c0_196 = arith.constant 0 : index
    %616 = vector.load %arg14[%c1_194, %c0_195, %c0_196] : memref<2x1x64xf32, #tpu.memory_space<vmem>>, vector<1x1x64xf32>
    %617 = vector.shape_cast %616 : vector<1x1x64xf32> to vector<1x64xf32>
    %cst_197 = arith.constant dense<0.000000e+00> : vector<16xf32>
    %618 = vector.multi_reduction <add>, %613, %cst_197 [1] : vector<16x64xf32> to vector<16xf32>
    %619 = vector.shape_cast %618 : vector<16xf32> to vector<16x1xf32>
    %cst_198 = arith.constant 6.400000e+01 : f32
    %620 = vector.broadcast %cst_198 : f32 to vector<16x1xf32>
    %621 = arith.divf %619, %620 : vector<16x1xf32>
    %622 = vector.broadcast %621 : vector<16x1xf32> to vector<16x64xf32>
    %623 = arith.subf %613, %622 : vector<16x64xf32>
    %624 = vector.broadcast %621 : vector<16x1xf32> to vector<16x64xf32>
    %625 = arith.subf %613, %624 : vector<16x64xf32>
    %626 = arith.mulf %623, %625 : vector<16x64xf32>
    %cst_199 = arith.constant dense<0.000000e+00> : vector<16xf32>
    %627 = vector.multi_reduction <add>, %626, %cst_199 [1] : vector<16x64xf32> to vector<16xf32>
    %628 = vector.shape_cast %627 : vector<16xf32> to vector<16x1xf32>
    %cst_200 = arith.constant 6.400000e+01 : f32
    %629 = vector.broadcast %cst_200 : f32 to vector<16x1xf32>
    %630 = arith.divf %628, %629 : vector<16x1xf32>
    %631 = vector.broadcast %621 : vector<16x1xf32> to vector<16x64xf32>
    %632 = arith.subf %613, %631 : vector<16x64xf32>
    %cst_201 = arith.constant 9.99999996E-13 : f32
    %633 = vector.broadcast %cst_201 : f32 to vector<16x1xf32>
    %634 = arith.addf %630, %633 : vector<16x1xf32>
    %635 = math.rsqrt %634 : vector<16x1xf32>
    %636 = vector.broadcast %635 : vector<16x1xf32> to vector<16x64xf32>
    %637 = arith.mulf %632, %636 : vector<16x64xf32>
    %638 = vector.broadcast %615 : vector<1x64xf32> to vector<16x64xf32>
    %639 = arith.mulf %637, %638 : vector<16x64xf32>
    %640 = vector.broadcast %617 : vector<1x64xf32> to vector<16x64xf32>
    %641 = arith.addf %639, %640 : vector<16x64xf32>
    %642 = vector.extract_strided_slice %641 {offsets = [0, 0], sizes = [1, 64], strides = [1, 1]} : vector<16x64xf32> to vector<1x64xf32>
    %643 = vector.extract_strided_slice %641 {offsets = [8, 0], sizes = [1, 64], strides = [1, 1]} : vector<16x64xf32> to vector<1x64xf32>
    %cst_202 = arith.constant 0.000000e+00 : f32
    %644 = vector.broadcast %cst_202 : f32 to vector<6x64xf32>
    %645 = tpu.concatenate %642, %643, %644 in 0 : vector<1x64xf32>, vector<1x64xf32>, vector<6x64xf32> -> vector<8x64xf32>
    %646 = arith.truncf %645 : vector<8x64xf32> to vector<8x64xbf16>
    %c0_203 = arith.constant 0 : index
    %c0_204 = arith.constant 0 : index
    %647 = vector.load %arg17[%c0_203, %c0_204] : memref<64x64xbf16, #tpu.memory_space<vmem>>, vector<64x64xbf16>
    %cst_205 = arith.constant dense<0.000000e+00> : vector<8x64xf32>
    %648 = tpu.matmul %646, %647, %cst_205 {dimension_numbers = #tpu.dot_dimension_numbers<[1], [0], [0], [1], [0, 0, 1, 1], [], []>} : vector<8x64xbf16>, vector<64x64xbf16>, vector<8x64xf32> -> vector<8x64xf32>
    %c0_206 = arith.constant 0 : index
    %c0_207 = arith.constant 0 : index
    %649 = vector.load %arg18[%c0_206, %c0_207] : memref<1x64xf32, #tpu.memory_space<vmem>>, vector<1x64xf32>
    %650 = vector.broadcast %649 : vector<1x64xf32> to vector<8x64xf32>
    %651 = arith.addf %648, %650 : vector<8x64xf32>
    %652 = math.tanh %651 : vector<8x64xf32>
    %c0_208 = arith.constant 0 : index
    %c0_209 = arith.constant 0 : index
    %653 = vector.load %arg19[%c0_208, %c0_209] : memref<1x64xf32, #tpu.memory_space<vmem>>, vector<1x64xf32>
    %654 = vector.broadcast %653 : vector<1x64xf32> to vector<8x64xf32>
    %655 = arith.mulf %652, %654 : vector<8x64xf32>
    %cst_210 = arith.constant dense<0.000000e+00> : vector<8xf32>
    %656 = vector.multi_reduction <add>, %655, %cst_210 [1] : vector<8x64xf32> to vector<8xf32>
    %657 = vector.shape_cast %656 : vector<8xf32> to vector<8x1xf32>
    %c0_211 = arith.constant 0 : index
    %c0_212 = arith.constant 0 : index
    %658 = vector.load %arg20[%c0_211, %c0_212] : memref<1x1xf32, #tpu.memory_space<vmem>>, vector<1x1xf32>
    %659 = vector.broadcast %658 : vector<1x1xf32> to vector<8x1xf32>
    %660 = arith.addf %657, %659 : vector<8x1xf32>
    %661 = vector.shape_cast %660 : vector<8x1xf32> to vector<8x1xf32>
    %662 = vector.broadcast %661 : vector<8x1xf32> to vector<8x128xf32>
    %c0_213 = arith.constant 0 : index
    %c0_214 = arith.constant 0 : index
    %c0_215 = arith.constant 0 : index
    %663 = vector.load %arg21[%c0_213, %c0_214, %c0_215] : memref<1x8x128xf32, #tpu.memory_space<vmem>>, vector<1x8x128xf32>
    %664 = vector.shape_cast %663 : vector<1x8x128xf32> to vector<8x128xf32>
    %665 = vector.shape_cast %662 : vector<8x128xf32> to vector<1x8x128xf32>
    tpu.vector_store %arg21[%c0_213, %c0_214, %c0_215], %665 {strides = array<i32>} : memref<1x8x128xf32, #tpu.memory_space<vmem>>, vector<1x8x128xf32>,
    return
  }
  func.func @transform_0(%arg0: i32) -> (i32, i32, i32) {
    %c0_i32 = arith.constant 0 : i32
    %c0_i32_0 = arith.constant 0 : i32
    %c0_i32_1 = arith.constant 0 : i32
    return %arg0, %c0_i32, %c0_i32_0 : i32, i32, i32
  }
  func.func @transform_1(%arg0: i32) -> (i32, i32, i32) {
    %c0_i32 = arith.constant 0 : i32
    %c0_i32_0 = arith.constant 0 : i32
    %c0_i32_1 = arith.constant 0 : i32
    return %arg0, %c0_i32, %c0_i32_0 : i32, i32, i32
  }
  func.func @transform_2(%arg0: i32) -> (i32, i32, i32) {
    %c0_i32 = arith.constant 0 : i32
    %c0_i32_0 = arith.constant 0 : i32
    %c0_i32_1 = arith.constant 0 : i32
    %c0_i32_2 = arith.constant 0 : i32
    return %c0_i32, %c0_i32_0, %c0_i32_1 : i32, i32, i32
  }
  func.func @transform_3(%arg0: i32) -> (i32, i32, i32) {
    %c0_i32 = arith.constant 0 : i32
    %c0_i32_0 = arith.constant 0 : i32
    %c0_i32_1 = arith.constant 0 : i32
    %c0_i32_2 = arith.constant 0 : i32
    return %c0_i32, %c0_i32_0, %c0_i32_1 : i32, i32, i32
  }
  func.func @transform_4(%arg0: i32) -> (i32, i32, i32) {
    %c0_i32 = arith.constant 0 : i32
    %c0_i32_0 = arith.constant 0 : i32
    %c0_i32_1 = arith.constant 0 : i32
    %c0_i32_2 = arith.constant 0 : i32
    return %c0_i32, %c0_i32_0, %c0_i32_1 : i32, i32, i32
  }
  func.func @transform_5(%arg0: i32) -> (i32, i32, i32) {
    %c0_i32 = arith.constant 0 : i32
    %c0_i32_0 = arith.constant 0 : i32
    %c0_i32_1 = arith.constant 0 : i32
    %c0_i32_2 = arith.constant 0 : i32
    return %c0_i32, %c0_i32_0, %c0_i32_1 : i32, i32, i32
  }
  func.func @transform_6(%arg0: i32) -> (i32, i32, i32) {
    %c0_i32 = arith.constant 0 : i32
    %c0_i32_0 = arith.constant 0 : i32
    %c0_i32_1 = arith.constant 0 : i32
    %c0_i32_2 = arith.constant 0 : i32
    return %c0_i32, %c0_i32_0, %c0_i32_1 : i32, i32, i32
  }
  func.func @transform_7(%arg0: i32) -> (i32, i32, i32) {
    %c0_i32 = arith.constant 0 : i32
    %c0_i32_0 = arith.constant 0 : i32
    %c0_i32_1 = arith.constant 0 : i32
    %c0_i32_2 = arith.constant 0 : i32
    return %c0_i32, %c0_i32_0, %c0_i32_1 : i32, i32, i32
  }
  func.func @transform_8(%arg0: i32) -> (i32, i32, i32) {
    %c0_i32 = arith.constant 0 : i32
    %c0_i32_0 = arith.constant 0 : i32
    %c0_i32_1 = arith.constant 0 : i32
    %c0_i32_2 = arith.constant 0 : i32
    return %c0_i32, %c0_i32_0, %c0_i32_1 : i32, i32, i32
  }
  func.func @transform_9(%arg0: i32) -> (i32, i32, i32) {
    %c0_i32 = arith.constant 0 : i32
    %c0_i32_0 = arith.constant 0 : i32
    %c0_i32_1 = arith.constant 0 : i32
    %c0_i32_2 = arith.constant 0 : i32
    return %c0_i32, %c0_i32_0, %c0_i32_1 : i32, i32, i32
  }
  func.func @transform_10(%arg0: i32) -> (i32, i32, i32) {
    %c0_i32 = arith.constant 0 : i32
    %c0_i32_0 = arith.constant 0 : i32
    %c0_i32_1 = arith.constant 0 : i32
    %c0_i32_2 = arith.constant 0 : i32
    return %c0_i32, %c0_i32_0, %c0_i32_1 : i32, i32, i32
  }
  func.func @transform_11(%arg0: i32) -> (i32, i32, i32) {
    %c0_i32 = arith.constant 0 : i32
    %c0_i32_0 = arith.constant 0 : i32
    %c0_i32_1 = arith.constant 0 : i32
    %c0_i32_2 = arith.constant 0 : i32
    return %c0_i32, %c0_i32_0, %c0_i32_1 : i32, i32, i32
  }
  func.func @transform_12(%arg0: i32) -> (i32, i32, i32) {
    %c0_i32 = arith.constant 0 : i32
    %c0_i32_0 = arith.constant 0 : i32
    %c0_i32_1 = arith.constant 0 : i32
    %c0_i32_2 = arith.constant 0 : i32
    return %c0_i32, %c0_i32_0, %c0_i32_1 : i32, i32, i32
  }
  func.func @transform_13(%arg0: i32) -> (i32, i32, i32) {
    %c0_i32 = arith.constant 0 : i32
    %c0_i32_0 = arith.constant 0 : i32
    %c0_i32_1 = arith.constant 0 : i32
    %c0_i32_2 = arith.constant 0 : i32
    return %c0_i32, %c0_i32_0, %c0_i32_1 : i32, i32, i32
  }
  func.func @transform_14(%arg0: i32) -> (i32, i32) {
    %c0_i32 = arith.constant 0 : i32
    %c0_i32_0 = arith.constant 0 : i32
    %c0_i32_1 = arith.constant 0 : i32
    return %c0_i32, %c0_i32_0 : i32, i32
  }
  func.func @transform_15(%arg0: i32) -> (i32, i32) {
    %c0_i32 = arith.constant 0 : i32
    %c0_i32_0 = arith.constant 0 : i32
    %c0_i32_1 = arith.constant 0 : i32
    return %c0_i32, %c0_i32_0 : i32, i32
  }
  func.func @transform_16(%arg0: i32) -> (i32, i32) {
    %c0_i32 = arith.constant 0 : i32
    %c0_i32_0 = arith.constant 0 : i32
    %c0_i32_1 = arith.constant 0 : i32
    return %c0_i32, %c0_i32_0 : i32, i32
  }
  func.func @transform_17(%arg0: i32) -> (i32, i32) {
    %c0_i32 = arith.constant 0 : i32
    %c0_i32_0 = arith.constant 0 : i32
    %c0_i32_1 = arith.constant 0 : i32
    return %c0_i32, %c0_i32_0 : i32, i32
  }
  func.func @transform_18(%arg0: i32) -> (i32, i32) {
    %c0_i32 = arith.constant 0 : i32
    %c0_i32_0 = arith.constant 0 : i32
    %c0_i32_1 = arith.constant 0 : i32
    return %c0_i32, %c0_i32_0 : i32, i32
  }
  func.func @transform_19(%arg0: i32) -> (i32, i32) {
    %c0_i32 = arith.constant 0 : i32
    %c0_i32_0 = arith.constant 0 : i32
    %c0_i32_1 = arith.constant 0 : i32
    return %c0_i32, %c0_i32_0 : i32, i32
  }
  func.func @transform_20(%arg0: i32) -> (i32, i32, i32) {
    %c0_i32 = arith.constant 0 : i32
    %c0_i32_0 = arith.constant 0 : i32
    %c0_i32_1 = arith.constant 0 : i32
    return %arg0, %c0_i32, %c0_i32_0 : i32, i32, i32
  }
}

</mosaic_0001>

<bundles_post_ra>
// kernel: pair_classifier_forward.1
= control target key start
LH: loop header
LB: loop body
LE: loop exit
PB: predicated region body
PF: predicated region fallthrough
CT: control target
= control target key end

     0   :  { %vm72_vm0 = vcmask 523264   ;;  %v4473_v15 = vmov 0   ;;  %v160_v40 = vlaneseq  ;;  %v4474_v42 = vmov 0.0   ;;  %s4477_s24 = smov 64   ;;  %s4480_s27 = smov 32   ;;  %s5381_s0 = inlined_call_operand.vmem [shape: f32[1,16,64], index: 0, kind: input, shape index: {}]   ;;  %s5382_s2 = inlined_call_operand.vmem [shape: bf16[2,64,192], index: 2, kind: input, shape index: {}]   ;;  %s5383_s14 = inlined_call_operand.vmem [shape: f32[1,64], index: 14, kind: input, shape index: {}]   ;;  %s5384_s15 = inlined_call_operand.vmem [shape: f32[1,64], index: 15, kind: input, shape index: {}]   ;;  %s5385_s3 = inlined_call_operand.vmem [shape: f32[2,1,192], index: 3, kind: input, shape index: {}]   ;;  %s5386_s1 = inlined_call_operand.vmem [shape: f32[1,2,8], index: 1, kind: input, shape index: {}]   ;;  %s5387_s4 = inlined_call_operand.vmem [shape: bf16[2,64,64], index: 4, kind: input, shape index: {}]   ;;  %s5388_s5 = inlined_call_operand.vmem [shape: f32[2,1,64], index: 5, kind: input, shape index: {}]   ;;  %s5389_s8 = inlined_call_operand.vmem [shape: bf16[2,64,128], index: 8, kind: input, shape index: {}]   ;;  %s5390_s6 = inlined_call_operand.vmem [shape: f32[2,1,64], index: 6, kind: input, shape index: {}]   ;;  %s5391_s7 = inlined_call_operand.vmem [shape: f32[2,1,64], index: 7, kind: input, shape index: {}]   ;;  %s5392_s10 = inlined_call_operand.vmem [shape: bf16[2,128,64], index: 10, kind: input, shape index: {}]   ;;  %s5393_s9 = inlined_call_operand.vmem [shape: f32[2,1,128], index: 9, kind: input, shape index: {}]   ;;  %s5394_s11 = inlined_call_operand.vmem [shape: f32[2,1,64], index: 11, kind: input, shape index: {}]   ;;  %s5395_s12 = inlined_call_operand.vmem [shape: f32[2,1,64], index: 12, kind: input, shape index: {}]   ;;  %s5396_s13 = inlined_call_operand.vmem [shape: f32[2,1,64], index: 13, kind: input, shape index: {}]   ;;  %s5397_s16 = inlined_call_operand.vmem [shape: bf16[64,64], index: 16, kind: input, shape index: {}]   ;;  %s5398_s19 = inlined_call_operand.<no memory space> [shape: f32[1,1], index: 19, kind: input, shape index: {}]   ;;  %s5399_s17 = inlined_call_operand.vmem [shape: f32[1,64], index: 17, kind: input, shape index: {}]   ;;  %s5400_s18 = inlined_call_operand.vmem [shape: f32[1,64], index: 18, kind: input, shape index: {}]   ;;  %s5401_s20 = inlined_call_operand.vmem [shape: f32[1,8,128], index: 20, kind: output, shape index: {}]  }
   0x1   :  { %5411 = sst [smem:[#allocation3_spill]] %s5381_s0  ;;  %245 = vmatprep.mubr.bf16.mxu0 %v4473_v15  ;;  %4317 = vset.pattern.permute.xlu1 %v4473_v15  ;;  %vm4475_vm1 = vmmov 0   ;;  %vm265_vm2 = vcmask 130048   ;;  %vm328_vm3 = vcmask 1043456   ;;  %vm312_vm4 = vcmask 64512   ;;  %s5407_s21 = smov 80  }
   0x2   :  { %5412 = sst [smem:[#allocation4_spill]] %s5382_s2  ;;  %s5416_s23 = sld [smem:[#allocation3_spill]]  ;;  %4318 = vset.pattern.permute.xlu0 %v4473_v15  ;;  %v161_v41 = vshrl.u32 %v160_v40, 7  ;;  %3943 = vmatprep.subr.bf16.mxu1 %v4474_v42  ;;  %vm3525_vm5 = vcmask 1040384   ;;  %vm3527_vm6 = vcmask 1041408  }
   0x3   :  { %5413 = sst [smem:[#allocation5_spill]] %s5383_s14  ;;  %s5417_s26 = sld [smem:[#allocation4_spill]]  ;;  %3945 = vmatprep.mubr.msk.bf16.mxu1 %vm4475_vm1, %v4474_v42 }
   0x4   :  { %5414 = sst [smem:[#allocation6_spill]] %s5384_s15  ;;  %v4640_v43 = vsub.s32 0, %v161_v41  ;;  %v4650_v46 = vsub.s32 1, %v161_v41  ;;  %s4478_s14 = smov 112  }
   0x5   :  { %5415 = sst [smem:[#allocation7_spill]] %s5385_s3  ;;  %s5418_s3 = sld [smem:[#allocation5_spill]] }
   0x6   :  { %s5419_s0 = sld [smem:[#allocation6_spill]]  ;;  %s5420_s22 = sld [smem:[#allocation7_spill]] }
   0x7   :  { %s5422_s28 = smov 80  }
   0x8   :  { %v68_v0 = vld [vmem:[%s5416_s23] sm:$0xff]  ;;  %v69_v1 = vld [vmem:[%s5416_s23 + $0x8] sm:$0xff]  ;;  %s4476_s23 = smov 48  }
   0x9   :  { %v73_v2 = vsel %vm72_vm0, %v68_v0, 0.0  ;;  %v76_v3 = vsel %vm72_vm0, %v69_v1, 0.0  ;;  %v4319_v14 = vld [vmem:[%s5417_s26 + $0x4] ss:$8 sps:$4 sm:$0xff]   ;;  %v4321_v16 = vld [vmem:[%s5417_s26] ss:$8 sps:$4 sm:$0xff]  }
   0xa   :  { %74 = vadd.xlane.f32.xlu0 %v73_v2  ;;  %213 = vmatprep.subr.bf16.mxu0 %v4319_v14  ;;  %v4322_v17 = vld [vmem:[%s5417_s26 + $0x14] ss:$8 sps:$4 sm:$0xff]   ;;  %v4324_v18 = vld [vmem:[%s5417_s26 + $0x10] ss:$8 sps:$4 sm:$0xff]   ;;  %v4325_v19 = vld [vmem:[%s5417_s26 + $0x24] ss:$8 sps:$4 sm:$0xff]  }
   0xb   :  { %214 = vmatpush1.bf16.msra.mxu0 %v4321_v16  ;;  %v4327_v20 = vld [vmem:[%s5417_s26 + $0x20] ss:$8 sps:$4 sm:$0xff]   ;;  %v4328_v21 = vld [vmem:[%s5417_s26 + $0x34] ss:$8 sps:$4 sm:$0xff]   ;;  %v4330_v22 = vld [vmem:[%s5417_s26 + $0x30] ss:$8 sps:$4 sm:$0xff]  }
   0xc   :  { %215 = vmatprep.subr.bf16.mxu0 %v4322_v17  ;;  %v3642_v31 = vld [vmem:[%s5418_s3] ss:$0 sm:$0xff] }
   0xd   :  { %v3643_v35 = vld [vmem:[%s5419_s0] ss:$0 sm:$0xff]  ;;  %s5405_s0 = smov 16  }
   0xe   :  { %77 = vadd.xlane.f32.xlu0 %v76_v3  ;;  %v158_v44 = vld [vmem:[%s5420_s22] sm:$0x3] }
   0xf   :  { %216 = vmatpush1.bf16.msra.mxu0 %v4324_v18  ;;  %v163_v45 = vrot.slane %v158_v44, %v4640_v43  ;;  %v167_v50 = vrot.slane %v158_v44, %v4650_v46 }
  0x10   :  { %217 = vmatprep.subr.bf16.mxu0 %v4325_v19 }
  0x13   :  { %218 = vmatpush1.bf16.msra.mxu0 %v4327_v20 }
  0x14   :  { %219 = vmatprep.subr.bf16.mxu0 %v4328_v21 }
  0x17   :  { %220 = vmatpush1.bf16.msra.mxu0 %v4330_v22 }
  0x18   :  { %3955 = vmatprep.subr.bf16.mxu0 %v4474_v42 }
  0x97   :  { %v75_v4 = vpop.xlane.xlu0 %74 }
  0x98   :  { %v80_v5 = vmul.f32 0.015625, %v75_v4 }
  0x9a   :  { %v82_v6 = vsub.f32 %v68_v0, %v80_v5  ;;  %v4684_v0 = vld [vmem:[%s5386_s1] sm:$0x3]  ;;  %s5409_s1 = smov 96  }
  0x9b   :  { %v78_v7 = vpop.xlane.xlu0 %77 }
  0x9c   :  { %v81_v8 = vmul.f32 0.015625, %v78_v7  ;;  %v84_v9 = vmul.f32 %v82_v6, %v82_v6 }
  0x9e   :  { %v83_v10 = vsub.f32 %v69_v1, %v81_v8  ;;  %v86_v11 = vsel %vm72_vm0, %v84_v9, 0.0  ;;  %v4688_v1 = vrot.slane %v4684_v0, %v4640_v43 }
  0x9f   :  { %87 = vadd.xlane.f32.xlu1 %v86_v11 }
  0xa0   :  { %v85_v12 = vmul.f32 %v83_v10, %v83_v10 }
  0xa2   :  { %v89_v13 = vsel %vm72_vm0, %v85_v12, 0.0 }
  0xa3   :  { %90 = vadd.xlane.f32.xlu1 %v89_v13 }
 0x12c   :  { %v88_v23 = vpop.xlane.xlu1 %87 }
 0x12d   :  { %v92_v24 = vmul.f32 0.015625, %v88_v23 }
 0x12f   :  { %v94_v25 = vadd.f32 1e-12, %v92_v24 }
 0x130   :  { %v91_v26 = vpop.xlane.xlu1 %90 }
 0x131   :  { %4379 = vrsqrt.f32 %v94_v25  ;;  %v93_v27 = vmul.f32 0.015625, %v91_v26 }
 0x133   :  { %v95_v28 = vadd.f32 1e-12, %v93_v27 }
 0x135   :  { %4381 = vrsqrt.f32 %v95_v28 }
 0x13b   :  { %v4380_v29 = vpop.eup %4379 }
 0x13c   :  { %v98_v30 = vmul.f32 %v4380_v29, %v82_v6 }
 0x13e   :  { %v106_v34 = vmul.f32 %v3642_v31, %v98_v30 }
 0x13f   :  { %v4382_v32 = vpop.eup %4381 }
 0x140   :  { %v99_v33 = vmul.f32 %v4382_v32, %v83_v10  ;;  %v4631_v37 = vadd.f32 %v3643_v35, %v106_v34 }
 0x142   :  { %v107_v36 = vmul.f32 %v3642_v31, %v99_v33 }
 0x144   :  { %v4633_v38 = vadd.f32 %v3643_v35, %v107_v36  ;;  %v4713_v35 = vld [vmem:[%s5387_s4] sm:$0xff]   ;;  %v4719_v36 = vld [vmem:[%s5387_s4 + $0x8] sm:$0xff]  }
 0x146   :  { %v157_v39 = vpack.c.bf16 %v4633_v38, %v4631_v37 }
 0x148   :  { %3652 = vmatmul.mubr.msk.bf16.vlgmr.msra.gmra.mrb[0].mxu0 %vm72_vm0, %v157_v39 }
 0x149   :  { %3957 = vmatprep.mubr.msk.bf16.mxu0 %vm4475_vm1, %v4474_v42 }
 0x21b   :  { %v247_v47 = vpop.f32.mrb[0].mxu0 }
 0x21c   :  { %v248_v48 = vadd.f32 %v247_v47, %v163_v45  ;;  %v249_v49 = vpop.f32.mrb[1].mxu0 }
 0x21d   :  { %v251_v51 = vpop.f32.mrb[2].mxu0  ;;  %v250_v58 = vadd.f32 %v249_v49, %v167_v50 }
 0x21e   :  { %v4653_v52 = vpack.c.bf16 %v248_v48, %v248_v48  ;;  %v4655_v53 = vadd.f32 %v251_v51, %v163_v45  ;;  %v253_v54 = vpop.f32.mrb[3].mxu0 }
 0x21f   :  { %v4657_v55 = vadd.f32 %v253_v54, %v167_v50  ;;  %v4669_v61 = vpack.c.bf16 %v250_v58, %v250_v58 }
 0x220   :  { %375 = vrot.lane.b32.xlu1 %v4653_v52, %s4476_s23  ;;  %263 = vrot.lane.b32.xlu0 %v4653_v52, %s4477_s24 }
 0x221   :  { %v330_v63 = vsel %vm328_vm3, %v4669_v61, 0 }
 0x224   :  { %373 = vrot.lane.b32.xlu1 %v4653_v52, %s4478_s14 }
 0x292   :  { %v376_v56 = vpop.permute.xlu1 %375  ;;  %v264_v57 = vpop.permute.xlu0 %263 }
 0x293   :  { %v381_v59 = vsel %vm265_vm2, %v376_v56, 0  ;;  %v270_v60 = vsel %vm265_vm2, %v264_v57, 0 }
 0x294   :  { %3944 = vmatpush3.bf16.xpose.msra.mxu1 %v270_v60  ;;  %3956 = vmatpush3.bf16.xpose.msra.mxu0 %v381_v59 }
 0x295   :  { %3949 = vmatprep.subr.bf16.mxu1 %v4474_v42  ;;  %3967 = vmatprep.subr.bf16.mxu0 %v4474_v42 }
 0x296   :  { %v374_v62 = vpop.permute.xlu1 %373 }
 0x29b   :  { %3946 = vmatmul.mubr.msk.bf16.vlgmr.msra.gmra.mrb[0].mxu1 %vm265_vm2, %v4653_v52  ;;  %3958 = vmatmul.mubr.msk.bf16.vlgmr.msra.gmra.mrb[4].mxu0 %vm265_vm2, %v374_v62 }
 0x29c   :  { %3950 = vmatpush3.bf16.msra.mxu1 %v330_v63  ;;  %3951 = vmatprep.mubr.msk.bf16.mxu1 %vm4475_vm1, %v4474_v42 }
 0x29d   :  { %3961 = vmatprep.subr.bf16.mxu1 %v4474_v42  ;;  %3969 = vmatprep.mubr.msk.bf16.mxu0 %vm4475_vm1, %v4474_v42 }
 0x29e   :  { %3968 = vmatpush3.bf16.msra.mxu0 %v4719_v36 }
 0x29f   :  { %3979 = vmatprep.subr.bf16.mxu0 %v4474_v42 }
 0x36e   :  { %v306_v2 = vpop.f32.mrb[0].mxu1  ;;  %v417_v3 = vpop.f32.mrb[4].mxu0 }
 0x36f   :  { %v307_v4 = vadd.f32 %v306_v2, %v4688_v1  ;;  %v418_v5 = vadd.f32 %v417_v3, %v4688_v1  ;;  %v3947_v6 = vpop.f32.mrb[1].mxu1  ;;  %v3959_v7 = vpop.f32.mrb[5].mxu0 }
 0x370   :  { %v309_v8 = vpop.f32.mrb[2].mxu1  ;;  %v420_v9 = vpop.f32.mrb[6].mxu0 }
 0x371   :  { %v3948_v10 = vpop.f32.mrb[3].mxu1  ;;  %v3960_v11 = vpop.f32.mrb[7].mxu0  ;;  %v423_v12 = vsel %vm312_vm4, %v418_v5, -inf  ;;  %v313_v13 = vsel %vm312_vm4, %v307_v4, -inf }
 0x372   :  { %424 = vmax.xlane.f32.xlu0 %v423_v12  ;;  %314 = vmax.xlane.f32.xlu1 %v313_v13 }
 0x383   :  { %436 = vrot.lane.b32.xlu1 %v4669_v61, %s4478_s14 }
 0x387   :  { %583 = vrot.lane.b32.xlu1 %v4653_v52, %s5409_s1 }
 0x3ff   :  { %v315_v14 = vpop.xlane.xlu1 %314  ;;  %v425_v16 = vpop.xlane.xlu0 %424 }
 0x400   :  { %v316_v17 = vsub.f32 %v307_v4, %v315_v14  ;;  %v426_v18 = vsub.f32 %v418_v5, %v425_v16 }
 0x402   :  { %v317_v19 = vmul.f32 1.442695, %v316_v17  ;;  %v427_v20 = vmul.f32 1.442695, %v426_v18 }
 0x403   :  { %v437_v29 = vpop.permute.xlu1 %436 }
 0x404   :  { %4383 = vpow2.f32 %v317_v19  ;;  %v442_v32 = vsel %vm328_vm3, %v437_v29, 0 }
 0x405   :  { %4385 = vpow2.f32 %v427_v20 }
 0x407   :  { %v584_v57 = vpop.permute.xlu1 %583 }
 0x40e   :  { %v4384_v21 = vpop.eup %4383 }
 0x40f   :  { %v319_v22 = vsel %vm312_vm4, %v4384_v21, 0.0  ;;  %v4386_v23 = vpop.eup %4385 }
 0x410   :  { %320 = vadd.xlane.f32.xlu0 %v319_v22  ;;  %v429_v24 = vsel %vm312_vm4, %v4386_v23, 0.0 }
 0x414   :  { %430 = vadd.xlane.f32.xlu0 %v429_v24 }
 0x42a   :  { %585 = vrot.lane.b32.xlu0 %v4653_v52, %s4480_s27 }
 0x49d   :  { %v321_v25 = vpop.xlane.xlu0 %320 }
 0x49e   :  { %4387 = vrcp.f32 %v321_v25 }
 0x4a1   :  { %v431_v26 = vpop.xlane.xlu0 %430 }
 0x4a2   :  { %4389 = vrcp.f32 %v431_v26  ;;  %v4759_v26 = vld [vmem:[%s5387_s4 + $0x10] sm:$0xff]  }
 0x4a5   :  { %v586_v47 = vpop.permute.xlu0 %585 }
 0x4a6   :  { %v591_v54 = vsel %vm265_vm2, %v586_v47, 0 }
 0x4a8   :  { %v4388_v27 = vpop.eup %4387 }
 0x4a9   :  { %v323_v28 = vmul.f32 %v4388_v27, %v4384_v21 }
 0x4ab   :  { %v324_v30 = vpack.c.bf16 %v323_v28, %v323_v28 }
 0x4ac   :  { %v4390_v31 = vpop.eup %4389 }
 0x4ad   :  { %3952 = vmatmul.mubr.msk.bf16.vlgmr.msra.gmra.mrb[4].mxu1 %vm312_vm4, %v324_v30  ;;  %v433_v33 = vmul.f32 %v4390_v31, %v4386_v23 }
 0x4ae   :  { %3962 = vmatpush3.bf16.msra.mxu1 %v442_v32  ;;  %3963 = vmatprep.mubr.msk.bf16.mxu1 %vm4475_vm1, %v4474_v42 }
 0x4af   :  { %3973 = vmatprep.subr.bf16.mxu1 %v4474_v42  ;;  %v434_v34 = vpack.c.bf16 %v433_v33, %v433_v33 }
 0x4b5   :  { %3964 = vmatmul.mubr.msk.bf16.vlgmr.msra.gmra.mrb[8].mxu1 %vm312_vm4, %v434_v34 }
 0x4b6   :  { %3975 = vmatprep.mubr.msk.bf16.mxu1 %vm4475_vm1, %v4474_v42  ;;  %3974 = vmatpush3.bf16.msra.mxu1 %v4713_v35 }
 0x4b7   :  { %3985 = vmatprep.subr.bf16.mxu1 %v4474_v42 }
 0x580   :  { %v366_v39 = vpop.f32.mrb[4].mxu1 }
 0x581   :  { %v372_v40 = vpack.c.bf16 %v366_v39, %v366_v39  ;;  %v3953_v41 = vpop.f32.mrb[5].mxu1 }
 0x582   :  { %v369_v44 = vpop.f32.mrb[6].mxu1 }
 0x583   :  { %v3954_v45 = vpop.f32.mrb[7].mxu1  ;;  %3976 = vmatmul.mubr.msk.bf16.vlgmr.msra.gmra.mrb[12].mxu1 %vm265_vm2, %v372_v40  ;;  %v4770_v44 = vpack.c.bf16 %v4655_v53, %v4655_v53 }
 0x584   :  { %3987 = vmatprep.mubr.msk.bf16.mxu1 %vm4475_vm1, %v4474_v42 }
 0x588   :  { %v478_v48 = vpop.f32.mrb[8].mxu1 }
 0x589   :  { %v484_v49 = vpack.c.bf16 %v478_v48, %v478_v48  ;;  %v3965_v50 = vpop.f32.mrb[9].mxu1 }
 0x58a   :  { %v481_v51 = vpop.f32.mrb[10].mxu1 }
 0x58b   :  { %v3966_v56 = vpop.f32.mrb[11].mxu1  ;;  %3970 = vmatmul.mubr.msk.bf16.vlgmr.msra.gmra.mrb[8].mxu0 %vm265_vm2, %v484_v49 }
 0x58c   :  { %3980 = vmatpush3.bf16.xpose.msra.mxu0 %v591_v54  ;;  %3981 = vmatprep.mubr.msk.bf16.mxu0 %vm4475_vm1, %v4474_v42  ;;  %v4787_v56 = vld [vmem:[%s5387_s4 + $0x18] sm:$0xff]  }
 0x58d   :  { %3991 = vmatprep.subr.bf16.mxu0 %v4474_v42 }
 0x593   :  { %3982 = vmatmul.mubr.msk.bf16.vlgmr.msra.gmra.mrb[12].mxu0 %vm265_vm2, %v584_v57 }
 0x594   :  { %3993 = vmatprep.mubr.msk.bf16.mxu0 %vm4475_vm1, %v4474_v42  ;;  %3992 = vmatpush3.bf16.msra.mxu0 %v4759_v26 }
 0x595   :  { %4003 = vmatprep.subr.bf16.mxu0 %v4474_v42 }
 0x656   :  { %v577_v58 = vpop.f32.mrb[12].mxu1 }
 0x657   :  { %v3977_v59 = vpop.f32.mrb[13].mxu1 }
 0x658   :  { %v580_v60 = vpop.f32.mrb[14].mxu1 }
 0x659   :  { %v3978_v62 = vpop.f32.mrb[15].mxu1 }
 0x65e   :  { %v528_v63 = vpop.f32.mrb[8].mxu0 }
 0x65f   :  { %v4735_v2 = vadd.f32 %v577_v58, %v528_v63  ;;  %v3971_v3 = vpop.f32.mrb[9].mxu0 }
 0x660   :  { %v531_v4 = vpop.f32.mrb[10].mxu0 }
 0x661   :  { %v3972_v5 = vpop.f32.mrb[11].mxu0 }
 0x666   :  { %v627_v6 = vpop.f32.mrb[12].mxu0 }
 0x667   :  { %v628_v7 = vadd.f32 %v627_v6, %v4688_v1  ;;  %v3983_v8 = vpop.f32.mrb[13].mxu0 }
 0x668   :  { %v630_v9 = vpop.f32.mrb[14].mxu0  ;;  %v4811_v8 = vpack.c.bf16 %v4657_v55, %v4657_v55 }
 0x669   :  { %v3984_v10 = vpop.f32.mrb[15].mxu0  ;;  %v633_v11 = vsel %vm312_vm4, %v628_v7, -inf }
 0x66a   :  { %634 = vmax.xlane.f32.xlu1 %v633_v11 }
 0x67b   :  { %746 = vrot.lane.b32.xlu1 %v4653_v52, %s5405_s0 }
 0x67f   :  { %744 = vrot.lane.b32.xlu1 %v4653_v52, %s5407_s21 }
 0x6f7   :  { %v635_v12 = vpop.xlane.xlu1 %634 }
 0x6f8   :  { %v636_v13 = vsub.f32 %v628_v7, %v635_v12 }
 0x6fa   :  { %v637_v14 = vmul.f32 1.442695, %v636_v13 }
 0x6fb   :  { %v747_v22 = vpop.permute.xlu1 %746 }
 0x6fc   :  { %4391 = vpow2.f32 %v637_v14  ;;  %v752_v24 = vsel %vm265_vm2, %v747_v22, 0  ;;  %v976_v14 = vsel %vm328_vm3, %v4811_v8, 0 }
 0x6ff   :  { %v745_v25 = vpop.permute.xlu1 %744 }
 0x706   :  { %v4392_v16 = vpop.eup %4391 }
 0x707   :  { %v639_v17 = vsel %vm312_vm4, %v4392_v16, 0.0 }
 0x708   :  { %640 = vadd.xlane.f32.xlu0 %v639_v17 }
 0x71e   :  { %645 = vrot.lane.b32.xlu0 %v4669_v61, %s5409_s1 }
 0x795   :  { %v641_v18 = vpop.xlane.xlu0 %640 }
 0x796   :  { %4393 = vrcp.f32 %v641_v18 }
 0x799   :  { %v646_v19 = vpop.permute.xlu0 %645 }
 0x79a   :  { %v651_v20 = vsel %vm328_vm3, %v646_v19, 0 }
 0x79b   :  { %3986 = vmatpush3.bf16.msra.mxu1 %v651_v20 }
 0x79c   :  { %3997 = vmatprep.subr.bf16.mxu1 %v4474_v42 }
 0x7a0   :  { %v4394_v52 = vpop.eup %4393 }
 0x7a1   :  { %v643_v21 = vmul.f32 %v4394_v52, %v4392_v16 }
 0x7a3   :  { %v644_v23 = vpack.c.bf16 %v643_v21, %v643_v21 }
 0x7a5   :  { %3988 = vmatmul.mubr.msk.bf16.vlgmr.msra.gmra.mrb[16].mxu1 %vm312_vm4, %v644_v23 }
 0x7a6   :  { %3998 = vmatpush3.bf16.xpose.msra.mxu1 %v752_v24  ;;  %3999 = vmatprep.mubr.msk.bf16.mxu1 %vm4475_vm1, %v4474_v42 }
 0x7a7   :  { %4009 = vmatprep.subr.bf16.mxu1 %v4474_v42 }
 0x7ad   :  { %4000 = vmatmul.mubr.msk.bf16.vlgmr.msra.gmra.mrb[20].mxu1 %vm265_vm2, %v745_v25 }
 0x7ae   :  { %4011 = vmatprep.mubr.msk.bf16.mxu1 %vm4475_vm1, %v4474_v42  ;;  %4010 = vmatpush3.bf16.msra.mxu1 %v4787_v56 }
 0x7af   :  { %4021 = vmatprep.subr.bf16.mxu1 %v4474_v42 }
 0x878   :  { %v687_v27 = vpop.f32.mrb[16].mxu1 }
 0x879   :  { %v693_v28 = vpack.c.bf16 %v687_v27, %v687_v27  ;;  %v3989_v29 = vpop.f32.mrb[17].mxu1 }
 0x87a   :  { %v690_v30 = vpop.f32.mrb[18].mxu1 }
 0x87b   :  { %v3990_v31 = vpop.f32.mrb[19].mxu1  ;;  %3994 = vmatmul.mubr.msk.bf16.vlgmr.msra.gmra.mrb[16].mxu0 %vm265_vm2, %v693_v28 }
 0x87c   :  { %4005 = vmatprep.mubr.msk.bf16.mxu0 %vm4475_vm1, %v4474_v42 }
 0x880   :  { %v788_v32 = vpop.f32.mrb[20].mxu1 }
 0x881   :  { %v789_v33 = vadd.f32 %v788_v32, %v4688_v1  ;;  %v4001_v34 = vpop.f32.mrb[21].mxu1 }
 0x882   :  { %v791_v39 = vpop.f32.mrb[22].mxu1 }
 0x883   :  { %v4002_v40 = vpop.f32.mrb[23].mxu1  ;;  %v794_v41 = vsel %vm312_vm4, %v789_v33, -inf }
 0x884   :  { %795 = vmax.xlane.f32.xlu1 %v794_v41 }
 0x895   :  { %912 = vrot.lane.b32.xlu1 %v4770_v44, %s4477_s24 }
 0x899   :  { %1021 = vrot.lane.b32.xlu1 %v4770_v44, %s4476_s23 }
 0x911   :  { %v796_v45 = vpop.xlane.xlu1 %795 }
 0x912   :  { %v797_v47 = vsub.f32 %v789_v33, %v796_v45 }
 0x914   :  { %v798_v48 = vmul.f32 1.442695, %v797_v47 }
 0x916   :  { %4395 = vpow2.f32 %v798_v48 }
 0x920   :  { %v4396_v49 = vpop.eup %4395 }
 0x921   :  { %v800_v50 = vsel %vm312_vm4, %v4396_v49, 0.0 }
 0x922   :  { %801 = vadd.xlane.f32.xlu0 %v800_v50 }
 0x938   :  { %806 = vrot.lane.b32.xlu0 %v4669_v61, %s5407_s21 }
 0x93c   :  { %1019 = vrot.lane.b32.xlu0 %v4770_v44, %s4478_s14 }
 0x94e   :  { %v737_v53 = vpop.f32.mrb[16].mxu0 }
 0x94f   :  { %v4782_v51 = vadd.f32 %v737_v53, %v4735_v2  ;;  %v3995_v54 = vpop.f32.mrb[17].mxu0  ;;  %v913_v2 = vpop.permute.xlu1 %912 }
 0x950   :  { %v740_v57 = vpop.f32.mrb[18].mxu0  ;;  %v918_v4 = vsel %vm265_vm2, %v913_v2, 0 }
 0x951   :  { %v3996_v58 = vpop.f32.mrb[19].mxu0 }
 0x953   :  { %v1022_v5 = vpop.permute.xlu1 %1021 }
 0x954   :  { %v1027_v6 = vsel %vm265_vm2, %v1022_v5, 0 }
 0x9af   :  { %v802_v61 = vpop.xlane.xlu0 %801 }
 0x9b0   :  { %4397 = vrcp.f32 %v802_v61 }
 0x9b3   :  { %v807_v59 = vpop.permute.xlu0 %806 }
 0x9b4   :  { %v812_v60 = vsel %vm328_vm3, %v807_v59, 0 }
 0x9b5   :  { %4004 = vmatpush3.bf16.msra.mxu0 %v812_v60 }
 0x9b6   :  { %4015 = vmatprep.subr.bf16.mxu0 %v4474_v42 }
 0x9b7   :  { %v1020_v7 = vpop.permute.xlu0 %1019 }
 0x9ba   :  { %v4398_v62 = vpop.eup %4397 }
 0x9bb   :  { %v804_v63 = vmul.f32 %v4398_v62, %v4396_v49 }
 0x9bd   :  { %v805_v3 = vpack.c.bf16 %v804_v63, %v804_v63 }
 0x9bf   :  { %4006 = vmatmul.mubr.msk.bf16.vlgmr.msra.gmra.mrb[20].mxu0 %vm312_vm4, %v805_v3 }
 0x9c0   :  { %4016 = vmatpush3.bf16.xpose.msra.mxu0 %v918_v4  ;;  %4017 = vmatprep.mubr.msk.bf16.mxu0 %vm4475_vm1, %v4474_v42 }
 0x9c1   :  { %4027 = vmatprep.subr.bf16.mxu0 %v4474_v42 }
 0x9c7   :  { %4018 = vmatmul.mubr.msk.bf16.vlgmr.msra.gmra.mrb[24].mxu0 %vm265_vm2, %v4770_v44 }
 0x9c8   :  { %4028 = vmatpush3.bf16.xpose.msra.mxu0 %v1027_v6  ;;  %4029 = vmatprep.mubr.msk.bf16.mxu0 %vm4475_vm1, %v4474_v42 }
 0x9c9   :  { %4039 = vmatprep.subr.bf16.mxu0 %v4474_v42 }
 0x9cf   :  { %4030 = vmatmul.mubr.msk.bf16.vlgmr.msra.gmra.mrb[28].mxu0 %vm265_vm2, %v1020_v7 }
 0x9d0   :  { %4040 = vmatpush3.bf16.msra.mxu0 %v4719_v36  ;;  %4041 = vmatprep.mubr.msk.bf16.mxu0 %vm4475_vm1, %v4474_v42  ;;  %v4820_v36 = vrot.slane %v4684_v0, %v4650_v46 }
 0x9d1   :  { %4051 = vmatprep.subr.bf16.mxu0 %v4474_v42 }
 0xa92   :  { %v848_v9 = vpop.f32.mrb[20].mxu0 }
 0xa93   :  { %v854_v10 = vpack.c.bf16 %v848_v9, %v848_v9  ;;  %v4007_v11 = vpop.f32.mrb[21].mxu0 }
 0xa94   :  { %v851_v12 = vpop.f32.mrb[22].mxu0 }
 0xa95   :  { %v4008_v13 = vpop.f32.mrb[23].mxu0  ;;  %4012 = vmatmul.mubr.msk.bf16.vlgmr.msra.gmra.mrb[24].mxu1 %vm265_vm2, %v854_v10 }
 0xa96   :  { %4022 = vmatpush3.bf16.msra.mxu1 %v976_v14  ;;  %4023 = vmatprep.mubr.msk.bf16.mxu1 %vm4475_vm1, %v4474_v42 }
 0xa97   :  { %4033 = vmatprep.subr.bf16.mxu1 %v4474_v42 }
 0xa9a   :  { %v954_v55 = vpop.f32.mrb[24].mxu0 }
 0xa9b   :  { %v955_v16 = vadd.f32 %v954_v55, %v4820_v36  ;;  %v4019_v17 = vpop.f32.mrb[25].mxu0 }
 0xa9c   :  { %v957_v18 = vpop.f32.mrb[26].mxu0 }
 0xa9d   :  { %v4020_v19 = vpop.f32.mrb[27].mxu0  ;;  %v960_v20 = vsel %vm312_vm4, %v955_v16, -inf }
 0xa9e   :  { %961 = vmax.xlane.f32.xlu1 %v960_v20 }
 0xaa2   :  { %v1063_v52 = vpop.f32.mrb[28].mxu0 }
 0xaa3   :  { %v1064_v21 = vadd.f32 %v1063_v52, %v4820_v36  ;;  %v4031_v22 = vpop.f32.mrb[29].mxu0 }
 0xaa4   :  { %v1066_v23 = vpop.f32.mrb[30].mxu0 }
 0xaa5   :  { %v4032_v24 = vpop.f32.mrb[31].mxu0  ;;  %v1069_v0 = vsel %vm312_vm4, %v1064_v21, -inf }
 0xaa6   :  { %1070 = vmax.xlane.f32.xlu0 %v1069_v0 }
 0xaaf   :  { %1082 = vrot.lane.b32.xlu1 %v4811_v8, %s4478_s14 }
 0xab3   :  { %1217 = vrot.lane.b32.xlu1 %v4770_v44, %s5409_s1 }
 0xb2b   :  { %v962_v25 = vpop.xlane.xlu1 %961 }
 0xb2c   :  { %v963_v27 = vsub.f32 %v955_v16, %v962_v25 }
 0xb2e   :  { %v964_v28 = vmul.f32 1.442695, %v963_v27 }
 0xb2f   :  { %v1083_v57 = vpop.permute.xlu1 %1082 }
 0xb30   :  { %4399 = vpow2.f32 %v964_v28  ;;  %v1088_v61 = vsel %vm328_vm3, %v1083_v57, 0  ;;  %v3681_v57 = vld [vmem:[%s5388_s5] ss:$0 sm:$0xff] }
 0xb33   :  { %v1071_v29 = vpop.xlane.xlu0 %1070  ;;  %v1218_v12 = vpop.permute.xlu1 %1217 }
 0xb34   :  { %v1072_v30 = vsub.f32 %v1064_v21, %v1071_v29 }
 0xb36   :  { %v1073_v31 = vmul.f32 1.442695, %v1072_v30 }
 0xb38   :  { %4401 = vpow2.f32 %v1073_v31 }
 0xb3a   :  { %v4400_v32 = vpop.eup %4399 }
 0xb3b   :  { %v966_v33 = vsel %vm312_vm4, %v4400_v32, 0.0 }
 0xb3c   :  { %967 = vadd.xlane.f32.xlu0 %v966_v33 }
 0xb42   :  { %v4402_v34 = vpop.eup %4401 }
 0xb43   :  { %v1075_v39 = vsel %vm312_vm4, %v4402_v34, 0.0 }
 0xb44   :  { %1076 = vadd.xlane.f32.xlu0 %v1075_v39 }
 0xb5a   :  { %1219 = vrot.lane.b32.xlu0 %v4770_v44, %s4480_s27 }
 0xb68   :  { %v898_v40 = vpop.f32.mrb[24].mxu1 }
 0xb69   :  { %v4836_v41 = vadd.f32 %v898_v40, %v4782_v51  ;;  %v4013_v45 = vpop.f32.mrb[25].mxu1 }
 0xb6a   :  { %v901_v47 = vpop.f32.mrb[26].mxu1 }
 0xb6b   :  { %v4014_v48 = vpop.f32.mrb[27].mxu1 }
 0xbc9   :  { %v968_v49 = vpop.xlane.xlu0 %967 }
 0xbca   :  { %4403 = vrcp.f32 %v968_v49 }
 0xbd1   :  { %v1077_v50 = vpop.xlane.xlu0 %1076 }
 0xbd2   :  { %4405 = vrcp.f32 %v1077_v50 }
 0xbd4   :  { %v4404_v53 = vpop.eup %4403 }
 0xbd5   :  { %v970_v54 = vmul.f32 %v4404_v53, %v4400_v32  ;;  %v1220_v5 = vpop.permute.xlu0 %1219 }
 0xbd6   :  { %v1225_v10 = vsel %vm265_vm2, %v1220_v5, 0 }
 0xbd7   :  { %v971_v58 = vpack.c.bf16 %v970_v54, %v970_v54 }
 0xbd9   :  { %4024 = vmatmul.mubr.msk.bf16.vlgmr.msra.gmra.mrb[28].mxu1 %vm312_vm4, %v971_v58 }
 0xbda   :  { %4034 = vmatpush3.bf16.msra.mxu1 %v1088_v61  ;;  %4035 = vmatprep.mubr.msk.bf16.mxu1 %vm4475_vm1, %v4474_v42 }
 0xbdb   :  { %4045 = vmatprep.subr.bf16.mxu1 %v4474_v42 }
 0xbdc   :  { %v4406_v51 = vpop.eup %4405 }
 0xbdd   :  { %v1079_v59 = vmul.f32 %v4406_v51, %v4402_v34 }
 0xbdf   :  { %v1080_v60 = vpack.c.bf16 %v1079_v59, %v1079_v59 }
 0xbe1   :  { %4036 = vmatmul.mubr.msk.bf16.vlgmr.msra.gmra.mrb[32].mxu1 %vm312_vm4, %v1080_v60 }
 0xbe2   :  { %4046 = vmatpush3.bf16.msra.mxu1 %v4713_v35  ;;  %4047 = vmatprep.mubr.msk.bf16.mxu1 %vm4475_vm1, %v4474_v42 }
 0xbe3   :  { %4057 = vmatprep.subr.bf16.mxu1 %v4474_v42 }
 0xcac   :  { %v1012_v62 = vpop.f32.mrb[28].mxu1 }
 0xcad   :  { %v1018_v63 = vpack.c.bf16 %v1012_v62, %v1012_v62  ;;  %v4025_v2 = vpop.f32.mrb[29].mxu1 }
 0xcae   :  { %v1015_v3 = vpop.f32.mrb[30].mxu1 }
 0xcaf   :  { %v4026_v4 = vpop.f32.mrb[31].mxu1  ;;  %4048 = vmatmul.mubr.msk.bf16.vlgmr.msra.gmra.mrb[36].mxu1 %vm265_vm2, %v1018_v63 }
 0xcb0   :  { %4059 = vmatprep.mubr.msk.bf16.mxu1 %vm4475_vm1, %v4474_v42 }
 0xcb4   :  { %v1124_v6 = vpop.f32.mrb[32].mxu1 }
 0xcb5   :  { %v1130_v7 = vpack.c.bf16 %v1124_v6, %v1124_v6  ;;  %v4037_v9 = vpop.f32.mrb[33].mxu1 }
 0xcb6   :  { %v1127_v35 = vpop.f32.mrb[34].mxu1 }
 0xcb7   :  { %v4038_v11 = vpop.f32.mrb[35].mxu1  ;;  %4042 = vmatmul.mubr.msk.bf16.vlgmr.msra.gmra.mrb[32].mxu0 %vm265_vm2, %v1130_v7 }
 0xcb8   :  { %4052 = vmatpush3.bf16.xpose.msra.mxu0 %v1225_v10  ;;  %4053 = vmatprep.mubr.msk.bf16.mxu0 %vm4475_vm1, %v4474_v42 }
 0xcb9   :  { %4063 = vmatprep.subr.bf16.mxu0 %v4474_v42 }
 0xcbf   :  { %4054 = vmatmul.mubr.msk.bf16.vlgmr.msra.gmra.mrb[36].mxu0 %vm265_vm2, %v1218_v12 }
 0xcc0   :  { %4064 = vmatpush3.bf16.msra.mxu0 %v4759_v26  ;;  %4065 = vmatprep.mubr.msk.bf16.mxu0 %vm4475_vm1, %v4474_v42 }
 0xcc1   :  { %4075 = vmatprep.subr.bf16.mxu0 %v4474_v42 }
 0xd82   :  { %v1211_v13 = vpop.f32.mrb[36].mxu1 }
 0xd83   :  { %v4049_v14 = vpop.f32.mrb[37].mxu1 }
 0xd84   :  { %v1214_v55 = vpop.f32.mrb[38].mxu1 }
 0xd85   :  { %v4050_v16 = vpop.f32.mrb[39].mxu1 }
 0xd8a   :  { %v1168_v17 = vpop.f32.mrb[32].mxu0 }
 0xd8b   :  { %v4861_v18 = vadd.f32 %v1211_v13, %v1168_v17  ;;  %v4043_v19 = vpop.f32.mrb[33].mxu0 }
 0xd8c   :  { %v1171_v20 = vpop.f32.mrb[34].mxu0 }
 0xd8d   :  { %v4044_v52 = vpop.f32.mrb[35].mxu0 }
 0xd92   :  { %v1261_v21 = vpop.f32.mrb[36].mxu0 }
 0xd93   :  { %v1262_v22 = vadd.f32 %v1261_v21, %v4820_v36  ;;  %v4055_v23 = vpop.f32.mrb[37].mxu0 }
 0xd94   :  { %v1264_v26 = vpop.f32.mrb[38].mxu0 }
 0xd95   :  { %v4056_v24 = vpop.f32.mrb[39].mxu0  ;;  %v1267_v0 = vsel %vm312_vm4, %v1262_v22, -inf }
 0xd96   :  { %1268 = vmax.xlane.f32.xlu1 %v1267_v0 }
 0xda7   :  { %1374 = vrot.lane.b32.xlu1 %v4770_v44, %s5405_s0 }
 0xdab   :  { %1372 = vrot.lane.b32.xlu1 %v4770_v44, %s5407_s21 }
 0xe23   :  { %v1269_v25 = vpop.xlane.xlu1 %1268 }
 0xe24   :  { %v1270_v27 = vsub.f32 %v1262_v22, %v1269_v25 }
 0xe26   :  { %v1271_v28 = vmul.f32 1.442695, %v1270_v27 }
 0xe27   :  { %v1375_v39 = vpop.permute.xlu1 %1374 }
 0xe28   :  { %4407 = vpow2.f32 %v1271_v28  ;;  %v1380_v45 = vsel %vm265_vm2, %v1375_v39, 0 }
 0xe2b   :  { %v1373_v47 = vpop.permute.xlu1 %1372 }
 0xe32   :  { %v4408_v29 = vpop.eup %4407 }
 0xe33   :  { %v1273_v30 = vsel %vm312_vm4, %v4408_v29, 0.0 }
 0xe34   :  { %1274 = vadd.xlane.f32.xlu0 %v1273_v30 }
 0xe4a   :  { %1279 = vrot.lane.b32.xlu0 %v4811_v8, %s5409_s1  ;;  %s5423_s1 = smov 16  }
 0xec1   :  { %v1275_v31 = vpop.xlane.xlu0 %1274 }
 0xec2   :  { %4409 = vrcp.f32 %v1275_v31 }
 0xec5   :  { %v1280_v32 = vpop.permute.xlu0 %1279 }
 0xec6   :  { %v1285_v33 = vsel %vm328_vm3, %v1280_v32, 0 }
 0xec7   :  { %4058 = vmatpush3.bf16.msra.mxu1 %v1285_v33 }
 0xec8   :  { %4069 = vmatprep.subr.bf16.mxu1 %v4474_v42 }
 0xecc   :  { %v4410_v44 = vpop.eup %4409 }
 0xecd   :  { %v1277_v34 = vmul.f32 %v4410_v44, %v4408_v29 }
 0xecf   :  { %v1278_v40 = vpack.c.bf16 %v1277_v34, %v1277_v34 }
 0xed1   :  { %4060 = vmatmul.mubr.msk.bf16.vlgmr.msra.gmra.mrb[40].mxu1 %vm312_vm4, %v1278_v40  ;;  %v4335_v40 = vld [vmem:[%s5389_s8] sm:$0xff]  }
 0xed2   :  { %4070 = vmatpush3.bf16.xpose.msra.mxu1 %v1380_v45  ;;  %4071 = vmatprep.mubr.msk.bf16.mxu1 %vm4475_vm1, %v4474_v42  ;;  %v4337_v45 = vld [vmem:[%s5389_s8 + $0x10] sm:$0xff]  }
 0xed3   :  { %4081 = vmatprep.subr.bf16.mxu1 %v4474_v42 }
 0xed9   :  { %4072 = vmatmul.mubr.msk.bf16.vlgmr.msra.gmra.mrb[44].mxu1 %vm265_vm2, %v1373_v47  ;;  %v4338_v47 = vld [vmem:[%s5389_s8 + $0x18] sm:$0xff]  }
 0xeda   :  { %4082 = vmatpush3.bf16.msra.mxu1 %v4787_v56  ;;  %4083 = vmatprep.mubr.msk.bf16.mxu1 %vm4475_vm1, %v4474_v42  ;;  %v1534_v56 = vadd.f32 %v3681_v57, %v4836_v41 }
 0xedb   :  { %4099 = vmatprep.subr.bf16.mxu1 %v4474_v42 }
 0xedc   :  { %v1536_v63 = vadd.f32 %v1534_v56, %v4631_v37 }
 0xede   :  { %v1540_v2 = vsel %vm72_vm0, %v1536_v63, 0.0 }
 0xfa4   :  { %v1321_v48 = vpop.f32.mrb[40].mxu1 }
 0xfa5   :  { %v1327_v49 = vpack.c.bf16 %v1321_v48, %v1321_v48  ;;  %v4061_v50 = vpop.f32.mrb[41].mxu1 }
 0xfa6   :  { %v1324_v53 = vpop.f32.mrb[42].mxu1 }
 0xfa7   :  { %v4062_v54 = vpop.f32.mrb[43].mxu1  ;;  %4066 = vmatmul.mubr.msk.bf16.vlgmr.msra.gmra.mrb[40].mxu0 %vm265_vm2, %v1327_v49 }
 0xfa8   :  { %4077 = vmatprep.mubr.msk.bf16.mxu0 %vm4475_vm1, %v4474_v42 }
 0xfac   :  { %v1416_v58 = vpop.f32.mrb[44].mxu1 }
 0xfad   :  { %v1417_v61 = vadd.f32 %v1416_v58, %v4820_v36  ;;  %v4073_v51 = vpop.f32.mrb[45].mxu1 }
 0xfae   :  { %v1419_v59 = vpop.f32.mrb[46].mxu1 }
 0xfaf   :  { %v4074_v60 = vpop.f32.mrb[47].mxu1  ;;  %v1422_v62 = vsel %vm312_vm4, %v1417_v61, -inf }
 0xfb0   :  { %1423 = vmax.xlane.f32.xlu1 %v1422_v62  ;;  %v3683_v62 = vld [vmem:[%s5391_s7] ss:$0 sm:$0xff] }
 0xfb4   :  { %1541 = vadd.xlane.f32.xlu1 %v1540_v2 }
0x103d   :  { %v1424_v3 = vpop.xlane.xlu1 %1423 }
0x103e   :  { %v1425_v4 = vsub.f32 %v1417_v61, %v1424_v3  ;;  %v3682_v61 = vld [vmem:[%s5390_s6] ss:$0 sm:$0xff] }
0x1040   :  { %v1426_v5 = vmul.f32 1.442695, %v1425_v4 }
0x1041   :  { %v1542_v52 = vpop.xlane.xlu1 %1541 }
0x1042   :  { %4411 = vpow2.f32 %v1426_v5  ;;  %v1546_v21 = vmul.f32 0.015625, %v1542_v52  ;;  %v4339_v5 = vld [vmem:[%s5392_s10] sm:$0xff]  }
0x1044   :  { %v1548_v0 = vsub.f32 %v1536_v63, %v1546_v21 }
0x1046   :  { %v1550_v30 = vmul.f32 %v1548_v0, %v1548_v0 }
0x1048   :  { %v1552_v31 = vsel %vm72_vm0, %v1550_v30, 0.0 }
0x104c   :  { %v4412_v6 = vpop.eup %4411 }
0x104d   :  { %v1428_v41 = vsel %vm312_vm4, %v4412_v6, 0.0 }
0x104e   :  { %1429 = vadd.xlane.f32.xlu0 %v1428_v41  ;;  %v4341_v41 = vld [vmem:[%s5392_s10 + $0x10] sm:$0xff]  }
0x1064   :  { %1434 = vrot.lane.b32.xlu0 %v4811_v8, %s5407_s21 }
0x107a   :  { %v1365_v7 = vpop.f32.mrb[40].mxu0 }
0x107b   :  { %v1371_v9 = vadd.f32 %v1365_v7, %v4861_v18  ;;  %v4067_v35 = vpop.f32.mrb[41].mxu0  ;;  %v4343_v7 = vld [vmem:[%s5392_s10 + $0x20] sm:$0xff]  }
0x107c   :  { %v1368_v37 = vpop.f32.mrb[42].mxu0  ;;  %v4345_v35 = vld [vmem:[%s5392_s10 + $0x30] sm:$0xff]  }
0x107d   :  { %v4068_v10 = vpop.f32.mrb[43].mxu0  ;;  %v4346_v37 = vld [vmem:[%s5392_s10 + $0x38] sm:$0xff]  }
0x107e   :  { %v3684_v10 = vld [vmem:[%s5393_s9] ss:$0 sm:$0xff] }
0x10db   :  { %v1430_v11 = vpop.xlane.xlu0 %1429 }
0x10dc   :  { %4413 = vrcp.f32 %v1430_v11 }
0x10df   :  { %v1435_v12 = vpop.permute.xlu0 %1434 }
0x10e0   :  { %v1440_v13 = vsel %vm328_vm3, %v1435_v12, 0 }
0x10e1   :  { %4076 = vmatpush3.bf16.msra.mxu0 %v1440_v13 }
0x10e2   :  { %4087 = vmatprep.subr.bf16.mxu0 %v4474_v42 }
0x10e6   :  { %v4414_v14 = vpop.eup %4413 }
0x10e7   :  { %v1432_v55 = vmul.f32 %v4414_v14, %v4412_v6  ;;  %v4340_v6 = vld [vmem:[%s5392_s10 + $0x8] sm:$0xff]  }
0x10e9   :  { %v1433_v16 = vpack.c.bf16 %v1432_v55, %v1432_v55 }
0x10eb   :  { %4078 = vmatmul.mubr.msk.bf16.vlgmr.msra.gmra.mrb[44].mxu0 %vm312_vm4, %v1433_v16 }
0x10ec   :  { %4095 = vmatprep.mubr.msk.bf16.mxu0 %vm4475_vm1, %v4474_v42  ;;  %4088 = vmatpush3.bf16.msra.mxu0 %v4335_v40 }
0x10ed   :  { %4089 = vmatprep.subr.bf16.mxu0 %v4474_v42 }
0x11be   :  { %v1476_v8 = vpop.f32.mrb[44].mxu0 }
0x11bf   :  { %v1482_v17 = vpack.c.bf16 %v1476_v8, %v1476_v8  ;;  %v4079_v18 = vpop.f32.mrb[45].mxu0 }
0x11c0   :  { %v1479_v19 = vpop.f32.mrb[46].mxu0 }
0x11c1   :  { %v4080_v20 = vpop.f32.mrb[47].mxu0  ;;  %4084 = vmatmul.mubr.msk.bf16.vlgmr.msra.gmra.mrb[48].mxu1 %vm265_vm2, %v1482_v17 }
0x11c2   :  { %4115 = vmatprep.mubr.msk.bf16.mxu1 %vm4475_vm1, %v4474_v42  ;;  %4100 = vmatpush3.bf16.msra.mxu1 %v4339_v5  ;;  %v4355_v5 = vld [vmem:[%s5417_s26 + $0x64] ss:$8 sps:$4 sm:$0xff]  }
0x11c3   :  { %4101 = vmatprep.subr.bf16.mxu1 %v4474_v42 }
0x11c6   :  { %4102 = vmatpush3.bf16.msra.mxu1 %v4340_v6  ;;  %v4353_v6 = vld [vmem:[%s5417_s26 + $0x60] ss:$8 sps:$4 sm:$0xff]  }
0x11c7   :  { %4103 = vmatprep.subr.bf16.mxu1 %v4474_v42 }
0x11ca   :  { %4104 = vmatpush3.bf16.msra.mxu1 %v4341_v41  ;;  %v4356_v41 = vld [vmem:[%s5417_s26 + $0x70] ss:$8 sps:$4 sm:$0xff]  }
0x11cb   :  { %4105 = vmatprep.subr.bf16.mxu1 %v4474_v42 }
0x1294   :  { %v1520_v22 = vpop.f32.mrb[48].mxu1 }
0x1295   :  { %v1526_v23 = vadd.f32 %v1520_v22, %v1371_v9  ;;  %v4085_v26 = vpop.f32.mrb[49].mxu1  ;;  %v4344_v9 = vld [vmem:[%s5392_s10 + $0x28] sm:$0xff]  }
0x1296   :  { %v1523_v24 = vpop.f32.mrb[50].mxu1 }
0x1297   :  { %v1535_v25 = vadd.f32 %v3681_v57, %v1526_v23  ;;  %v4086_v27 = vpop.f32.mrb[51].mxu1 }
0x1299   :  { %v1537_v28 = vadd.f32 %v1535_v25, %v4633_v38  ;;  %v4336_v38 = vld [vmem:[%s5389_s8 + $0x8] sm:$0xff]  }
0x129a   :  { %4090 = vmatpush3.bf16.msra.mxu0 %v4336_v38 }
0x129b   :  { %v1543_v29 = vsel %vm72_vm0, %v1537_v28, 0.0  ;;  %4091 = vmatprep.subr.bf16.mxu0 %v4474_v42 }
0x129c   :  { %1544 = vadd.xlane.f32.xlu1 %v1543_v29 }
0x129e   :  { %4092 = vmatpush3.bf16.msra.mxu0 %v4337_v45 }
0x129f   :  { %4093 = vmatprep.subr.bf16.mxu0 %v4474_v42 }
0x12a0   :  { %1553 = vadd.xlane.f32.xlu1 %v1552_v31 }
0x12a2   :  { %4094 = vmatpush3.bf16.msra.mxu0 %v4338_v47 }
0x1329   :  { %v1545_v32 = vpop.xlane.xlu1 %1544 }
0x132a   :  { %v1547_v33 = vmul.f32 0.015625, %v1545_v32 }
0x132c   :  { %v1549_v44 = vsub.f32 %v1537_v28, %v1547_v33  ;;  %v3690_v33 = vld [vmem:[%s5394_s11] ss:$0 sm:$0xff] }
0x132d   :  { %v1554_v48 = vpop.xlane.xlu1 %1553 }
0x132e   :  { %v1551_v34 = vmul.f32 %v1549_v44, %v1549_v44  ;;  %v1558_v49 = vmul.f32 0.015625, %v1554_v48 }
0x1330   :  { %v1555_v39 = vsel %vm72_vm0, %v1551_v34, 0.0  ;;  %v1560_v50 = vadd.f32 1e-12, %v1558_v49 }
0x1331   :  { %1556 = vadd.xlane.f32.xlu1 %v1555_v39 }
0x1332   :  { %4415 = vrsqrt.f32 %v1560_v50 }
0x133c   :  { %v4416_v56 = vpop.eup %4415 }
0x133d   :  { %v1564_v58 = vmul.f32 %v4416_v56, %v1548_v0 }
0x133f   :  { %v1572_v59 = vmul.f32 %v3682_v61, %v1564_v58 }
0x1341   :  { %v4932_v2 = vadd.f32 %v3683_v62, %v1572_v59 }
0x13be   :  { %v1557_v53 = vpop.xlane.xlu1 %1556 }
0x13bf   :  { %v1559_v54 = vmul.f32 0.015625, %v1557_v53 }
0x13c1   :  { %v1561_v57 = vadd.f32 1e-12, %v1559_v54 }
0x13c3   :  { %4417 = vrsqrt.f32 %v1561_v57 }
0x13cd   :  { %v4418_v51 = vpop.eup %4417 }
0x13ce   :  { %v1565_v60 = vmul.f32 %v4418_v51, %v1549_v44 }
0x13d0   :  { %v1573_v63 = vmul.f32 %v3682_v61, %v1565_v60 }
0x13d2   :  { %v4934_v3 = vadd.f32 %v3683_v62, %v1573_v63  ;;  %v4349_v63 = vld [vmem:[%s5417_s26 + $0x44] ss:$8 sps:$4 sm:$0xff]  }
0x13d3   :  { %1920 = vmatprep.subr.bf16.mxu0 %v4349_v63 }
0x13d4   :  { %v1582_v4 = vpack.c.bf16 %v4934_v3, %v4932_v2 }
0x13d6   :  { %4096 = vmatmul.mubr.msk.bf16.vlgmr.msra.gmra.mrb[48].mxu0 %vm72_vm0, %v1582_v4  ;;  %v4350_v4 = vld [vmem:[%s5417_s26 + $0x50] ss:$8 sps:$4 sm:$0xff]  }
0x13d7   :  { %1952 = vmatprep.mubr.bf16.mxu0 %v4473_v15  ;;  %v4342_v15 = vld [vmem:[%s5392_s10 + $0x18] sm:$0xff]  }
0x13d8   :  { %4106 = vmatpush3.bf16.msra.mxu1 %v4342_v15  ;;  %v4358_v15 = vld [vmem:[%s5417_s26 + $0x74] ss:$8 sps:$4 sm:$0xff]  }
0x13d9   :  { %4107 = vmatprep.subr.bf16.mxu1 %v4474_v42 }
0x13dc   :  { %4108 = vmatpush3.bf16.msra.mxu1 %v4343_v7 }
0x13dd   :  { %4109 = vmatprep.subr.bf16.mxu1 %v4474_v42 }
0x13e0   :  { %4110 = vmatpush3.bf16.msra.mxu1 %v4344_v9 }
0x13e1   :  { %4111 = vmatprep.subr.bf16.mxu1 %v4474_v42 }
0x13e4   :  { %4112 = vmatpush3.bf16.msra.mxu1 %v4345_v35 }
0x13e5   :  { %4113 = vmatprep.subr.bf16.mxu1 %v4474_v42 }
0x13e8   :  { %4114 = vmatpush3.bf16.msra.mxu1 %v4346_v37 }
0x13e9   :  { %4125 = vmatprep.subr.bf16.mxu1 %v4474_v42 }
0x14a9   :  { %v1651_v11 = vpop.f32.mrb[48].mxu0 }
0x14aa   :  { %v1652_v12 = vadd.f32 %v3684_v10, %v1651_v11  ;;  %v4097_v13 = vpop.f32.mrb[49].mxu0 }
0x14ab   :  { %v1654_v14 = vpop.f32.mrb[50].mxu0 }
0x14ac   :  { %v1660_v55 = vmul.f32 0.044715, %v1652_v12  ;;  %v1655_v16 = vadd.f32 %v3684_v10, %v1654_v14  ;;  %v4098_v8 = vpop.f32.mrb[51].mxu0  ;;  %v1658_v27 = vmul.f32 0.5, %v1652_v12  ;;  %v3699_v14 = vld [vmem:[%s5395_s12] ss:$0 sm:$0xff] }
0x14ae   :  { %v1662_v17 = vmul.f32 %v1660_v55, %v1652_v12  ;;  %v1661_v18 = vmul.f32 0.044715, %v1655_v16  ;;  %v1659_v28 = vmul.f32 0.5, %v1655_v16 }
0x14b0   :  { %v1664_v19 = vmul.f32 %v1662_v17, %v1652_v12  ;;  %v1663_v20 = vmul.f32 %v1661_v18, %v1655_v16  ;;  %v3700_v17 = vld [vmem:[%s5396_s13] ss:$0 sm:$0xff] }
0x14b2   :  { %v1666_v52 = vadd.f32 %v1664_v19, %v1652_v12  ;;  %v1665_v21 = vmul.f32 %v1663_v20, %v1655_v16 }
0x14b4   :  { %v1668_v22 = vmul.f32 0.7978846, %v1666_v52  ;;  %v1667_v23 = vadd.f32 %v1665_v21, %v1655_v16  ;;  %v3741_v21 = vld [vmem:[%s5420_s22 + $0x2] sm:$0x3]  ;;  %s5421_s22 = smov 96  }
0x14b6   :  { %4419 = vtanh.f32 %v1668_v22  ;;  %v1669_v26 = vmul.f32 0.7978846, %v1667_v23  ;;  %v1870_v22 = vrot.slane %v3741_v21, %v4640_v43  ;;  %v1874_v23 = vrot.slane %v3741_v21, %v4650_v46 }
0x14b8   :  { %4421 = vtanh.f32 %v1669_v26 }
0x14c0   :  { %v4420_v24 = vpop.eup %4419 }
0x14c1   :  { %v1672_v0 = vadd.f32 1.0, %v4420_v24 }
0x14c2   :  { %v4422_v25 = vpop.eup %4421 }
0x14c3   :  { %v1673_v29 = vadd.f32 1.0, %v4422_v25  ;;  %v1674_v30 = vmul.f32 %v1672_v0, %v1658_v27 }
0x14c5   :  { %v1675_v31 = vmul.f32 %v1673_v29, %v1659_v28 }
0x14c7   :  { %v1676_v32 = vpack.c.bf16 %v1675_v31, %v1674_v30 }
0x14c9   :  { %4116 = vmatmul.mubr.bf16.vlgmr.msra.gmra.mrb[52].mxu1 %v1676_v32 }
0x14ca   :  { %4127 = vmatprep.mubr.msk.bf16.mxu1 %vm4475_vm1, %v4474_v42 }
0x159c   :  { %v1766_v44 = vpop.f32.mrb[52].mxu1 }
0x159d   :  { %v1767_v34 = vadd.f32 %v3690_v33, %v1766_v44  ;;  %v4117_v39 = vpop.f32.mrb[53].mxu1 }
0x159e   :  { %v1769_v40 = vpop.f32.mrb[54].mxu1 }
0x159f   :  { %v1770_v38 = vadd.f32 %v3690_v33, %v1769_v40  ;;  %v4118_v45 = vpop.f32.mrb[55].mxu1  ;;  %v1773_v47 = vadd.f32 %v1767_v34, %v4932_v2  ;;  %v4347_v2 = vld [vmem:[%s5417_s26 + $0x40] ss:$8 sps:$4 sm:$0xff]  }
0x15a0   :  { %1921 = vmatpush1.bf16.msra.mxu0 %v4347_v2 }
0x15a1   :  { %v1777_v48 = vsel %vm72_vm0, %v1773_v47, 0.0  ;;  %v1774_v49 = vadd.f32 %v1770_v38, %v4934_v3  ;;  %v4352_v3 = vld [vmem:[%s5417_s26 + $0x54] ss:$8 sps:$4 sm:$0xff]  }
0x15a2   :  { %1778 = vadd.xlane.f32.xlu1 %v1777_v48  ;;  %1922 = vmatprep.subr.bf16.mxu0 %v4352_v3 }
0x15a3   :  { %v1780_v50 = vsel %vm72_vm0, %v1774_v49, 0.0 }
0x15a4   :  { %1781 = vadd.xlane.f32.xlu0 %v1780_v50  ;;  %1923 = vmatpush1.bf16.msra.mxu0 %v4350_v4 }
0x15a5   :  { %1924 = vmatprep.subr.bf16.mxu0 %v4355_v5 }
0x15a8   :  { %1925 = vmatpush1.bf16.msra.mxu0 %v4353_v6 }
0x15a9   :  { %1926 = vmatprep.subr.bf16.mxu0 %v4358_v15 }
0x15ac   :  { %1927 = vmatpush1.bf16.msra.mxu0 %v4356_v41 }
0x15ad   :  { %4119 = vmatprep.subr.bf16.mxu0 %v4474_v42 }
0x162f   :  { %v1779_v53 = vpop.xlane.xlu1 %1778 }
0x1630   :  { %v1783_v54 = vmul.f32 0.015625, %v1779_v53 }
0x1631   :  { %v1782_v57 = vpop.xlane.xlu0 %1781 }
0x1632   :  { %v1785_v56 = vsub.f32 %v1773_v47, %v1783_v54  ;;  %v1784_v58 = vmul.f32 0.015625, %v1782_v57 }
0x1634   :  { %v1786_v61 = vsub.f32 %v1774_v49, %v1784_v58  ;;  %v1787_v51 = vmul.f32 %v1785_v56, %v1785_v56 }
0x1636   :  { %v1789_v59 = vsel %vm72_vm0, %v1787_v51, 0.0  ;;  %v1788_v60 = vmul.f32 %v1786_v61, %v1786_v61 }
0x1637   :  { %1790 = vadd.xlane.f32.xlu1 %v1789_v59 }
0x1638   :  { %v1792_v62 = vsel %vm72_vm0, %v1788_v60, 0.0 }
0x163b   :  { %1793 = vadd.xlane.f32.xlu1 %v1792_v62 }
0x16c4   :  { %v1791_v7 = vpop.xlane.xlu1 %1790 }
0x16c5   :  { %v1795_v9 = vmul.f32 0.015625, %v1791_v7 }
0x16c7   :  { %v1797_v35 = vadd.f32 1e-12, %v1795_v9 }
0x16c8   :  { %v1794_v37 = vpop.xlane.xlu1 %1793 }
0x16c9   :  { %4423 = vrsqrt.f32 %v1797_v35  ;;  %v1796_v10 = vmul.f32 0.015625, %v1794_v37 }
0x16cb   :  { %v1798_v11 = vadd.f32 1e-12, %v1796_v10 }
0x16cd   :  { %4425 = vrsqrt.f32 %v1798_v11 }
0x16d3   :  { %v4424_v12 = vpop.eup %4423 }
0x16d4   :  { %v1801_v13 = vmul.f32 %v4424_v12, %v1785_v56 }
0x16d6   :  { %v1809_v16 = vmul.f32 %v3699_v14, %v1801_v13  ;;  %v5082_v13 = vld [vmem:[%s5387_s4 + $0x20] sm:$0xff]  }
0x16d7   :  { %v4426_v55 = vpop.eup %4425 }
0x16d8   :  { %v1802_v8 = vmul.f32 %v4426_v55, %v1786_v61  ;;  %v5017_v19 = vadd.f32 %v3700_v17, %v1809_v16 }
0x16da   :  { %v1810_v18 = vmul.f32 %v3699_v14, %v1802_v8  ;;  %v5088_v14 = vld [vmem:[%s5387_s4 + $0x28] sm:$0xff]  }
0x16dc   :  { %v5019_v20 = vadd.f32 %v3700_v17, %v1810_v18 }
0x16de   :  { %v1863_v52 = vpack.c.bf16 %v5019_v20, %v5017_v19 }
0x16e0   :  { %3750 = vmatmul.mubr.msk.bf16.vlgmr.msra.gmra.mrb[52].mxu0 %vm72_vm0, %v1863_v52 }
0x16e1   :  { %4121 = vmatprep.mubr.msk.bf16.mxu0 %vm4475_vm1, %v4474_v42 }
0x17b3   :  { %v1954_v26 = vpop.f32.mrb[52].mxu0 }
0x17b4   :  { %v1955_v24 = vadd.f32 %v1954_v26, %v1870_v22  ;;  %v1956_v0 = vpop.f32.mrb[53].mxu0 }
0x17b5   :  { %v1957_v25 = vadd.f32 %v1956_v0, %v1874_v23  ;;  %v1958_v27 = vpop.f32.mrb[54].mxu0 }
0x17b6   :  { %v5031_v28 = vpack.c.bf16 %v1955_v24, %v1955_v24  ;;  %v5033_v29 = vadd.f32 %v1958_v27, %v1870_v22  ;;  %v1960_v30 = vpop.f32.mrb[55].mxu0 }
0x17b7   :  { %v5035_v31 = vpack.c.bf16 %v1957_v25, %v1957_v25  ;;  %v5037_v32 = vadd.f32 %v1960_v30, %v1874_v23 }
0x17b8   :  { %2073 = vrot.lane.b32.xlu0 %v5031_v28, %s4478_s14  ;;  %1966 = vrot.lane.b32.xlu1 %v5031_v28, %s4477_s24 }
0x17b9   :  { %v2030_v43 = vsel %vm328_vm3, %v5035_v31, 0 }
0x17ba   :  { %4126 = vmatpush3.bf16.msra.mxu1 %v2030_v43 }
0x17bb   :  { %4137 = vmatprep.subr.bf16.mxu1 %v4474_v42 }
0x17bc   :  { %2075 = vrot.lane.b32.xlu1 %v5031_v28, %s4476_s23 }
0x182a   :  { %v1967_v46 = vpop.permute.xlu1 %1966  ;;  %v2074_v39 = vpop.permute.xlu0 %2073 }
0x182b   :  { %v1972_v33 = vsel %vm265_vm2, %v1967_v46, 0 }
0x182c   :  { %4120 = vmatpush3.bf16.xpose.msra.mxu0 %v1972_v33 }
0x182d   :  { %4131 = vmatprep.subr.bf16.mxu0 %v4474_v42 }
0x182e   :  { %v2076_v44 = vpop.permute.xlu1 %2075 }
0x182f   :  { %v2081_v34 = vsel %vm265_vm2, %v2076_v44, 0 }
0x1833   :  { %4122 = vmatmul.mubr.msk.bf16.vlgmr.msra.gmra.mrb[56].mxu0 %vm265_vm2, %v5031_v28 }
0x1834   :  { %4132 = vmatpush3.bf16.xpose.msra.mxu0 %v2081_v34  ;;  %4133 = vmatprep.mubr.msk.bf16.mxu0 %vm4475_vm1, %v4474_v42 }
0x1835   :  { %4143 = vmatprep.subr.bf16.mxu0 %v4474_v42 }
0x183b   :  { %4134 = vmatmul.mubr.msk.bf16.vlgmr.msra.gmra.mrb[60].mxu0 %vm265_vm2, %v2074_v39 }
0x183c   :  { %4145 = vmatprep.mubr.msk.bf16.mxu0 %vm4475_vm1, %v4474_v42  ;;  %4144 = vmatpush3.bf16.msra.mxu0 %v5088_v14 }
0x183d   :  { %4155 = vmatprep.subr.bf16.mxu0 %v4474_v42 }
0x1906   :  { %v2008_v40 = vpop.f32.mrb[56].mxu0 }
0x1907   :  { %v2009_v38 = vadd.f32 %v2008_v40, %v4688_v1  ;;  %v4123_v45 = vpop.f32.mrb[57].mxu0 }
0x1908   :  { %v2011_v47 = vpop.f32.mrb[58].mxu0 }
0x1909   :  { %v4124_v48 = vpop.f32.mrb[59].mxu0  ;;  %v2014_v49 = vsel %vm312_vm4, %v2009_v38, -inf }
0x190a   :  { %2015 = vmax.xlane.f32.xlu1 %v2014_v49 }
0x190e   :  { %v2117_v50 = vpop.f32.mrb[60].mxu0 }
0x190f   :  { %v2118_v53 = vadd.f32 %v2117_v50, %v4688_v1  ;;  %v4135_v54 = vpop.f32.mrb[61].mxu0 }
0x1910   :  { %v2120_v57 = vpop.f32.mrb[62].mxu0 }
0x1911   :  { %v4136_v56 = vpop.f32.mrb[63].mxu0  ;;  %v2123_v58 = vsel %vm312_vm4, %v2118_v53, -inf }
0x1912   :  { %2124 = vmax.xlane.f32.xlu0 %v2123_v58 }
0x1928   :  { %2285 = vrot.lane.b32.xlu0 %v5031_v28, %s4480_s27 }
0x1997   :  { %v2016_v61 = vpop.xlane.xlu1 %2015 }
0x1998   :  { %v2017_v51 = vsub.f32 %v2009_v38, %v2016_v61 }
0x199a   :  { %v2018_v59 = vmul.f32 1.442695, %v2017_v51 }
0x199c   :  { %4427 = vpow2.f32 %v2018_v59 }
0x199f   :  { %v2125_v60 = vpop.xlane.xlu0 %2124 }
0x19a0   :  { %v2126_v62 = vsub.f32 %v2118_v53, %v2125_v60 }
0x19a2   :  { %v2127_v63 = vmul.f32 1.442695, %v2126_v62 }
0x19a3   :  { %v2286_v52 = vpop.permute.xlu0 %2285 }
0x19a4   :  { %4429 = vpow2.f32 %v2127_v63  ;;  %v2291_v24 = vsel %vm265_vm2, %v2286_v52, 0 }
0x19a6   :  { %v4428_v2 = vpop.eup %4427 }
0x19a7   :  { %v2020_v3 = vsel %vm312_vm4, %v4428_v2, 0.0 }
0x19a8   :  { %2021 = vadd.xlane.f32.xlu1 %v2020_v3 }
0x19ae   :  { %v4430_v4 = vpop.eup %4429 }
0x19af   :  { %v2129_v5 = vsel %vm312_vm4, %v4430_v4, 0.0 }
0x19b0   :  { %2130 = vadd.xlane.f32.xlu1 %v2129_v5 }
0x19c1   :  { %2136 = vrot.lane.b32.xlu1 %v5035_v31, %s4478_s14 }
0x19c5   :  { %2283 = vrot.lane.b32.xlu1 %v5031_v28, %s5421_s22 }
0x1a35   :  { %v2022_v6 = vpop.xlane.xlu1 %2021 }
0x1a36   :  { %4431 = vrcp.f32 %v2022_v6 }
0x1a3d   :  { %v2131_v41 = vpop.xlane.xlu1 %2130 }
0x1a3e   :  { %4433 = vrcp.f32 %v2131_v41 }
0x1a40   :  { %v4432_v15 = vpop.eup %4431 }
0x1a41   :  { %v2024_v7 = vmul.f32 %v4432_v15, %v4428_v2  ;;  %v2137_v9 = vpop.permute.xlu1 %2136 }
0x1a42   :  { %v2142_v37 = vsel %vm328_vm3, %v2137_v9, 0 }
0x1a43   :  { %v2025_v35 = vpack.c.bf16 %v2024_v7, %v2024_v7 }
0x1a45   :  { %4128 = vmatmul.mubr.msk.bf16.vlgmr.msra.gmra.mrb[56].mxu1 %vm312_vm4, %v2025_v35  ;;  %v2284_v25 = vpop.permute.xlu1 %2283 }
0x1a46   :  { %4138 = vmatpush3.bf16.msra.mxu1 %v2142_v37  ;;  %4139 = vmatprep.mubr.msk.bf16.mxu1 %vm4475_vm1, %v4474_v42 }
0x1a47   :  { %4149 = vmatprep.subr.bf16.mxu1 %v4474_v42 }
0x1a48   :  { %v4434_v10 = vpop.eup %4433 }
0x1a49   :  { %v2133_v11 = vmul.f32 %v4434_v10, %v4430_v4 }
0x1a4b   :  { %v2134_v12 = vpack.c.bf16 %v2133_v11, %v2133_v11 }
0x1a4d   :  { %4140 = vmatmul.mubr.msk.bf16.vlgmr.msra.gmra.mrb[60].mxu1 %vm312_vm4, %v2134_v12 }
0x1a4e   :  { %4151 = vmatprep.mubr.msk.bf16.mxu1 %vm4475_vm1, %v4474_v42  ;;  %4150 = vmatpush3.bf16.msra.mxu1 %v5082_v13 }
0x1a4f   :  { %4161 = vmatprep.subr.bf16.mxu1 %v4474_v42 }
0x1b18   :  { %v2066_v55 = vpop.f32.mrb[56].mxu1 }
0x1b19   :  { %v2072_v16 = vpack.c.bf16 %v2066_v55, %v2066_v55  ;;  %v4129_v8 = vpop.f32.mrb[57].mxu1  ;;  %v5141_v55 = vpack.c.bf16 %v5033_v29, %v5033_v29 }
0x1b1a   :  { %v2069_v17 = vpop.f32.mrb[58].mxu1 }
0x1b1b   :  { %v4130_v18 = vpop.f32.mrb[59].mxu1  ;;  %4152 = vmatmul.mubr.msk.bf16.vlgmr.msra.gmra.mrb[64].mxu1 %vm265_vm2, %v2072_v16 }
0x1b1c   :  { %4163 = vmatprep.mubr.msk.bf16.mxu1 %vm4475_vm1, %v4474_v42 }
0x1b20   :  { %v2178_v21 = vpop.f32.mrb[60].mxu1 }
0x1b21   :  { %v2184_v22 = vpack.c.bf16 %v2178_v21, %v2178_v21  ;;  %v4141_v23 = vpop.f32.mrb[61].mxu1 }
0x1b22   :  { %v2181_v26 = vpop.f32.mrb[62].mxu1  ;;  %v5158_v23 = vld [vmem:[%s5387_s4 + $0x38] sm:$0xff]  }
0x1b23   :  { %v4142_v0 = vpop.f32.mrb[63].mxu1  ;;  %4146 = vmatmul.mubr.msk.bf16.vlgmr.msra.gmra.mrb[64].mxu0 %vm265_vm2, %v2184_v22 }
0x1b24   :  { %4156 = vmatpush3.bf16.xpose.msra.mxu0 %v2291_v24  ;;  %4157 = vmatprep.mubr.msk.bf16.mxu0 %vm4475_vm1, %v4474_v42 }
0x1b25   :  { %4167 = vmatprep.subr.bf16.mxu0 %v4474_v42 }
0x1b2b   :  { %4158 = vmatmul.mubr.msk.bf16.vlgmr.msra.gmra.mrb[68].mxu0 %vm265_vm2, %v2284_v25 }
0x1b2c   :  { %4169 = vmatprep.mubr.msk.bf16.mxu0 %vm4475_vm1, %v4474_v42 }
0x1bee   :  { %v2277_v27 = vpop.f32.mrb[64].mxu1 }
0x1bef   :  { %v4153_v30 = vpop.f32.mrb[65].mxu1 }
0x1bf0   :  { %v2280_v43 = vpop.f32.mrb[66].mxu1 }
0x1bf1   :  { %v4154_v46 = vpop.f32.mrb[67].mxu1 }
0x1bf6   :  { %v2228_v33 = vpop.f32.mrb[64].mxu0 }
0x1bf7   :  { %v5104_v44 = vadd.f32 %v2277_v27, %v2228_v33  ;;  %v4147_v34 = vpop.f32.mrb[65].mxu0 }
0x1bf8   :  { %v2231_v39 = vpop.f32.mrb[66].mxu0 }
0x1bf9   :  { %v4148_v40 = vpop.f32.mrb[67].mxu0  ;;  %v5180_v39 = vpack.c.bf16 %v5037_v32, %v5037_v32 }
0x1bfe   :  { %v2327_v38 = vpop.f32.mrb[68].mxu0 }
0x1bff   :  { %v2328_v45 = vadd.f32 %v2327_v38, %v4688_v1  ;;  %v4159_v47 = vpop.f32.mrb[69].mxu0 }
0x1c00   :  { %v2330_v48 = vpop.f32.mrb[70].mxu0 }
0x1c01   :  { %v4160_v49 = vpop.f32.mrb[71].mxu0  ;;  %v2333_v50 = vsel %vm312_vm4, %v2328_v45, -inf }
0x1c02   :  { %2334 = vmax.xlane.f32.xlu1 %v2333_v50  ;;  %v2672_v49 = vsel %vm328_vm3, %v5180_v39, 0 }
0x1c13   :  { %2345 = vrot.lane.b32.xlu1 %v5035_v31, %s5421_s22 }
0x1c17   :  { %2444 = vrot.lane.b32.xlu1 %v5031_v28, %s5422_s28 }
0x1c8f   :  { %v2335_v53 = vpop.xlane.xlu1 %2334 }
0x1c90   :  { %v2336_v54 = vsub.f32 %v2328_v45, %v2335_v53 }
0x1c92   :  { %v2337_v57 = vmul.f32 1.442695, %v2336_v54 }
0x1c93   :  { %v2346_v56 = vpop.permute.xlu1 %2345 }
0x1c94   :  { %4435 = vpow2.f32 %v2337_v57  ;;  %v2351_v58 = vsel %vm328_vm3, %v2346_v56, 0 }
0x1c95   :  { %4162 = vmatpush3.bf16.msra.mxu1 %v2351_v58 }
0x1c96   :  { %4173 = vmatprep.subr.bf16.mxu1 %v4474_v42 }
0x1c97   :  { %v2445_v4 = vpop.permute.xlu1 %2444 }
0x1c9e   :  { %v4436_v61 = vpop.eup %4435 }
0x1c9f   :  { %v2339_v51 = vsel %vm312_vm4, %v4436_v61, 0.0 }
0x1ca0   :  { %2340 = vadd.xlane.f32.xlu0 %v2339_v51 }
0x1cb6   :  { %2446 = vrot.lane.b32.xlu0 %v5031_v28, %s5423_s1  ;;  %v5128_v28 = vld [vmem:[%s5387_s4 + $0x30] sm:$0xff]  }
0x1cb7   :  { %4168 = vmatpush3.bf16.msra.mxu0 %v5128_v28 }
0x1cb8   :  { %4179 = vmatprep.subr.bf16.mxu0 %v4474_v42 }
0x1d2d   :  { %v2341_v59 = vpop.xlane.xlu0 %2340 }
0x1d2e   :  { %4437 = vrcp.f32 %v2341_v59 }
0x1d31   :  { %v2447_v63 = vpop.permute.xlu0 %2446 }
0x1d32   :  { %v2452_v3 = vsel %vm265_vm2, %v2447_v63, 0 }
0x1d38   :  { %v4438_v60 = vpop.eup %4437 }
0x1d39   :  { %v2343_v62 = vmul.f32 %v4438_v60, %v4436_v61 }
0x1d3b   :  { %v2344_v2 = vpack.c.bf16 %v2343_v62, %v2343_v62 }
0x1d3d   :  { %4164 = vmatmul.mubr.msk.bf16.vlgmr.msra.gmra.mrb[68].mxu1 %vm312_vm4, %v2344_v2 }
0x1d3e   :  { %4174 = vmatpush3.bf16.xpose.msra.mxu1 %v2452_v3  ;;  %4175 = vmatprep.mubr.msk.bf16.mxu1 %vm4475_vm1, %v4474_v42 }
0x1d3f   :  { %4185 = vmatprep.subr.bf16.mxu1 %v4474_v42 }
0x1d45   :  { %4176 = vmatmul.mubr.msk.bf16.vlgmr.msra.gmra.mrb[72].mxu1 %vm265_vm2, %v2445_v4 }
0x1d46   :  { %4187 = vmatprep.mubr.msk.bf16.mxu1 %vm4475_vm1, %v4474_v42  ;;  %4186 = vmatpush3.bf16.msra.mxu1 %v5158_v23 }
0x1d47   :  { %4197 = vmatprep.subr.bf16.mxu1 %v4474_v42 }
0x1e10   :  { %v2387_v5 = vpop.f32.mrb[68].mxu1 }
0x1e11   :  { %v2393_v6 = vpack.c.bf16 %v2387_v5, %v2387_v5  ;;  %v4165_v41 = vpop.f32.mrb[69].mxu1 }
0x1e12   :  { %v2390_v15 = vpop.f32.mrb[70].mxu1 }
0x1e13   :  { %v4166_v7 = vpop.f32.mrb[71].mxu1  ;;  %4170 = vmatmul.mubr.msk.bf16.vlgmr.msra.gmra.mrb[72].mxu0 %vm265_vm2, %v2393_v6 }
0x1e14   :  { %4181 = vmatprep.mubr.msk.bf16.mxu0 %vm4475_vm1, %v4474_v42 }
0x1e18   :  { %v2488_v9 = vpop.f32.mrb[72].mxu1 }
0x1e19   :  { %v2489_v35 = vadd.f32 %v2488_v9, %v4688_v1  ;;  %v4177_v37 = vpop.f32.mrb[73].mxu1 }
0x1e1a   :  { %v2491_v10 = vpop.f32.mrb[74].mxu1 }
0x1e1b   :  { %v4178_v11 = vpop.f32.mrb[75].mxu1  ;;  %v2494_v12 = vsel %vm312_vm4, %v2489_v35, -inf }
0x1e1c   :  { %2495 = vmax.xlane.f32.xlu1 %v2494_v12 }
0x1e2d   :  { %2506 = vrot.lane.b32.xlu1 %v5035_v31, %s5422_s28 }
0x1e31   :  { %2717 = vrot.lane.b32.xlu1 %v5141_v55, %s4476_s23 }
0x1e35   :  { %2715 = vrot.lane.b32.xlu1 %v5141_v55, %s4478_s14 }
0x1ea9   :  { %v2496_v1 = vpop.xlane.xlu1 %2495 }
0x1eaa   :  { %v2497_v16 = vsub.f32 %v2489_v35, %v2496_v1 }
0x1eac   :  { %v2498_v8 = vmul.f32 1.442695, %v2497_v16 }
0x1ead   :  { %v2507_v17 = vpop.permute.xlu1 %2506 }
0x1eae   :  { %4439 = vpow2.f32 %v2498_v8  ;;  %v2512_v18 = vsel %vm328_vm3, %v2507_v17, 0 }
0x1eaf   :  { %4180 = vmatpush3.bf16.msra.mxu0 %v2512_v18 }
0x1eb0   :  { %4191 = vmatprep.subr.bf16.mxu0 %v4474_v42 }
0x1eb1   :  { %v2718_v33 = vpop.permute.xlu1 %2717 }
0x1eb5   :  { %v2716_v34 = vpop.permute.xlu1 %2715 }
0x1eb8   :  { %v4440_v31 = vpop.eup %4439 }
0x1eb9   :  { %v2500_v29 = vsel %vm312_vm4, %v4440_v31, 0.0 }
0x1eba   :  { %2501 = vadd.xlane.f32.xlu0 %v2500_v29 }
0x1ed0   :  { %2608 = vrot.lane.b32.xlu0 %v5141_v55, %s4477_s24 }
0x1ee6   :  { %v2437_v52 = vpop.f32.mrb[72].mxu0 }
0x1ee7   :  { %v5153_v21 = vadd.f32 %v2437_v52, %v5104_v44  ;;  %v4171_v22 = vpop.f32.mrb[73].mxu0  ;;  %v2723_v44 = vsel %vm265_vm2, %v2718_v33, 0 }
0x1ee8   :  { %v2440_v26 = vpop.f32.mrb[74].mxu0 }
0x1ee9   :  { %v4172_v24 = vpop.f32.mrb[75].mxu0 }
0x1f47   :  { %v2502_v0 = vpop.xlane.xlu0 %2501 }
0x1f48   :  { %4441 = vrcp.f32 %v2502_v0 }
0x1f4b   :  { %v2609_v30 = vpop.permute.xlu0 %2608 }
0x1f4c   :  { %v2614_v46 = vsel %vm265_vm2, %v2609_v30, 0 }
0x1f52   :  { %v4442_v25 = vpop.eup %4441 }
0x1f53   :  { %v2504_v27 = vmul.f32 %v4442_v25, %v4440_v31 }
0x1f55   :  { %v2505_v43 = vpack.c.bf16 %v2504_v27, %v2504_v27 }
0x1f57   :  { %4182 = vmatmul.mubr.msk.bf16.vlgmr.msra.gmra.mrb[76].mxu0 %vm312_vm4, %v2505_v43 }
0x1f58   :  { %4192 = vmatpush3.bf16.xpose.msra.mxu0 %v2614_v46  ;;  %4193 = vmatprep.mubr.msk.bf16.mxu0 %vm4475_vm1, %v4474_v42 }
0x1f59   :  { %4203 = vmatprep.subr.bf16.mxu0 %v4474_v42 }
0x1f5f   :  { %4194 = vmatmul.mubr.msk.bf16.vlgmr.msra.gmra.mrb[80].mxu0 %vm265_vm2, %v5141_v55 }
0x1f60   :  { %4204 = vmatpush3.bf16.xpose.msra.mxu0 %v2723_v44  ;;  %4205 = vmatprep.mubr.msk.bf16.mxu0 %vm4475_vm1, %v4474_v42 }
0x1f61   :  { %4215 = vmatprep.subr.bf16.mxu0 %v4474_v42 }
0x1f67   :  { %4206 = vmatmul.mubr.msk.bf16.vlgmr.msra.gmra.mrb[84].mxu0 %vm265_vm2, %v2716_v34 }
0x1f68   :  { %4216 = vmatpush3.bf16.msra.mxu0 %v5088_v14  ;;  %4217 = vmatprep.mubr.msk.bf16.mxu0 %vm4475_vm1, %v4474_v42 }
0x1f69   :  { %4227 = vmatprep.subr.bf16.mxu0 %v4474_v42 }
0x202a   :  { %v2548_v40 = vpop.f32.mrb[76].mxu0 }
0x202b   :  { %v2554_v38 = vpack.c.bf16 %v2548_v40, %v2548_v40  ;;  %v4183_v45 = vpop.f32.mrb[77].mxu0 }
0x202c   :  { %v2551_v47 = vpop.f32.mrb[78].mxu0 }
0x202d   :  { %v4184_v48 = vpop.f32.mrb[79].mxu0  ;;  %4188 = vmatmul.mubr.msk.bf16.vlgmr.msra.gmra.mrb[76].mxu1 %vm265_vm2, %v2554_v38 }
0x202e   :  { %4198 = vmatpush3.bf16.msra.mxu1 %v2672_v49  ;;  %4199 = vmatprep.mubr.msk.bf16.mxu1 %vm4475_vm1, %v4474_v42 }
0x202f   :  { %4209 = vmatprep.subr.bf16.mxu1 %v4474_v42 }
0x2032   :  { %v2650_v14 = vpop.f32.mrb[80].mxu0 }
0x2033   :  { %v2651_v32 = vadd.f32 %v2650_v14, %v4820_v36  ;;  %v4195_v50 = vpop.f32.mrb[81].mxu0 }
0x2034   :  { %v2653_v53 = vpop.f32.mrb[82].mxu0 }
0x2035   :  { %v4196_v54 = vpop.f32.mrb[83].mxu0  ;;  %v2656_v57 = vsel %vm312_vm4, %v2651_v32, -inf }
0x2036   :  { %2657 = vmax.xlane.f32.xlu0 %v2656_v57 }
0x203a   :  { %v2759_v56 = vpop.f32.mrb[84].mxu0 }
0x203b   :  { %v2760_v58 = vadd.f32 %v2759_v56, %v4820_v36  ;;  %v4207_v61 = vpop.f32.mrb[85].mxu0 }
0x203c   :  { %v2762_v51 = vpop.f32.mrb[86].mxu0 }
0x203d   :  { %v4208_v59 = vpop.f32.mrb[87].mxu0  ;;  %v2765_v60 = vsel %vm312_vm4, %v2760_v58, -inf }
0x203e   :  { %2766 = vmax.xlane.f32.xlu1 %v2765_v60 }
0x204f   :  { %2778 = vrot.lane.b32.xlu1 %v5180_v39, %s4478_s14 }
0x2053   :  { %2913 = vrot.lane.b32.xlu1 %v5141_v55, %s5421_s22 }
0x20c3   :  { %v2658_v62 = vpop.xlane.xlu0 %2657 }
0x20c4   :  { %v2659_v63 = vsub.f32 %v2651_v32, %v2658_v62 }
0x20c6   :  { %v2660_v2 = vmul.f32 1.442695, %v2659_v63 }
0x20c8   :  { %4443 = vpow2.f32 %v2660_v2 }
0x20cb   :  { %v2767_v3 = vpop.xlane.xlu1 %2766 }
0x20cc   :  { %v2768_v4 = vsub.f32 %v2760_v58, %v2767_v3 }
0x20ce   :  { %v2769_v5 = vmul.f32 1.442695, %v2768_v4 }
0x20cf   :  { %v2779_v17 = vpop.permute.xlu1 %2778 }
0x20d0   :  { %4445 = vpow2.f32 %v2769_v5  ;;  %v2784_v31 = vsel %vm328_vm3, %v2779_v17, 0 }
0x20d2   :  { %v4444_v6 = vpop.eup %4443 }
0x20d3   :  { %v2662_v41 = vsel %vm312_vm4, %v4444_v6, 0.0  ;;  %v2914_v34 = vpop.permute.xlu1 %2913 }
0x20d4   :  { %2663 = vadd.xlane.f32.xlu0 %v2662_v41 }
0x20da   :  { %v4446_v15 = vpop.eup %4445 }
0x20db   :  { %v2771_v7 = vsel %vm312_vm4, %v4446_v15, 0.0 }
0x20dc   :  { %2772 = vadd.xlane.f32.xlu0 %v2771_v7 }
0x20f2   :  { %2915 = vrot.lane.b32.xlu0 %v5141_v55, %s4480_s27 }
0x2100   :  { %v2598_v9 = vpop.f32.mrb[76].mxu1 }
0x2101   :  { %v5201_v35 = vadd.f32 %v2598_v9, %v5153_v21  ;;  %v4189_v37 = vpop.f32.mrb[77].mxu1 }
0x2102   :  { %v2601_v10 = vpop.f32.mrb[78].mxu1 }
0x2103   :  { %v4190_v11 = vpop.f32.mrb[79].mxu1 }
0x2161   :  { %v2664_v12 = vpop.xlane.xlu0 %2663 }
0x2162   :  { %4447 = vrcp.f32 %v2664_v12 }
0x2169   :  { %v2773_v1 = vpop.xlane.xlu0 %2772 }
0x216a   :  { %4449 = vrcp.f32 %v2773_v1 }
0x216c   :  { %v4448_v16 = vpop.eup %4447 }
0x216d   :  { %v2666_v8 = vmul.f32 %v4448_v16, %v4444_v6  ;;  %v2916_v27 = vpop.permute.xlu0 %2915 }
0x216e   :  { %v2921_v33 = vsel %vm265_vm2, %v2916_v27, 0 }
0x216f   :  { %v2667_v18 = vpack.c.bf16 %v2666_v8, %v2666_v8 }
0x2171   :  { %4200 = vmatmul.mubr.msk.bf16.vlgmr.msra.gmra.mrb[80].mxu1 %vm312_vm4, %v2667_v18 }
0x2172   :  { %4210 = vmatpush3.bf16.msra.mxu1 %v2784_v31  ;;  %4211 = vmatprep.mubr.msk.bf16.mxu1 %vm4475_vm1, %v4474_v42 }
0x2173   :  { %4221 = vmatprep.subr.bf16.mxu1 %v4474_v42 }
0x2174   :  { %v4450_v29 = vpop.eup %4449 }
0x2175   :  { %v2775_v52 = vmul.f32 %v4450_v29, %v4446_v15 }
0x2177   :  { %v2776_v21 = vpack.c.bf16 %v2775_v52, %v2775_v52 }
0x2179   :  { %4212 = vmatmul.mubr.msk.bf16.vlgmr.msra.gmra.mrb[84].mxu1 %vm312_vm4, %v2776_v21 }
0x217a   :  { %4222 = vmatpush3.bf16.msra.mxu1 %v5082_v13  ;;  %4223 = vmatprep.mubr.msk.bf16.mxu1 %vm4475_vm1, %v4474_v42 }
0x217b   :  { %4233 = vmatprep.subr.bf16.mxu1 %v4474_v42 }
0x2244   :  { %v2708_v22 = vpop.f32.mrb[80].mxu1 }
0x2245   :  { %v2714_v26 = vpack.c.bf16 %v2708_v22, %v2708_v22  ;;  %v4201_v24 = vpop.f32.mrb[81].mxu1 }
0x2246   :  { %v2711_v0 = vpop.f32.mrb[82].mxu1 }
0x2247   :  { %v4202_v25 = vpop.f32.mrb[83].mxu1  ;;  %4224 = vmatmul.mubr.msk.bf16.vlgmr.msra.gmra.mrb[88].mxu1 %vm265_vm2, %v2714_v26 }
0x2248   :  { %4235 = vmatprep.mubr.msk.bf16.mxu1 %vm4475_vm1, %v4474_v42 }
0x224c   :  { %v2820_v30 = vpop.f32.mrb[84].mxu1 }
0x224d   :  { %v2826_v43 = vpack.c.bf16 %v2820_v30, %v2820_v30  ;;  %v4213_v46 = vpop.f32.mrb[85].mxu1 }
0x224e   :  { %v2823_v13 = vpop.f32.mrb[86].mxu1 }
0x224f   :  { %v4214_v44 = vpop.f32.mrb[87].mxu1  ;;  %4218 = vmatmul.mubr.msk.bf16.vlgmr.msra.gmra.mrb[88].mxu0 %vm265_vm2, %v2826_v43 }
0x2250   :  { %4228 = vmatpush3.bf16.xpose.msra.mxu0 %v2921_v33  ;;  %4229 = vmatprep.mubr.msk.bf16.mxu0 %vm4475_vm1, %v4474_v42 }
0x2251   :  { %4239 = vmatprep.subr.bf16.mxu0 %v4474_v42 }
0x2257   :  { %4230 = vmatmul.mubr.msk.bf16.vlgmr.msra.gmra.mrb[92].mxu0 %vm265_vm2, %v2914_v34 }
0x2258   :  { %4240 = vmatpush3.bf16.msra.mxu0 %v5128_v28  ;;  %4241 = vmatprep.mubr.msk.bf16.mxu0 %vm4475_vm1, %v4474_v42 }
0x2259   :  { %4251 = vmatprep.subr.bf16.mxu0 %v4474_v42 }
0x231a   :  { %v2907_v40 = vpop.f32.mrb[88].mxu1 }
0x231b   :  { %v4225_v38 = vpop.f32.mrb[89].mxu1 }
0x231c   :  { %v2910_v45 = vpop.f32.mrb[90].mxu1 }
0x231d   :  { %v4226_v47 = vpop.f32.mrb[91].mxu1 }
0x2322   :  { %v2864_v48 = vpop.f32.mrb[88].mxu0 }
0x2323   :  { %v5226_v49 = vadd.f32 %v2907_v40, %v2864_v48  ;;  %v4219_v14 = vpop.f32.mrb[89].mxu0 }
0x2324   :  { %v2867_v32 = vpop.f32.mrb[90].mxu0 }
0x2325   :  { %v4220_v50 = vpop.f32.mrb[91].mxu0 }
0x232a   :  { %v2957_v53 = vpop.f32.mrb[92].mxu0 }
0x232b   :  { %v2958_v54 = vadd.f32 %v2957_v53, %v4820_v36  ;;  %v4231_v57 = vpop.f32.mrb[93].mxu0 }
0x232c   :  { %v2960_v28 = vpop.f32.mrb[94].mxu0 }
0x232d   :  { %v4232_v56 = vpop.f32.mrb[95].mxu0  ;;  %v2963_v58 = vsel %vm312_vm4, %v2958_v54, -inf }
0x232e   :  { %2964 = vmax.xlane.f32.xlu1 %v2963_v58 }
0x233f   :  { %3070 = vrot.lane.b32.xlu1 %v5141_v55, %s5423_s1 }
0x2343   :  { %3068 = vrot.lane.b32.xlu1 %v5141_v55, %s5422_s28 }
0x23bb   :  { %v2965_v61 = vpop.xlane.xlu1 %2964 }
0x23bc   :  { %v2966_v51 = vsub.f32 %v2958_v54, %v2965_v61 }
0x23be   :  { %v2967_v59 = vmul.f32 1.442695, %v2966_v51 }
0x23bf   :  { %v3071_v5 = vpop.permute.xlu1 %3070 }
0x23c0   :  { %4451 = vpow2.f32 %v2967_v59  ;;  %v3076_v41 = vsel %vm265_vm2, %v3071_v5, 0 }
0x23c3   :  { %v3069_v15 = vpop.permute.xlu1 %3068 }
0x23ca   :  { %v4452_v60 = vpop.eup %4451 }
0x23cb   :  { %v2969_v62 = vsel %vm312_vm4, %v4452_v60, 0.0 }
0x23cc   :  { %2970 = vadd.xlane.f32.xlu0 %v2969_v62 }
0x23e2   :  { %2975 = vrot.lane.b32.xlu0 %v5180_v39, %s5421_s22 }
0x2459   :  { %v2971_v63 = vpop.xlane.xlu0 %2970 }
0x245a   :  { %4453 = vrcp.f32 %v2971_v63 }
0x245d   :  { %v2976_v2 = vpop.permute.xlu0 %2975 }
0x245e   :  { %v2981_v3 = vsel %vm328_vm3, %v2976_v2, 0  ;;  %v4363_v2 = vld [vmem:[%s5389_s8 + $0x20] sm:$0xff]  }
0x245f   :  { %4234 = vmatpush3.bf16.msra.mxu1 %v2981_v3  ;;  %v4365_v3 = vld [vmem:[%s5389_s8 + $0x30] sm:$0xff]  }
0x2460   :  { %4245 = vmatprep.subr.bf16.mxu1 %v4474_v42 }
0x2464   :  { %v4454_v55 = vpop.eup %4453 }
0x2465   :  { %v2973_v4 = vmul.f32 %v4454_v55, %v4452_v60  ;;  %v4366_v55 = vld [vmem:[%s5389_s8 + $0x38] sm:$0xff]  }
0x2467   :  { %v2974_v6 = vpack.c.bf16 %v2973_v4, %v2973_v4 }
0x2469   :  { %4236 = vmatmul.mubr.msk.bf16.vlgmr.msra.gmra.mrb[92].mxu1 %vm312_vm4, %v2974_v6 }
0x246a   :  { %4246 = vmatpush3.bf16.xpose.msra.mxu1 %v3076_v41  ;;  %4247 = vmatprep.mubr.msk.bf16.mxu1 %vm4475_vm1, %v4474_v42 }
0x246b   :  { %4257 = vmatprep.subr.bf16.mxu1 %v4474_v42 }
0x2471   :  { %4248 = vmatmul.mubr.msk.bf16.vlgmr.msra.gmra.mrb[96].mxu1 %vm265_vm2, %v3069_v15 }
0x2472   :  { %4258 = vmatpush3.bf16.msra.mxu1 %v5158_v23  ;;  %4259 = vmatprep.mubr.msk.bf16.mxu1 %vm4475_vm1, %v4474_v42 }
0x2473   :  { %4275 = vmatprep.subr.bf16.mxu1 %v4474_v42 }
0x253c   :  { %v3017_v7 = vpop.f32.mrb[92].mxu1 }
0x253d   :  { %v3023_v9 = vpack.c.bf16 %v3017_v7, %v3017_v7  ;;  %v4237_v37 = vpop.f32.mrb[93].mxu1 }
0x253e   :  { %v3020_v10 = vpop.f32.mrb[94].mxu1 }
0x253f   :  { %v4238_v11 = vpop.f32.mrb[95].mxu1  ;;  %4242 = vmatmul.mubr.msk.bf16.vlgmr.msra.gmra.mrb[96].mxu0 %vm265_vm2, %v3023_v9  ;;  %v3783_v10 = vld [vmem:[%s5390_s6 + $0x1] ss:$0 sm:$0xff] }
0x2540   :  { %4253 = vmatprep.mubr.msk.bf16.mxu0 %vm4475_vm1, %v4474_v42 }
0x2544   :  { %v3112_v12 = vpop.f32.mrb[96].mxu1 }
0x2545   :  { %v3113_v1 = vadd.f32 %v3112_v12, %v4820_v36  ;;  %v4249_v16 = vpop.f32.mrb[97].mxu1  ;;  %v3780_v36 = vld [vmem:[%s5388_s5 + $0x1] ss:$0 sm:$0xff] }
0x2546   :  { %v3115_v23 = vpop.f32.mrb[98].mxu1  ;;  %v3231_v22 = vadd.f32 %v3780_v36, %v5201_v35  ;;  %v3784_v16 = vld [vmem:[%s5391_s7 + $0x1] ss:$0 sm:$0xff] }
0x2547   :  { %v4250_v8 = vpop.f32.mrb[99].mxu1  ;;  %v3118_v17 = vsel %vm312_vm4, %v3113_v1, -inf }
0x2548   :  { %3119 = vmax.xlane.f32.xlu0 %v3118_v17 }
0x255e   :  { %3130 = vrot.lane.b32.xlu0 %v5180_v39, %s5422_s28  ;;  %v3233_v39 = vadd.f32 %v3231_v22, %v5017_v19  ;;  %v4372_v22 = vld [vmem:[%s5392_s10 + $0x68] sm:$0xff]  }
0x2560   :  { %v3239_v0 = vsel %vm72_vm0, %v3233_v39, 0.0 }
0x25d5   :  { %v3120_v18 = vpop.xlane.xlu0 %3119 }
0x25d6   :  { %v3121_v31 = vsub.f32 %v3113_v1, %v3120_v18 }
0x25d8   :  { %v3122_v29 = vmul.f32 1.442695, %v3121_v31  ;;  %v4367_v31 = vld [vmem:[%s5392_s10 + $0x40] sm:$0xff]  }
0x25d9   :  { %v3131_v52 = vpop.permute.xlu0 %3130 }
0x25da   :  { %4455 = vpow2.f32 %v3122_v29  ;;  %v3136_v21 = vsel %vm328_vm3, %v3131_v52, 0  ;;  %v4368_v29 = vld [vmem:[%s5392_s10 + $0x48] sm:$0xff]   ;;  %v4369_v52 = vld [vmem:[%s5392_s10 + $0x50] sm:$0xff]  }
0x25db   :  { %4252 = vmatpush3.bf16.msra.mxu0 %v3136_v21  ;;  %v4370_v21 = vld [vmem:[%s5392_s10 + $0x58] sm:$0xff]  }
0x25dc   :  { %4263 = vmatprep.subr.bf16.mxu0 %v4474_v42 }
0x25e4   :  { %v4456_v26 = vpop.eup %4455 }
0x25e5   :  { %v3124_v24 = vsel %vm312_vm4, %v4456_v26, 0.0 }
0x25e6   :  { %3125 = vadd.xlane.f32.xlu1 %v3124_v24  ;;  %v4374_v24 = vld [vmem:[%s5392_s10 + $0x78] sm:$0xff]  }
0x25ea   :  { %3240 = vadd.xlane.f32.xlu1 %v3239_v0 }
0x2612   :  { %v3061_v25 = vpop.f32.mrb[96].mxu0 }
0x2613   :  { %v3067_v27 = vadd.f32 %v3061_v25, %v5226_v49  ;;  %v4243_v30 = vpop.f32.mrb[97].mxu0 }
0x2614   :  { %v3064_v43 = vpop.f32.mrb[98].mxu0 }
0x2615   :  { %v4244_v46 = vpop.f32.mrb[99].mxu0 }
0x2673   :  { %v3126_v13 = vpop.xlane.xlu1 %3125 }
0x2674   :  { %4457 = vrcp.f32 %v3126_v13 }
0x2677   :  { %v3241_v47 = vpop.xlane.xlu1 %3240 }
0x2678   :  { %v3245_v48 = vmul.f32 0.015625, %v3241_v47 }
0x267a   :  { %v3247_v53 = vsub.f32 %v3233_v39, %v3245_v48  ;;  %v3786_v39 = vld [vmem:[%s5393_s9 + $0x1] ss:$0 sm:$0xff] }
0x267c   :  { %v3249_v58 = vmul.f32 %v3247_v53, %v3247_v53 }
0x267e   :  { %v4458_v33 = vpop.eup %4457  ;;  %v3251_v61 = vsel %vm72_vm0, %v3249_v58, 0.0 }
0x267f   :  { %v3128_v44 = vmul.f32 %v4458_v33, %v4456_v26  ;;  %v4373_v26 = vld [vmem:[%s5392_s10 + $0x70] sm:$0xff]  }
0x2681   :  { %v3129_v35 = vpack.c.bf16 %v3128_v44, %v3128_v44 }
0x2683   :  { %4254 = vmatmul.mubr.msk.bf16.vlgmr.msra.gmra.mrb[100].mxu0 %vm312_vm4, %v3129_v35 }
0x2684   :  { %4271 = vmatprep.mubr.msk.bf16.mxu0 %vm4475_vm1, %v4474_v42  ;;  %4264 = vmatpush3.bf16.msra.mxu0 %v4363_v2 }
0x2685   :  { %4265 = vmatprep.subr.bf16.mxu0 %v4474_v42 }
0x2756   :  { %v3172_v19 = vpop.f32.mrb[100].mxu0 }
0x2757   :  { %v3178_v34 = vpack.c.bf16 %v3172_v19, %v3172_v19  ;;  %v4255_v40 = vpop.f32.mrb[101].mxu0 }
0x2758   :  { %v3175_v38 = vpop.f32.mrb[102].mxu0 }
0x2759   :  { %v4256_v45 = vpop.f32.mrb[103].mxu0  ;;  %4260 = vmatmul.mubr.msk.bf16.vlgmr.msra.gmra.mrb[100].mxu1 %vm265_vm2, %v3178_v34 }
0x275a   :  { %4291 = vmatprep.mubr.msk.bf16.mxu1 %vm4475_vm1, %v4474_v42  ;;  %4276 = vmatpush3.bf16.msra.mxu1 %v4367_v31 }
0x275b   :  { %4277 = vmatprep.subr.bf16.mxu1 %v4474_v42 }
0x275e   :  { %4278 = vmatpush3.bf16.msra.mxu1 %v4368_v29 }
0x275f   :  { %4279 = vmatprep.subr.bf16.mxu1 %v4474_v42 }
0x2762   :  { %4280 = vmatpush3.bf16.msra.mxu1 %v4369_v52 }
0x2763   :  { %4281 = vmatprep.subr.bf16.mxu1 %v4474_v42 }
0x2766   :  { %4282 = vmatpush3.bf16.msra.mxu1 %v4370_v21  ;;  %v3804_v21 = vld [vmem:[%s5395_s12 + $0x1] ss:$0 sm:$0xff] }
0x2767   :  { %4283 = vmatprep.subr.bf16.mxu1 %v4474_v42 }
0x282c   :  { %v3216_v49 = vpop.f32.mrb[100].mxu1 }
0x282d   :  { %v3222_v14 = vadd.f32 %v3216_v49, %v3067_v27  ;;  %v4261_v32 = vpop.f32.mrb[101].mxu1 }
0x282e   :  { %v3219_v50 = vpop.f32.mrb[102].mxu1 }
0x282f   :  { %v3232_v54 = vadd.f32 %v3780_v36, %v3222_v14  ;;  %v4262_v57 = vpop.f32.mrb[103].mxu1  ;;  %v4371_v36 = vld [vmem:[%s5392_s10 + $0x60] sm:$0xff]  }
0x2830   :  { %4284 = vmatpush3.bf16.msra.mxu1 %v4371_v36 }
0x2831   :  { %v3234_v28 = vadd.f32 %v3232_v54, %v5019_v20  ;;  %v4364_v20 = vld [vmem:[%s5389_s8 + $0x28] sm:$0xff]   ;;  %4285 = vmatprep.subr.bf16.mxu1 %v4474_v42 }
0x2832   :  { %4266 = vmatpush3.bf16.msra.mxu0 %v4364_v20 }
0x2833   :  { %v3242_v56 = vsel %vm72_vm0, %v3234_v28, 0.0  ;;  %4267 = vmatprep.subr.bf16.mxu0 %v4474_v42 }
0x2834   :  { %3243 = vadd.xlane.f32.xlu1 %v3242_v56  ;;  %4286 = vmatpush3.bf16.msra.mxu1 %v4372_v22  ;;  %v3793_v56 = vld [vmem:[%s5394_s11 + $0x1] ss:$0 sm:$0xff] }
0x2835   :  { %4287 = vmatprep.subr.bf16.mxu1 %v4474_v42  ;;  %v3805_v22 = vld [vmem:[%s5396_s13 + $0x1] ss:$0 sm:$0xff] }
0x2836   :  { %4268 = vmatpush3.bf16.msra.mxu0 %v4365_v3 }
0x2837   :  { %4269 = vmatprep.subr.bf16.mxu0 %v4474_v42 }
0x2838   :  { %3252 = vadd.xlane.f32.xlu1 %v3251_v61  ;;  %4288 = vmatpush3.bf16.msra.mxu1 %v4373_v26 }
0x2839   :  { %4289 = vmatprep.subr.bf16.mxu1 %v4474_v42 }
0x283a   :  { %4270 = vmatpush3.bf16.msra.mxu0 %v4366_v55 }
0x283b   :  { %4295 = vmatprep.subr.bf16.mxu0 %v4474_v42 }
0x283c   :  { %4290 = vmatpush3.bf16.msra.mxu1 %v4374_v24 }
0x28c1   :  { %v3244_v51 = vpop.xlane.xlu1 %3243 }
0x28c2   :  { %v3246_v59 = vmul.f32 0.015625, %v3244_v51 }
0x28c4   :  { %v3248_v60 = vsub.f32 %v3234_v28, %v3246_v59 }
0x28c5   :  { %v3253_v4 = vpop.xlane.xlu1 %3252 }
0x28c6   :  { %v3250_v62 = vmul.f32 %v3248_v60, %v3248_v60  ;;  %v3257_v5 = vmul.f32 0.015625, %v3253_v4 }
0x28c8   :  { %v3254_v63 = vsel %vm72_vm0, %v3250_v62, 0.0  ;;  %v3259_v6 = vadd.f32 1e-12, %v3257_v5 }
0x28c9   :  { %3255 = vadd.xlane.f32.xlu1 %v3254_v63 }
0x28ca   :  { %4459 = vrsqrt.f32 %v3259_v6 }
0x28d4   :  { %v4460_v9 = vpop.eup %4459 }
0x28d5   :  { %v3263_v37 = vmul.f32 %v4460_v9, %v3247_v53 }
0x28d7   :  { %v3271_v12 = vmul.f32 %v3783_v10, %v3263_v37 }
0x28d9   :  { %v3279_v8 = vadd.f32 %v3784_v16, %v3271_v12  ;;  %v4376_v12 = vld [vmem:[%s5397_s16 + $0x8] sm:$0xff]  }
0x2956   :  { %v3256_v41 = vpop.xlane.xlu1 %3255 }
0x2957   :  { %v3258_v15 = vmul.f32 0.015625, %v3256_v41 }
0x2959   :  { %v3260_v7 = vadd.f32 1e-12, %v3258_v15 }
0x295b   :  { %4461 = vrsqrt.f32 %v3260_v7 }
0x2965   :  { %v4462_v11 = vpop.eup %4461 }
0x2966   :  { %v3264_v1 = vmul.f32 %v4462_v11, %v3248_v60  ;;  %v4375_v11 = vld [vmem:[%s5397_s16] sm:$0xff]  }
0x2968   :  { %v3272_v23 = vmul.f32 %v3783_v10, %v3264_v1  ;;  %v4377_v1 = vld [vmem:[%s5397_s16 + $0x10] sm:$0xff]  }
0x296a   :  { %v5298_v17 = vadd.f32 %v3784_v16, %v3272_v23  ;;  %v4378_v16 = vld [vmem:[%s5397_s16 + $0x18] sm:$0xff]  }
0x296c   :  { %v3281_v18 = vpack.c.bf16 %v5298_v17, %v3279_v8 }
0x296e   :  { %4272 = vmatmul.mubr.msk.bf16.vlgmr.msra.gmra.mrb[104].mxu0 %vm72_vm0, %v3281_v18 }
0x296f   :  { %4303 = vmatprep.mubr.msk.bf16.mxu0 %vm4475_vm1, %v4474_v42  ;;  %4296 = vmatpush3.bf16.msra.mxu0 %v4375_v11 }
0x2970   :  { %4297 = vmatprep.subr.bf16.mxu0 %v4474_v42 }
0x2973   :  { %4298 = vmatpush3.bf16.msra.mxu0 %v4376_v12 }
0x2974   :  { %4299 = vmatprep.subr.bf16.mxu0 %v4474_v42 }
0x2977   :  { %4300 = vmatpush3.bf16.msra.mxu0 %v4377_v1 }
0x2978   :  { %4301 = vmatprep.subr.bf16.mxu0 %v4474_v42 }
0x297b   :  { %4302 = vmatpush3.bf16.msra.mxu0 %v4378_v16 }
0x2a41   :  { %v3351_v0 = vpop.f32.mrb[104].mxu0 }
0x2a42   :  { %v3352_v25 = vadd.f32 %v3786_v39, %v3351_v0  ;;  %v4273_v27 = vpop.f32.mrb[105].mxu0 }
0x2a43   :  { %v3354_v30 = vpop.f32.mrb[106].mxu0 }
0x2a44   :  { %v3360_v43 = vmul.f32 0.044715, %v3352_v25  ;;  %v3355_v46 = vadd.f32 %v3786_v39, %v3354_v30  ;;  %v4274_v13 = vpop.f32.mrb[107].mxu0  ;;  %v3358_v32 = vmul.f32 0.5, %v3352_v25 }
0x2a45   :  { %v25_v13 = vstv %s5398_s19 }
0x2a46   :  { %v3362_v33 = vmul.f32 %v3360_v43, %v3352_v25  ;;  %v3361_v44 = vmul.f32 0.044715, %v3355_v46  ;;  %v3359_v50 = vmul.f32 0.5, %v3355_v46  ;;  %26 = vst [vmem:[#allocation2] sm:$0x1] %v25_v13 }
0x2a48   :  { %v3364_v35 = vmul.f32 %v3362_v33, %v3352_v25  ;;  %v3363_v19 = vmul.f32 %v3361_v44, %v3355_v46  ;;  %v3806_v33 = vld [vmem:[%s5399_s17] ss:$0 sm:$0xff] }
0x2a4a   :  { %v3366_v34 = vadd.f32 %v3364_v35, %v3352_v25  ;;  %v3365_v40 = vmul.f32 %v3363_v19, %v3355_v46 }
0x2a4c   :  { %v3368_v38 = vmul.f32 0.7978846, %v3366_v34  ;;  %v3367_v45 = vadd.f32 %v3365_v40, %v3355_v46 }
0x2a4e   :  { %4463 = vtanh.f32 %v3368_v38  ;;  %v3369_v47 = vmul.f32 0.7978846, %v3367_v45  ;;  %v3812_v38 = vld [vmem:[%s5400_s18] ss:$0 sm:$0xff] }
0x2a50   :  { %4465 = vtanh.f32 %v3369_v47 }
0x2a58   :  { %v4464_v48 = vpop.eup %4463 }
0x2a59   :  { %v3372_v49 = vadd.f32 1.0, %v4464_v48 }
0x2a5a   :  { %v4466_v14 = vpop.eup %4465 }
0x2a5b   :  { %v3373_v53 = vadd.f32 1.0, %v4466_v14  ;;  %v3374_v54 = vmul.f32 %v3372_v49, %v3358_v32  ;;  %v3813_v49 = vld [vmem:[#allocation2] ss:$0 sm:$0xff] }
0x2a5d   :  { %v3375_v57 = vmul.f32 %v3373_v53, %v3359_v50 }
0x2a5f   :  { %v3376_v28 = vpack.c.bf16 %v3375_v57, %v3374_v54 }
0x2a61   :  { %4292 = vmatmul.mubr.bf16.vlgmr.msra.gmra.mrb[104].mxu1 %v3376_v28 }
0x2b34   :  { %v3467_v58 = vpop.f32.mrb[104].mxu1 }
0x2b35   :  { %v3468_v61 = vadd.f32 %v3793_v56, %v3467_v58  ;;  %v4293_v51 = vpop.f32.mrb[105].mxu1 }
0x2b36   :  { %v3470_v59 = vpop.f32.mrb[106].mxu1 }
0x2b37   :  { %v3474_v60 = vadd.f32 %v3468_v61, %v3279_v8  ;;  %v3471_v62 = vadd.f32 %v3793_v56, %v3470_v59  ;;  %v4294_v63 = vpop.f32.mrb[107].mxu1 }
0x2b39   :  { %v3480_v2 = vsel %vm72_vm0, %v3474_v60, 0.0  ;;  %v3475_v20 = vadd.f32 %v3471_v62, %v5298_v17 }
0x2b3a   :  { %3481 = vadd.xlane.f32.xlu1 %v3480_v2 }
0x2b3b   :  { %v3483_v3 = vsel %vm72_vm0, %v3475_v20, 0.0 }
0x2b3c   :  { %3484 = vadd.xlane.f32.xlu0 %v3483_v3 }
0x2bc7   :  { %v3482_v55 = vpop.xlane.xlu1 %3481 }
0x2bc8   :  { %v3486_v4 = vmul.f32 0.015625, %v3482_v55 }
0x2bc9   :  { %v3485_v5 = vpop.xlane.xlu0 %3484 }
0x2bca   :  { %v3487_v6 = vmul.f32 0.015625, %v3485_v5  ;;  %v3488_v41 = vsub.f32 %v3474_v60, %v3486_v4 }
0x2bcc   :  { %v3489_v15 = vsub.f32 %v3475_v20, %v3487_v6  ;;  %v3490_v37 = vmul.f32 %v3488_v41, %v3488_v41 }
0x2bce   :  { %v3491_v7 = vmul.f32 %v3489_v15, %v3489_v15  ;;  %v3492_v10 = vsel %vm72_vm0, %v3490_v37, 0.0 }
0x2bd0   :  { %v3495_v9 = vsel %vm72_vm0, %v3491_v7, 0.0 }
0x2bd1   :  { %3496 = vadd.xlane.f32.xlu1 %v3495_v9 }
0x2bd5   :  { %3493 = vadd.xlane.f32.xlu1 %v3492_v10 }
0x2c5e   :  { %v3497_v23 = vpop.xlane.xlu1 %3496 }
0x2c5f   :  { %v3499_v8 = vmul.f32 0.015625, %v3497_v23 }
0x2c61   :  { %v3501_v17 = vadd.f32 1e-12, %v3499_v8 }
0x2c62   :  { %v3494_v18 = vpop.xlane.xlu1 %3493 }
0x2c63   :  { %4467 = vrsqrt.f32 %v3501_v17  ;;  %v3498_v31 = vmul.f32 0.015625, %v3494_v18 }
0x2c65   :  { %v3500_v29 = vadd.f32 1e-12, %v3498_v31 }
0x2c67   :  { %4469 = vrsqrt.f32 %v3500_v29 }
0x2c6d   :  { %v4468_v52 = vpop.eup %4467 }
0x2c6e   :  { %v3505_v36 = vmul.f32 %v4468_v52, %v3489_v15 }
0x2c70   :  { %v3513_v42 = vmul.f32 %v3804_v21, %v3505_v36 }
0x2c71   :  { %v4470_v26 = vpop.eup %4469 }
0x2c72   :  { %v3521_v24 = vadd.f32 %v3805_v22, %v3513_v42  ;;  %v3504_v39 = vmul.f32 %v4470_v26, %v3488_v41 }
0x2c74   :  { %v3512_v0 = vmul.f32 %v3804_v21, %v3504_v39  ;;  %v3523_v25 = vrot.slane %v3521_v24, 7 }
0x2c76   :  { %v3520_v27 = vadd.f32 %v3805_v22, %v3512_v0 }
0x2c78   :  { %v3526_v30 = vsel %vm3525_vm5, %v3520_v27, %v3523_v25 }
0x2c79   :  { %v3528_v43 = vsel %vm3527_vm6, %v3526_v30, 0.0 }
0x2c7a   :  { %v3529_v46 = vpack.c.bf16 %v3528_v43, %v3528_v43 }
0x2c7c   :  { %4304 = vmatmul.mubr.msk.bf16.vlgmr.msra.gmra.mrb[108].mxu0 %vm72_vm0, %v3529_v46 }
0x2d4f   :  { %v3606_v44 = vpop.f32.mrb[108].mxu0 }
0x2d50   :  { %v3607_v35 = vadd.f32 %v3806_v33, %v3606_v44  ;;  %v4305_v19 = vpop.f32.mrb[109].mxu0 }
0x2d51   :  { %v3609_v34 = vpop.f32.mrb[110].mxu0 }
0x2d52   :  { %4471 = vtanh.f32 %v3607_v35  ;;  %v4306_v40 = vpop.f32.mrb[111].mxu0 }
0x2d5c   :  { %v4472_v45 = vpop.eup %4471 }
0x2d5d   :  { %v3620_v47 = vmul.f32 %v4472_v45, %v3812_v38 }
0x2d5f   :  { %v3621_v48 = vsel %vm72_vm0, %v3620_v47, 0.0 }
0x2d60   :  { %3622 = vadd.xlane.f32.xlu1 %v3621_v48 }
0x2ded   :  { %v3623_v14 = vpop.xlane.xlu1 %3622 }
0x2dee   :  { %v3631_v32 = vadd.f32 %v3813_v49, %v3623_v14 }
0x2df0   :  { %3634 = vperm.xlu1 %4317, %v3631_v32  }
0x2e6f   :  { %v3635_v50 = vpop.permute.xlu1 %3634 }
0x2e70   :  { %3637 = vst [vmem:[%s5401_s20] sm:$0xff] %v3635_v50 }

</bundles_post_ra>
